<compile_context>
chip_gen: v5e
topology: v5e:2x2
jax: 0.10.0
libtpu: 0.0.40
codegen_flags: <defaults>
</compile_context>

<pallas_src>
import functools
import numpy as np
import jax
import jax.numpy as jnp
from jax.experimental import pallas as pl
from jax.experimental.pallas import tpu as pltpu

NEG_SLOPE = 0.01      # nn.LeakyReLU default negative_slope
EPS = 1e-5            # nn.InstanceNorm2d default eps (affine=False, biased var)
MXU_MIN_CIN = 8       # below this, the per-tap contraction stays on the VPU


def _spade_kernel(x_ref, cg_ref, mask_ref, ws_ref, bs_ref, wgb_ref, bgb_ref,
                  o_ref, *, H, W):
    Wp = W + 2                      # padded row width
    GUARD = Wp + 1                  # flat zero guard so all taps slice in-bounds
    HW = H * W
    out_ch = x_ref.shape[0]
    CLEN_P = x_ref.shape[1]         # lane-padded output length (multiple of 128)
    SLEN = mask_ref.shape[1]        # lane-padded share length (multiple of 128)

    # ---- InstanceNorm2d(x): one-pass stats.  Every lane outside the HW valid
    # pixels (ring + trailing pad) is an exact zero, so sum-x / sum-x^2 over
    # the full lane-padded row need no correction terms.
    x = x_ref[...]                                     # (out_ch, CLEN_P)
    inv_n = 1.0 / HW
    s1 = jnp.sum(x, axis=1, keepdims=True)             # (out_ch, 1)
    s2 = jnp.sum(x * x, axis=1, keepdims=True)
    mu = s1 * inv_n
    var = s2 * inv_n - mu * mu                         # biased variance
    norm = (x - mu) * jax.lax.rsqrt(var + EPS)         # non-valid lanes garbage; dropped

    def conv3x3(src, out_len, w, b):
        """3x3 'same' conv over the flattened padded layout.

        src:  (cin, out_len + 2*GUARD) value; element j is padded-layout
              position (j - GUARD) relative to the output domain.
        w:    (cout, 9*cin) value, column = (3*ky + kx)*cin + ci  (HWIO order)
        b:    (cout, 1) value
        returns (cout, out_len) f32 value
        """
        cin = src.shape[0]
        cout = w.shape[0]
        acc = jnp.zeros((cout, out_len), jnp.float32)
        for ky in range(3):
            for kx in range(3):
                s0 = ky * Wp + kx                      # in-bounds contiguous lane slice
                win = src[:, s0:s0 + out_len]          # (cin, out_len)
                tap = 3 * ky + kx
                if cin >= MXU_MIN_CIN:
                    # Per-tap MXU matmul: (cout, cin) x (cin, out_len).
                    # TODO(synk): bf16 operands on v6e/v7x for MXU peak.
                    w_tap = w[:, tap * cin:(tap + 1) * cin]
                    acc = acc + jnp.dot(w_tap, win,
                                        preferred_element_type=jnp.float32)
                else:
                    # Tiny Cin: broadcast FMAs on the VPU (MXU would be idle K).
                    for ci in range(cin):
                        col = tap * cin + ci
                        acc = acc + w[:, col:col + 1] * win[ci:ci + 1, :]
        return acc + b

    # ---- c_share: conv3x3 + LeakyReLU over the share domain -----------------
    share = conv3x3(cg_ref[...], SLEN, ws_ref[...], bs_ref[...])   # (out_ch, SLEN)
    share = jnp.where(share > 0, share, NEG_SLOPE * share)
    share = share * mask_ref[...]                                  # re-zero ring / pad lanes

    # ---- gamma & beta fused into one conv pass (2*out_ch output rows) -------
    gb = conv3x3(share, CLEN_P, wgb_ref[...], bgb_ref[...])        # (2*out_ch, CLEN_P)
    gamma = gb[:out_ch, :]
    beta = gb[out_ch:, :]

    # ---- norm * (1 + gamma) + beta : full, lane-dense store -----------------
    o_ref[...] = norm * (1.0 + gamma) + beta


def _bilinear_matrix(out_size, in_size):
    """Row-resampling matrix matching F.interpolate(mode='bilinear', align_corners=False)."""
    m = np.zeros((out_size, in_size), np.float32)
    scale = in_size / out_size
    for o in range(out_size):
        src = max((o + 0.5) * scale - 0.5, 0.0)
        i0 = min(int(np.floor(src)), in_size - 1)
        i1 = min(i0 + 1, in_size - 1)
        frac = src - i0
        m[o, i0] += 1.0 - frac
        m[o, i1] += frac
    return jnp.asarray(m)


def _round_up(n, m=128):
    return ((n + m - 1) // m) * m


def spade_forward(x, c, params):
    """x: (B, out_ch, H, W) NCHW, c: (B, in_ch, Hc, Wc) NCHW -> (B, out_ch, H, W)."""
    B, out_ch, H, W = x.shape
    _, in_ch, Hc, Wc = c.shape
    Wp, Hp = W + 2, H + 2
    PADLEN = Hp * Wp                       # ring-padded image, flattened
    GUARD = Wp + 1
    CLEN = PADLEN - 2 * GUARD              # trimmed domain aligned with x / output
    CLEN_P = _round_up(CLEN)               # lane-dense output length
    SLEN = _round_up(CLEN_P + 2 * GUARD)   # share length (covers all gamma/beta taps)
    GLEN = _round_up(SLEN + 2 * GUARD)     # guarded c length (covers all share taps)
    f32 = jnp.float32

    # TODO(synk): bilinear resize kept as plain-JAX glue (two tiny precomputed
    # resampling matmuls); all conv/norm/elementwise compute is in the kernel.
    rh = _bilinear_matrix(H, Hc)
    rw = _bilinear_matrix(W, Wc)
    c_rs = jnp.einsum('hH,wW,bcHW->bchw', rh, rw, c.astype(f32),
                      precision=jax.lax.Precision.HIGHEST)       # (B, in_ch, H, W)

    # Zero ring pad + flat guards; everything stays NCHW-flattened.
    c_p = jnp.pad(c_rs, ((0, 0), (0, 0), (1, 1), (1, 1))).reshape(B, in_ch, PADLEN)
    c_g = jnp.pad(c_p, ((0, 0), (0, 0), (GUARD, GLEN - GUARD - PADLEN)))   # (B, in_ch, GLEN)

    x_p = jnp.pad(x.astype(f32), ((0, 0), (0, 0), (1, 1), (1, 1))).reshape(B, out_ch, PADLEN)
    x_k = x_p[:, :, GUARD:GUARD + CLEN]
    x_k = jnp.pad(x_k, ((0, 0), (0, 0), (0, CLEN_P - CLEN)))                # (B, out_ch, CLEN_P)

    # Interior (non-ring, non-pad) mask over the share layout.
    q = np.arange(SLEN)
    yp, xp = q // Wp, q % Wp
    interior = ((q < PADLEN) & (yp >= 1) & (yp <= H)
                & (xp >= 1) & (xp <= W)).astype(np.float32)
    mask = jnp.asarray(interior).reshape(1, SLEN)

    # Weights packed channels-on-sublanes: (cout, 9*cin), col = (3*ky+kx)*cin + ci.
    ws = jnp.transpose(params['w_share'].reshape(9 * in_ch, out_ch))
    wg = jnp.transpose(params['w_gamma'].reshape(9 * out_ch, out_ch))
    wb = jnp.transpose(params['w_beta'].reshape(9 * out_ch, out_ch))
    wgb = jnp.concatenate([wg, wb], axis=0)                       # (2*out_ch, 9*out_ch)
    bs = params['b_share'].reshape(out_ch, 1)
    bgb = jnp.concatenate([params['b_gamma'], params['b_beta']]).reshape(2 * out_ch, 1)

    kernel = functools.partial(_spade_kernel, H=H, W=W)

    # TODO(synk): add a row-block grid axis over H (1-row halo) for v7x
    # megacore usage at small B and to bound VMEM at production sizes.
    out = pl.pallas_call(
        kernel,
        out_shape=jax.ShapeDtypeStruct((B, out_ch, CLEN_P), f32),
        grid=(B,),
        in_specs=[
            pl.BlockSpec((None, out_ch, CLEN_P), lambda b: (b, 0, 0)),   # x (trimmed, lane-padded)
            pl.BlockSpec((None, in_ch, GLEN), lambda b: (b, 0, 0)),      # guarded padded c
            pl.BlockSpec((1, SLEN), lambda b: (0, 0)),                   # ring/pad mask
            pl.BlockSpec((out_ch, 9 * in_ch), lambda b: (0, 0)),         # w_share
            pl.BlockSpec((out_ch, 1), lambda b: (0, 0)),                 # b_share
            pl.BlockSpec((2 * out_ch, 9 * out_ch), lambda b: (0, 0)),    # w_gamma|w_beta fused
            pl.BlockSpec((2 * out_ch, 1), lambda b: (0, 0)),             # b_gamma|b_beta fused
        ],
        out_specs=pl.BlockSpec((None, out_ch, CLEN_P), lambda b: (b, 0, 0)),
        compiler_params=pltpu.CompilerParams(
            dimension_semantics=("parallel",),          # batch axis -> 2 TCs on v7x
            vmem_limit_bytes=32 * 1024 * 1024),
    )(x_k, c_g, mask, ws, bs, wgb, bgb)

    # Unpack: output element q corresponds to padded position q + GUARD, i.e.
    # pixel (q // Wp, q % Wp) with q % Wp < W.
    need = H * Wp
    if CLEN_P >= need:
        out_flat = out[:, :, :need]
    else:
        out_flat = jnp.pad(out, ((0, 0), (0, 0), (0, need - CLEN_P)))
    return out_flat.reshape(B, out_ch, H, Wp)[:, :, :, :W]


def spade_reference(x, c, params):
    """Pure-JAX reference for the PyTorch forward (NCHW)."""
    B, out_ch, H, W = x.shape
    _, in_ch, Hc, Wc = c.shape
    x = x.astype(jnp.float32)
    c = c.astype(jnp.float32)
    mu = jnp.mean(x, axis=(2, 3), keepdims=True)
    var = jnp.mean((x - mu) ** 2, axis=(2, 3), keepdims=True)
    norm = (x - mu) / jnp.sqrt(var + EPS)
    rh = _bilinear_matrix(H, Hc)
    rw = _bilinear_matrix(W, Wc)
    c_rs = jnp.einsum('hH,wW,bcHW->bchw', rh, rw, c,
                      precision=jax.lax.Precision.HIGHEST)

    def conv(inp, w, b):
        out = jax.lax.conv_general_dilated(
            inp, w, window_strides=(1, 1), padding=((1, 1), (1, 1)),
            dimension_numbers=('NCHW', 'HWIO', 'NCHW'),
            precision=jax.lax.Precision.HIGHEST)
        return out + b[None, :, None, None]

    share = conv(c_rs, params['w_share'], params['b_share'])
    share = jnp.where(share > 0, share, NEG_SLOPE * share)
    gamma = conv(share, params['w_gamma'], params['b_gamma'])
    beta = conv(share, params['w_beta'], params['b_beta'])
    return norm * (1.0 + gamma) + beta


if __name__ == "__main__":
    B, in_ch, out_ch = 2, 3, 4
    H = W = 16
    Hc = Wc = 8

    key = jax.random.PRNGKey(0)
    ks = jax.random.split(key, 8)
    params = {
        'w_share': 0.2 * jax.random.normal(ks[0], (3, 3, in_ch, out_ch), jnp.float32),
        'b_share': 0.1 * jax.random.normal(ks[1], (out_ch,), jnp.float32),
        'w_gamma': 0.2 * jax.random.normal(ks[2], (3, 3, out_ch, out_ch), jnp.float32),
        'b_gamma': 0.1 * jax.random.normal(ks[3], (out_ch,), jnp.float32),
        'w_beta':  0.2 * jax.random.normal(ks[4], (3, 3, out_ch, out_ch), jnp.float32),
        'b_beta':  0.1 * jax.random.normal(ks[5], (out_ch,), jnp.float32),
    }
    x = jax.random.normal(ks[6], (B, out_ch, H, W), jnp.float32)
    c = jax.random.normal(ks[7], (B, in_ch, Hc, Wc), jnp.float32)

    out = jax.block_until_ready(spade_forward(x, c, params))
    ref = jax.block_until_ready(spade_reference(x, c, params))
    assert out.shape == (B, out_ch, H, W)
    np.testing.assert_allclose(np.asarray(out), np.asarray(ref), atol=5e-3, rtol=5e-3)
    print("KERNEL_OK")
</pallas_src>

<mosaic_0001>
module attributes {stable_mosaic.version = 11 : i64} {
  func.func @_spade_kernel(%arg0: i32, %arg1: memref<1x4x384xf32, #tpu.memory_space<vmem>>, %arg2: memref<1x3x640xf32, #tpu.memory_space<vmem>>, %arg3: memref<1x512xf32, #tpu.memory_space<vmem>>, %arg4: memref<4x27xf32, #tpu.memory_space<vmem>>, %arg5: memref<4x1xf32, #tpu.memory_space<vmem>>, %arg6: memref<8x36xf32, #tpu.memory_space<vmem>>, %arg7: memref<8x1xf32, #tpu.memory_space<vmem>>, %arg8: memref<1x4x384xf32, #tpu.memory_space<vmem>>) attributes {dimension_semantics = [#tpu.dimension_semantics<parallel>], iteration_bounds = array<i64: 2>, scalar_prefetch = 0 : i64, scratch_operands = 0 : i64, tpu.core_type = #tpu.core_type<tc>, window_params = [{transform_indices = @transform_0, window_bounds = array<i64: 1, 4, 384>}, {transform_indices = @transform_1, window_bounds = array<i64: 1, 3, 640>}, {pipeline_mode = #tpu.pipeline_mode<synchronous>, transform_indices = @transform_2, window_bounds = array<i64: 1, 512>}, {pipeline_mode = #tpu.pipeline_mode<synchronous>, transform_indices = @transform_3, window_bounds = array<i64: 4, 27>}, {pipeline_mode = #tpu.pipeline_mode<synchronous>, transform_indices = @transform_4, window_bounds = array<i64: 4, 1>}, {pipeline_mode = #tpu.pipeline_mode<synchronous>, transform_indices = @transform_5, window_bounds = array<i64: 8, 36>}, {pipeline_mode = #tpu.pipeline_mode<synchronous>, transform_indices = @transform_6, window_bounds = array<i64: 8, 1>}, {transform_indices = @transform_7, window_bounds = array<i64: 1, 4, 384>}]} {
    %c0 = arith.constant 0 : index
    %c0_0 = arith.constant 0 : index
    %c0_1 = arith.constant 0 : index
    %0 = vector.load %arg1[%c0, %c0_0, %c0_1] : memref<1x4x384xf32, #tpu.memory_space<vmem>>, vector<1x4x384xf32>
    %1 = vector.shape_cast %0 : vector<1x4x384xf32> to vector<4x384xf32>
    %cst = arith.constant dense<0.000000e+00> : vector<4xf32>
    %2 = vector.multi_reduction <add>, %1, %cst [1] : vector<4x384xf32> to vector<4xf32>
    %3 = vector.shape_cast %2 : vector<4xf32> to vector<4x1xf32>
    %4 = arith.mulf %1, %1 : vector<4x384xf32>
    %cst_2 = arith.constant dense<0.000000e+00> : vector<4xf32>
    %5 = vector.multi_reduction <add>, %4, %cst_2 [1] : vector<4x384xf32> to vector<4xf32>
    %6 = vector.shape_cast %5 : vector<4xf32> to vector<4x1xf32>
    %cst_3 = arith.constant 3.906250e-03 : f32
    %7 = vector.broadcast %cst_3 : f32 to vector<4x1xf32>
    %8 = arith.mulf %3, %7 : vector<4x1xf32>
    %cst_4 = arith.constant 3.906250e-03 : f32
    %9 = vector.broadcast %cst_4 : f32 to vector<4x1xf32>
    %10 = arith.mulf %6, %9 : vector<4x1xf32>
    %11 = arith.mulf %8, %8 : vector<4x1xf32>
    %12 = arith.subf %10, %11 : vector<4x1xf32>
    %13 = vector.broadcast %8 : vector<4x1xf32> to vector<4x384xf32>
    %14 = arith.subf %1, %13 : vector<4x384xf32>
    %cst_5 = arith.constant 9.99999974E-6 : f32
    %15 = vector.broadcast %cst_5 : f32 to vector<4x1xf32>
    %16 = arith.addf %12, %15 : vector<4x1xf32>
    %17 = math.rsqrt %16 : vector<4x1xf32>
    %18 = vector.broadcast %17 : vector<4x1xf32> to vector<4x384xf32>
    %19 = arith.mulf %14, %18 : vector<4x384xf32>
    %c0_6 = arith.constant 0 : index
    %c0_7 = arith.constant 0 : index
    %c0_8 = arith.constant 0 : index
    %20 = vector.load %arg2[%c0_6, %c0_7, %c0_8] : memref<1x3x640xf32, #tpu.memory_space<vmem>>, vector<1x3x640xf32>
    %21 = vector.shape_cast %20 : vector<1x3x640xf32> to vector<3x640xf32>
    %c0_9 = arith.constant 0 : index
    %c0_10 = arith.constant 0 : index
    %22 = vector.load %arg4[%c0_9, %c0_10] : memref<4x27xf32, #tpu.memory_space<vmem>>, vector<4x27xf32>
    %c0_11 = arith.constant 0 : index
    %c0_12 = arith.constant 0 : index
    %23 = vector.load %arg5[%c0_11, %c0_12] : memref<4x1xf32, #tpu.memory_space<vmem>>, vector<4x1xf32>
    %cst_13 = arith.constant 0.000000e+00 : f32
    %24 = vector.broadcast %cst_13 : f32 to vector<4x512xf32>
    %25 = vector.extract_strided_slice %21 {offsets = [0, 0], sizes = [3, 512], strides = [1, 1]} : vector<3x640xf32> to vector<3x512xf32>
    %26 = vector.extract_strided_slice %22 {offsets = [0, 0], sizes = [4, 1], strides = [1, 1]} : vector<4x27xf32> to vector<4x1xf32>
    %27 = vector.extract_strided_slice %25 {offsets = [0, 0], sizes = [1, 512], strides = [1, 1]} : vector<3x512xf32> to vector<1x512xf32>
    %28 = vector.broadcast %26 : vector<4x1xf32> to vector<4x512xf32>
    %29 = vector.broadcast %27 : vector<1x512xf32> to vector<4x512xf32>
    %30 = arith.mulf %28, %29 : vector<4x512xf32>
    %31 = arith.addf %24, %30 : vector<4x512xf32>
    %32 = vector.extract_strided_slice %22 {offsets = [0, 1], sizes = [4, 1], strides = [1, 1]} : vector<4x27xf32> to vector<4x1xf32>
    %33 = vector.extract_strided_slice %25 {offsets = [1, 0], sizes = [1, 512], strides = [1, 1]} : vector<3x512xf32> to vector<1x512xf32>
    %34 = vector.broadcast %32 : vector<4x1xf32> to vector<4x512xf32>
    %35 = vector.broadcast %33 : vector<1x512xf32> to vector<4x512xf32>
    %36 = arith.mulf %34, %35 : vector<4x512xf32>
    %37 = arith.addf %31, %36 : vector<4x512xf32>
    %38 = vector.extract_strided_slice %22 {offsets = [0, 2], sizes = [4, 1], strides = [1, 1]} : vector<4x27xf32> to vector<4x1xf32>
    %39 = vector.extract_strided_slice %25 {offsets = [2, 0], sizes = [1, 512], strides = [1, 1]} : vector<3x512xf32> to vector<1x512xf32>
    %40 = vector.broadcast %38 : vector<4x1xf32> to vector<4x512xf32>
    %41 = vector.broadcast %39 : vector<1x512xf32> to vector<4x512xf32>
    %42 = arith.mulf %40, %41 : vector<4x512xf32>
    %43 = arith.addf %37, %42 : vector<4x512xf32>
    %44 = vector.extract_strided_slice %21 {offsets = [0, 1], sizes = [3, 512], strides = [1, 1]} : vector<3x640xf32> to vector<3x512xf32>
    %45 = vector.extract_strided_slice %22 {offsets = [0, 3], sizes = [4, 1], strides = [1, 1]} : vector<4x27xf32> to vector<4x1xf32>
    %46 = vector.extract_strided_slice %44 {offsets = [0, 0], sizes = [1, 512], strides = [1, 1]} : vector<3x512xf32> to vector<1x512xf32>
    %47 = vector.broadcast %45 : vector<4x1xf32> to vector<4x512xf32>
    %48 = vector.broadcast %46 : vector<1x512xf32> to vector<4x512xf32>
    %49 = arith.mulf %47, %48 : vector<4x512xf32>
    %50 = arith.addf %43, %49 : vector<4x512xf32>
    %51 = vector.extract_strided_slice %22 {offsets = [0, 4], sizes = [4, 1], strides = [1, 1]} : vector<4x27xf32> to vector<4x1xf32>
    %52 = vector.extract_strided_slice %44 {offsets = [1, 0], sizes = [1, 512], strides = [1, 1]} : vector<3x512xf32> to vector<1x512xf32>
    %53 = vector.broadcast %51 : vector<4x1xf32> to vector<4x512xf32>
    %54 = vector.broadcast %52 : vector<1x512xf32> to vector<4x512xf32>
    %55 = arith.mulf %53, %54 : vector<4x512xf32>
    %56 = arith.addf %50, %55 : vector<4x512xf32>
    %57 = vector.extract_strided_slice %22 {offsets = [0, 5], sizes = [4, 1], strides = [1, 1]} : vector<4x27xf32> to vector<4x1xf32>
    %58 = vector.extract_strided_slice %44 {offsets = [2, 0], sizes = [1, 512], strides = [1, 1]} : vector<3x512xf32> to vector<1x512xf32>
    %59 = vector.broadcast %57 : vector<4x1xf32> to vector<4x512xf32>
    %60 = vector.broadcast %58 : vector<1x512xf32> to vector<4x512xf32>
    %61 = arith.mulf %59, %60 : vector<4x512xf32>
    %62 = arith.addf %56, %61 : vector<4x512xf32>
    %63 = vector.extract_strided_slice %21 {offsets = [0, 2], sizes = [3, 512], strides = [1, 1]} : vector<3x640xf32> to vector<3x512xf32>
    %64 = vector.extract_strided_slice %22 {offsets = [0, 6], sizes = [4, 1], strides = [1, 1]} : vector<4x27xf32> to vector<4x1xf32>
    %65 = vector.extract_strided_slice %63 {offsets = [0, 0], sizes = [1, 512], strides = [1, 1]} : vector<3x512xf32> to vector<1x512xf32>
    %66 = vector.broadcast %64 : vector<4x1xf32> to vector<4x512xf32>
    %67 = vector.broadcast %65 : vector<1x512xf32> to vector<4x512xf32>
    %68 = arith.mulf %66, %67 : vector<4x512xf32>
    %69 = arith.addf %62, %68 : vector<4x512xf32>
    %70 = vector.extract_strided_slice %22 {offsets = [0, 7], sizes = [4, 1], strides = [1, 1]} : vector<4x27xf32> to vector<4x1xf32>
    %71 = vector.extract_strided_slice %63 {offsets = [1, 0], sizes = [1, 512], strides = [1, 1]} : vector<3x512xf32> to vector<1x512xf32>
    %72 = vector.broadcast %70 : vector<4x1xf32> to vector<4x512xf32>
    %73 = vector.broadcast %71 : vector<1x512xf32> to vector<4x512xf32>
    %74 = arith.mulf %72, %73 : vector<4x512xf32>
    %75 = arith.addf %69, %74 : vector<4x512xf32>
    %76 = vector.extract_strided_slice %22 {offsets = [0, 8], sizes = [4, 1], strides = [1, 1]} : vector<4x27xf32> to vector<4x1xf32>
    %77 = vector.extract_strided_slice %63 {offsets = [2, 0], sizes = [1, 512], strides = [1, 1]} : vector<3x512xf32> to vector<1x512xf32>
    %78 = vector.broadcast %76 : vector<4x1xf32> to vector<4x512xf32>
    %79 = vector.broadcast %77 : vector<1x512xf32> to vector<4x512xf32>
    %80 = arith.mulf %78, %79 : vector<4x512xf32>
    %81 = arith.addf %75, %80 : vector<4x512xf32>
    %82 = vector.extract_strided_slice %21 {offsets = [0, 18], sizes = [3, 512], strides = [1, 1]} : vector<3x640xf32> to vector<3x512xf32>
    %83 = vector.extract_strided_slice %22 {offsets = [0, 9], sizes = [4, 1], strides = [1, 1]} : vector<4x27xf32> to vector<4x1xf32>
    %84 = vector.extract_strided_slice %82 {offsets = [0, 0], sizes = [1, 512], strides = [1, 1]} : vector<3x512xf32> to vector<1x512xf32>
    %85 = vector.broadcast %83 : vector<4x1xf32> to vector<4x512xf32>
    %86 = vector.broadcast %84 : vector<1x512xf32> to vector<4x512xf32>
    %87 = arith.mulf %85, %86 : vector<4x512xf32>
    %88 = arith.addf %81, %87 : vector<4x512xf32>
    %89 = vector.extract_strided_slice %22 {offsets = [0, 10], sizes = [4, 1], strides = [1, 1]} : vector<4x27xf32> to vector<4x1xf32>
    %90 = vector.extract_strided_slice %82 {offsets = [1, 0], sizes = [1, 512], strides = [1, 1]} : vector<3x512xf32> to vector<1x512xf32>
    %91 = vector.broadcast %89 : vector<4x1xf32> to vector<4x512xf32>
    %92 = vector.broadcast %90 : vector<1x512xf32> to vector<4x512xf32>
    %93 = arith.mulf %91, %92 : vector<4x512xf32>
    %94 = arith.addf %88, %93 : vector<4x512xf32>
    %95 = vector.extract_strided_slice %22 {offsets = [0, 11], sizes = [4, 1], strides = [1, 1]} : vector<4x27xf32> to vector<4x1xf32>
    %96 = vector.extract_strided_slice %82 {offsets = [2, 0], sizes = [1, 512], strides = [1, 1]} : vector<3x512xf32> to vector<1x512xf32>
    %97 = vector.broadcast %95 : vector<4x1xf32> to vector<4x512xf32>
    %98 = vector.broadcast %96 : vector<1x512xf32> to vector<4x512xf32>
    %99 = arith.mulf %97, %98 : vector<4x512xf32>
    %100 = arith.addf %94, %99 : vector<4x512xf32>
    %101 = vector.extract_strided_slice %21 {offsets = [0, 19], sizes = [3, 512], strides = [1, 1]} : vector<3x640xf32> to vector<3x512xf32>
    %102 = vector.extract_strided_slice %22 {offsets = [0, 12], sizes = [4, 1], strides = [1, 1]} : vector<4x27xf32> to vector<4x1xf32>
    %103 = vector.extract_strided_slice %101 {offsets = [0, 0], sizes = [1, 512], strides = [1, 1]} : vector<3x512xf32> to vector<1x512xf32>
    %104 = vector.broadcast %102 : vector<4x1xf32> to vector<4x512xf32>
    %105 = vector.broadcast %103 : vector<1x512xf32> to vector<4x512xf32>
    %106 = arith.mulf %104, %105 : vector<4x512xf32>
    %107 = arith.addf %100, %106 : vector<4x512xf32>
    %108 = vector.extract_strided_slice %22 {offsets = [0, 13], sizes = [4, 1], strides = [1, 1]} : vector<4x27xf32> to vector<4x1xf32>
    %109 = vector.extract_strided_slice %101 {offsets = [1, 0], sizes = [1, 512], strides = [1, 1]} : vector<3x512xf32> to vector<1x512xf32>
    %110 = vector.broadcast %108 : vector<4x1xf32> to vector<4x512xf32>
    %111 = vector.broadcast %109 : vector<1x512xf32> to vector<4x512xf32>
    %112 = arith.mulf %110, %111 : vector<4x512xf32>
    %113 = arith.addf %107, %112 : vector<4x512xf32>
    %114 = vector.extract_strided_slice %22 {offsets = [0, 14], sizes = [4, 1], strides = [1, 1]} : vector<4x27xf32> to vector<4x1xf32>
    %115 = vector.extract_strided_slice %101 {offsets = [2, 0], sizes = [1, 512], strides = [1, 1]} : vector<3x512xf32> to vector<1x512xf32>
    %116 = vector.broadcast %114 : vector<4x1xf32> to vector<4x512xf32>
    %117 = vector.broadcast %115 : vector<1x512xf32> to vector<4x512xf32>
    %118 = arith.mulf %116, %117 : vector<4x512xf32>
    %119 = arith.addf %113, %118 : vector<4x512xf32>
    %120 = vector.extract_strided_slice %21 {offsets = [0, 20], sizes = [3, 512], strides = [1, 1]} : vector<3x640xf32> to vector<3x512xf32>
    %121 = vector.extract_strided_slice %22 {offsets = [0, 15], sizes = [4, 1], strides = [1, 1]} : vector<4x27xf32> to vector<4x1xf32>
    %122 = vector.extract_strided_slice %120 {offsets = [0, 0], sizes = [1, 512], strides = [1, 1]} : vector<3x512xf32> to vector<1x512xf32>
    %123 = vector.broadcast %121 : vector<4x1xf32> to vector<4x512xf32>
    %124 = vector.broadcast %122 : vector<1x512xf32> to vector<4x512xf32>
    %125 = arith.mulf %123, %124 : vector<4x512xf32>
    %126 = arith.addf %119, %125 : vector<4x512xf32>
    %127 = vector.extract_strided_slice %22 {offsets = [0, 16], sizes = [4, 1], strides = [1, 1]} : vector<4x27xf32> to vector<4x1xf32>
    %128 = vector.extract_strided_slice %120 {offsets = [1, 0], sizes = [1, 512], strides = [1, 1]} : vector<3x512xf32> to vector<1x512xf32>
    %129 = vector.broadcast %127 : vector<4x1xf32> to vector<4x512xf32>
    %130 = vector.broadcast %128 : vector<1x512xf32> to vector<4x512xf32>
    %131 = arith.mulf %129, %130 : vector<4x512xf32>
    %132 = arith.addf %126, %131 : vector<4x512xf32>
    %133 = vector.extract_strided_slice %22 {offsets = [0, 17], sizes = [4, 1], strides = [1, 1]} : vector<4x27xf32> to vector<4x1xf32>
    %134 = vector.extract_strided_slice %120 {offsets = [2, 0], sizes = [1, 512], strides = [1, 1]} : vector<3x512xf32> to vector<1x512xf32>
    %135 = vector.broadcast %133 : vector<4x1xf32> to vector<4x512xf32>
    %136 = vector.broadcast %134 : vector<1x512xf32> to vector<4x512xf32>
    %137 = arith.mulf %135, %136 : vector<4x512xf32>
    %138 = arith.addf %132, %137 : vector<4x512xf32>
    %139 = vector.extract_strided_slice %21 {offsets = [0, 36], sizes = [3, 512], strides = [1, 1]} : vector<3x640xf32> to vector<3x512xf32>
    %140 = vector.extract_strided_slice %22 {offsets = [0, 18], sizes = [4, 1], strides = [1, 1]} : vector<4x27xf32> to vector<4x1xf32>
    %141 = vector.extract_strided_slice %139 {offsets = [0, 0], sizes = [1, 512], strides = [1, 1]} : vector<3x512xf32> to vector<1x512xf32>
    %142 = vector.broadcast %140 : vector<4x1xf32> to vector<4x512xf32>
    %143 = vector.broadcast %141 : vector<1x512xf32> to vector<4x512xf32>
    %144 = arith.mulf %142, %143 : vector<4x512xf32>
    %145 = arith.addf %138, %144 : vector<4x512xf32>
    %146 = vector.extract_strided_slice %22 {offsets = [0, 19], sizes = [4, 1], strides = [1, 1]} : vector<4x27xf32> to vector<4x1xf32>
    %147 = vector.extract_strided_slice %139 {offsets = [1, 0], sizes = [1, 512], strides = [1, 1]} : vector<3x512xf32> to vector<1x512xf32>
    %148 = vector.broadcast %146 : vector<4x1xf32> to vector<4x512xf32>
    %149 = vector.broadcast %147 : vector<1x512xf32> to vector<4x512xf32>
    %150 = arith.mulf %148, %149 : vector<4x512xf32>
    %151 = arith.addf %145, %150 : vector<4x512xf32>
    %152 = vector.extract_strided_slice %22 {offsets = [0, 20], sizes = [4, 1], strides = [1, 1]} : vector<4x27xf32> to vector<4x1xf32>
    %153 = vector.extract_strided_slice %139 {offsets = [2, 0], sizes = [1, 512], strides = [1, 1]} : vector<3x512xf32> to vector<1x512xf32>
    %154 = vector.broadcast %152 : vector<4x1xf32> to vector<4x512xf32>
    %155 = vector.broadcast %153 : vector<1x512xf32> to vector<4x512xf32>
    %156 = arith.mulf %154, %155 : vector<4x512xf32>
    %157 = arith.addf %151, %156 : vector<4x512xf32>
    %158 = vector.extract_strided_slice %21 {offsets = [0, 37], sizes = [3, 512], strides = [1, 1]} : vector<3x640xf32> to vector<3x512xf32>
    %159 = vector.extract_strided_slice %22 {offsets = [0, 21], sizes = [4, 1], strides = [1, 1]} : vector<4x27xf32> to vector<4x1xf32>
    %160 = vector.extract_strided_slice %158 {offsets = [0, 0], sizes = [1, 512], strides = [1, 1]} : vector<3x512xf32> to vector<1x512xf32>
    %161 = vector.broadcast %159 : vector<4x1xf32> to vector<4x512xf32>
    %162 = vector.broadcast %160 : vector<1x512xf32> to vector<4x512xf32>
    %163 = arith.mulf %161, %162 : vector<4x512xf32>
    %164 = arith.addf %157, %163 : vector<4x512xf32>
    %165 = vector.extract_strided_slice %22 {offsets = [0, 22], sizes = [4, 1], strides = [1, 1]} : vector<4x27xf32> to vector<4x1xf32>
    %166 = vector.extract_strided_slice %158 {offsets = [1, 0], sizes = [1, 512], strides = [1, 1]} : vector<3x512xf32> to vector<1x512xf32>
    %167 = vector.broadcast %165 : vector<4x1xf32> to vector<4x512xf32>
    %168 = vector.broadcast %166 : vector<1x512xf32> to vector<4x512xf32>
    %169 = arith.mulf %167, %168 : vector<4x512xf32>
    %170 = arith.addf %164, %169 : vector<4x512xf32>
    %171 = vector.extract_strided_slice %22 {offsets = [0, 23], sizes = [4, 1], strides = [1, 1]} : vector<4x27xf32> to vector<4x1xf32>
    %172 = vector.extract_strided_slice %158 {offsets = [2, 0], sizes = [1, 512], strides = [1, 1]} : vector<3x512xf32> to vector<1x512xf32>
    %173 = vector.broadcast %171 : vector<4x1xf32> to vector<4x512xf32>
    %174 = vector.broadcast %172 : vector<1x512xf32> to vector<4x512xf32>
    %175 = arith.mulf %173, %174 : vector<4x512xf32>
    %176 = arith.addf %170, %175 : vector<4x512xf32>
    %177 = vector.extract_strided_slice %21 {offsets = [0, 38], sizes = [3, 512], strides = [1, 1]} : vector<3x640xf32> to vector<3x512xf32>
    %178 = vector.extract_strided_slice %22 {offsets = [0, 24], sizes = [4, 1], strides = [1, 1]} : vector<4x27xf32> to vector<4x1xf32>
    %179 = vector.extract_strided_slice %177 {offsets = [0, 0], sizes = [1, 512], strides = [1, 1]} : vector<3x512xf32> to vector<1x512xf32>
    %180 = vector.broadcast %178 : vector<4x1xf32> to vector<4x512xf32>
    %181 = vector.broadcast %179 : vector<1x512xf32> to vector<4x512xf32>
    %182 = arith.mulf %180, %181 : vector<4x512xf32>
    %183 = arith.addf %176, %182 : vector<4x512xf32>
    %184 = vector.extract_strided_slice %22 {offsets = [0, 25], sizes = [4, 1], strides = [1, 1]} : vector<4x27xf32> to vector<4x1xf32>
    %185 = vector.extract_strided_slice %177 {offsets = [1, 0], sizes = [1, 512], strides = [1, 1]} : vector<3x512xf32> to vector<1x512xf32>
    %186 = vector.broadcast %184 : vector<4x1xf32> to vector<4x512xf32>
    %187 = vector.broadcast %185 : vector<1x512xf32> to vector<4x512xf32>
    %188 = arith.mulf %186, %187 : vector<4x512xf32>
    %189 = arith.addf %183, %188 : vector<4x512xf32>
    %190 = vector.extract_strided_slice %22 {offsets = [0, 26], sizes = [4, 1], strides = [1, 1]} : vector<4x27xf32> to vector<4x1xf32>
    %191 = vector.extract_strided_slice %177 {offsets = [2, 0], sizes = [1, 512], strides = [1, 1]} : vector<3x512xf32> to vector<1x512xf32>
    %192 = vector.broadcast %190 : vector<4x1xf32> to vector<4x512xf32>
    %193 = vector.broadcast %191 : vector<1x512xf32> to vector<4x512xf32>
    %194 = arith.mulf %192, %193 : vector<4x512xf32>
    %195 = arith.addf %189, %194 : vector<4x512xf32>
    %196 = vector.broadcast %23 : vector<4x1xf32> to vector<4x512xf32>
    %197 = arith.addf %195, %196 : vector<4x512xf32>
    %cst_14 = arith.constant 0.000000e+00 : f32
    %198 = vector.broadcast %cst_14 : f32 to vector<4x512xf32>
    %199 = arith.cmpf ogt, %197, %198 : vector<4x512xf32>
    %cst_15 = arith.constant 0.00999999977 : f32
    %200 = vector.broadcast %cst_15 : f32 to vector<4x512xf32>
    %201 = arith.mulf %200, %197 : vector<4x512xf32>
    %202 = arith.select %199, %197, %201 : vector<4x512xi1>, vector<4x512xf32>
    %c0_16 = arith.constant 0 : index
    %c0_17 = arith.constant 0 : index
    %203 = vector.load %arg3[%c0_16, %c0_17] : memref<1x512xf32, #tpu.memory_space<vmem>>, vector<1x512xf32>
    %204 = vector.broadcast %203 : vector<1x512xf32> to vector<4x512xf32>
    %205 = arith.mulf %202, %204 : vector<4x512xf32>
    %c0_18 = arith.constant 0 : index
    %c0_19 = arith.constant 0 : index
    %206 = vector.load %arg6[%c0_18, %c0_19] : memref<8x36xf32, #tpu.memory_space<vmem>>, vector<8x36xf32>
    %c0_20 = arith.constant 0 : index
    %c0_21 = arith.constant 0 : index
    %207 = vector.load %arg7[%c0_20, %c0_21] : memref<8x1xf32, #tpu.memory_space<vmem>>, vector<8x1xf32>
    %cst_22 = arith.constant 0.000000e+00 : f32
    %208 = vector.broadcast %cst_22 : f32 to vector<8x384xf32>
    %209 = vector.extract_strided_slice %205 {offsets = [0, 0], sizes = [4, 384], strides = [1, 1]} : vector<4x512xf32> to vector<4x384xf32>
    %210 = vector.extract_strided_slice %206 {offsets = [0, 0], sizes = [8, 1], strides = [1, 1]} : vector<8x36xf32> to vector<8x1xf32>
    %211 = vector.extract_strided_slice %209 {offsets = [0, 0], sizes = [1, 384], strides = [1, 1]} : vector<4x384xf32> to vector<1x384xf32>
    %212 = vector.broadcast %210 : vector<8x1xf32> to vector<8x384xf32>
    %213 = vector.broadcast %211 : vector<1x384xf32> to vector<8x384xf32>
    %214 = arith.mulf %212, %213 : vector<8x384xf32>
    %215 = arith.addf %208, %214 : vector<8x384xf32>
    %216 = vector.extract_strided_slice %206 {offsets = [0, 1], sizes = [8, 1], strides = [1, 1]} : vector<8x36xf32> to vector<8x1xf32>
    %217 = vector.extract_strided_slice %209 {offsets = [1, 0], sizes = [1, 384], strides = [1, 1]} : vector<4x384xf32> to vector<1x384xf32>
    %218 = vector.broadcast %216 : vector<8x1xf32> to vector<8x384xf32>
    %219 = vector.broadcast %217 : vector<1x384xf32> to vector<8x384xf32>
    %220 = arith.mulf %218, %219 : vector<8x384xf32>
    %221 = arith.addf %215, %220 : vector<8x384xf32>
    %222 = vector.extract_strided_slice %206 {offsets = [0, 2], sizes = [8, 1], strides = [1, 1]} : vector<8x36xf32> to vector<8x1xf32>
    %223 = vector.extract_strided_slice %209 {offsets = [2, 0], sizes = [1, 384], strides = [1, 1]} : vector<4x384xf32> to vector<1x384xf32>
    %224 = vector.broadcast %222 : vector<8x1xf32> to vector<8x384xf32>
    %225 = vector.broadcast %223 : vector<1x384xf32> to vector<8x384xf32>
    %226 = arith.mulf %224, %225 : vector<8x384xf32>
    %227 = arith.addf %221, %226 : vector<8x384xf32>
    %228 = vector.extract_strided_slice %206 {offsets = [0, 3], sizes = [8, 1], strides = [1, 1]} : vector<8x36xf32> to vector<8x1xf32>
    %229 = vector.extract_strided_slice %209 {offsets = [3, 0], sizes = [1, 384], strides = [1, 1]} : vector<4x384xf32> to vector<1x384xf32>
    %230 = vector.broadcast %228 : vector<8x1xf32> to vector<8x384xf32>
    %231 = vector.broadcast %229 : vector<1x384xf32> to vector<8x384xf32>
    %232 = arith.mulf %230, %231 : vector<8x384xf32>
    %233 = arith.addf %227, %232 : vector<8x384xf32>
    %234 = vector.extract_strided_slice %205 {offsets = [0, 1], sizes = [4, 384], strides = [1, 1]} : vector<4x512xf32> to vector<4x384xf32>
    %235 = vector.extract_strided_slice %206 {offsets = [0, 4], sizes = [8, 1], strides = [1, 1]} : vector<8x36xf32> to vector<8x1xf32>
    %236 = vector.extract_strided_slice %234 {offsets = [0, 0], sizes = [1, 384], strides = [1, 1]} : vector<4x384xf32> to vector<1x384xf32>
    %237 = vector.broadcast %235 : vector<8x1xf32> to vector<8x384xf32>
    %238 = vector.broadcast %236 : vector<1x384xf32> to vector<8x384xf32>
    %239 = arith.mulf %237, %238 : vector<8x384xf32>
    %240 = arith.addf %233, %239 : vector<8x384xf32>
    %241 = vector.extract_strided_slice %206 {offsets = [0, 5], sizes = [8, 1], strides = [1, 1]} : vector<8x36xf32> to vector<8x1xf32>
    %242 = vector.extract_strided_slice %234 {offsets = [1, 0], sizes = [1, 384], strides = [1, 1]} : vector<4x384xf32> to vector<1x384xf32>
    %243 = vector.broadcast %241 : vector<8x1xf32> to vector<8x384xf32>
    %244 = vector.broadcast %242 : vector<1x384xf32> to vector<8x384xf32>
    %245 = arith.mulf %243, %244 : vector<8x384xf32>
    %246 = arith.addf %240, %245 : vector<8x384xf32>
    %247 = vector.extract_strided_slice %206 {offsets = [0, 6], sizes = [8, 1], strides = [1, 1]} : vector<8x36xf32> to vector<8x1xf32>
    %248 = vector.extract_strided_slice %234 {offsets = [2, 0], sizes = [1, 384], strides = [1, 1]} : vector<4x384xf32> to vector<1x384xf32>
    %249 = vector.broadcast %247 : vector<8x1xf32> to vector<8x384xf32>
    %250 = vector.broadcast %248 : vector<1x384xf32> to vector<8x384xf32>
    %251 = arith.mulf %249, %250 : vector<8x384xf32>
    %252 = arith.addf %246, %251 : vector<8x384xf32>
    %253 = vector.extract_strided_slice %206 {offsets = [0, 7], sizes = [8, 1], strides = [1, 1]} : vector<8x36xf32> to vector<8x1xf32>
    %254 = vector.extract_strided_slice %234 {offsets = [3, 0], sizes = [1, 384], strides = [1, 1]} : vector<4x384xf32> to vector<1x384xf32>
    %255 = vector.broadcast %253 : vector<8x1xf32> to vector<8x384xf32>
    %256 = vector.broadcast %254 : vector<1x384xf32> to vector<8x384xf32>
    %257 = arith.mulf %255, %256 : vector<8x384xf32>
    %258 = arith.addf %252, %257 : vector<8x384xf32>
    %259 = vector.extract_strided_slice %205 {offsets = [0, 2], sizes = [4, 384], strides = [1, 1]} : vector<4x512xf32> to vector<4x384xf32>
    %260 = vector.extract_strided_slice %206 {offsets = [0, 8], sizes = [8, 1], strides = [1, 1]} : vector<8x36xf32> to vector<8x1xf32>
    %261 = vector.extract_strided_slice %259 {offsets = [0, 0], sizes = [1, 384], strides = [1, 1]} : vector<4x384xf32> to vector<1x384xf32>
    %262 = vector.broadcast %260 : vector<8x1xf32> to vector<8x384xf32>
    %263 = vector.broadcast %261 : vector<1x384xf32> to vector<8x384xf32>
    %264 = arith.mulf %262, %263 : vector<8x384xf32>
    %265 = arith.addf %258, %264 : vector<8x384xf32>
    %266 = vector.extract_strided_slice %206 {offsets = [0, 9], sizes = [8, 1], strides = [1, 1]} : vector<8x36xf32> to vector<8x1xf32>
    %267 = vector.extract_strided_slice %259 {offsets = [1, 0], sizes = [1, 384], strides = [1, 1]} : vector<4x384xf32> to vector<1x384xf32>
    %268 = vector.broadcast %266 : vector<8x1xf32> to vector<8x384xf32>
    %269 = vector.broadcast %267 : vector<1x384xf32> to vector<8x384xf32>
    %270 = arith.mulf %268, %269 : vector<8x384xf32>
    %271 = arith.addf %265, %270 : vector<8x384xf32>
    %272 = vector.extract_strided_slice %206 {offsets = [0, 10], sizes = [8, 1], strides = [1, 1]} : vector<8x36xf32> to vector<8x1xf32>
    %273 = vector.extract_strided_slice %259 {offsets = [2, 0], sizes = [1, 384], strides = [1, 1]} : vector<4x384xf32> to vector<1x384xf32>
    %274 = vector.broadcast %272 : vector<8x1xf32> to vector<8x384xf32>
    %275 = vector.broadcast %273 : vector<1x384xf32> to vector<8x384xf32>
    %276 = arith.mulf %274, %275 : vector<8x384xf32>
    %277 = arith.addf %271, %276 : vector<8x384xf32>
    %278 = vector.extract_strided_slice %206 {offsets = [0, 11], sizes = [8, 1], strides = [1, 1]} : vector<8x36xf32> to vector<8x1xf32>
    %279 = vector.extract_strided_slice %259 {offsets = [3, 0], sizes = [1, 384], strides = [1, 1]} : vector<4x384xf32> to vector<1x384xf32>
    %280 = vector.broadcast %278 : vector<8x1xf32> to vector<8x384xf32>
    %281 = vector.broadcast %279 : vector<1x384xf32> to vector<8x384xf32>
    %282 = arith.mulf %280, %281 : vector<8x384xf32>
    %283 = arith.addf %277, %282 : vector<8x384xf32>
    %284 = vector.extract_strided_slice %205 {offsets = [0, 18], sizes = [4, 384], strides = [1, 1]} : vector<4x512xf32> to vector<4x384xf32>
    %285 = vector.extract_strided_slice %206 {offsets = [0, 12], sizes = [8, 1], strides = [1, 1]} : vector<8x36xf32> to vector<8x1xf32>
    %286 = vector.extract_strided_slice %284 {offsets = [0, 0], sizes = [1, 384], strides = [1, 1]} : vector<4x384xf32> to vector<1x384xf32>
    %287 = vector.broadcast %285 : vector<8x1xf32> to vector<8x384xf32>
    %288 = vector.broadcast %286 : vector<1x384xf32> to vector<8x384xf32>
    %289 = arith.mulf %287, %288 : vector<8x384xf32>
    %290 = arith.addf %283, %289 : vector<8x384xf32>
    %291 = vector.extract_strided_slice %206 {offsets = [0, 13], sizes = [8, 1], strides = [1, 1]} : vector<8x36xf32> to vector<8x1xf32>
    %292 = vector.extract_strided_slice %284 {offsets = [1, 0], sizes = [1, 384], strides = [1, 1]} : vector<4x384xf32> to vector<1x384xf32>
    %293 = vector.broadcast %291 : vector<8x1xf32> to vector<8x384xf32>
    %294 = vector.broadcast %292 : vector<1x384xf32> to vector<8x384xf32>
    %295 = arith.mulf %293, %294 : vector<8x384xf32>
    %296 = arith.addf %290, %295 : vector<8x384xf32>
    %297 = vector.extract_strided_slice %206 {offsets = [0, 14], sizes = [8, 1], strides = [1, 1]} : vector<8x36xf32> to vector<8x1xf32>
    %298 = vector.extract_strided_slice %284 {offsets = [2, 0], sizes = [1, 384], strides = [1, 1]} : vector<4x384xf32> to vector<1x384xf32>
    %299 = vector.broadcast %297 : vector<8x1xf32> to vector<8x384xf32>
    %300 = vector.broadcast %298 : vector<1x384xf32> to vector<8x384xf32>
    %301 = arith.mulf %299, %300 : vector<8x384xf32>
    %302 = arith.addf %296, %301 : vector<8x384xf32>
    %303 = vector.extract_strided_slice %206 {offsets = [0, 15], sizes = [8, 1], strides = [1, 1]} : vector<8x36xf32> to vector<8x1xf32>
    %304 = vector.extract_strided_slice %284 {offsets = [3, 0], sizes = [1, 384], strides = [1, 1]} : vector<4x384xf32> to vector<1x384xf32>
    %305 = vector.broadcast %303 : vector<8x1xf32> to vector<8x384xf32>
    %306 = vector.broadcast %304 : vector<1x384xf32> to vector<8x384xf32>
    %307 = arith.mulf %305, %306 : vector<8x384xf32>
    %308 = arith.addf %302, %307 : vector<8x384xf32>
    %309 = vector.extract_strided_slice %205 {offsets = [0, 19], sizes = [4, 384], strides = [1, 1]} : vector<4x512xf32> to vector<4x384xf32>
    %310 = vector.extract_strided_slice %206 {offsets = [0, 16], sizes = [8, 1], strides = [1, 1]} : vector<8x36xf32> to vector<8x1xf32>
    %311 = vector.extract_strided_slice %309 {offsets = [0, 0], sizes = [1, 384], strides = [1, 1]} : vector<4x384xf32> to vector<1x384xf32>
    %312 = vector.broadcast %310 : vector<8x1xf32> to vector<8x384xf32>
    %313 = vector.broadcast %311 : vector<1x384xf32> to vector<8x384xf32>
    %314 = arith.mulf %312, %313 : vector<8x384xf32>
    %315 = arith.addf %308, %314 : vector<8x384xf32>
    %316 = vector.extract_strided_slice %206 {offsets = [0, 17], sizes = [8, 1], strides = [1, 1]} : vector<8x36xf32> to vector<8x1xf32>
    %317 = vector.extract_strided_slice %309 {offsets = [1, 0], sizes = [1, 384], strides = [1, 1]} : vector<4x384xf32> to vector<1x384xf32>
    %318 = vector.broadcast %316 : vector<8x1xf32> to vector<8x384xf32>
    %319 = vector.broadcast %317 : vector<1x384xf32> to vector<8x384xf32>
    %320 = arith.mulf %318, %319 : vector<8x384xf32>
    %321 = arith.addf %315, %320 : vector<8x384xf32>
    %322 = vector.extract_strided_slice %206 {offsets = [0, 18], sizes = [8, 1], strides = [1, 1]} : vector<8x36xf32> to vector<8x1xf32>
    %323 = vector.extract_strided_slice %309 {offsets = [2, 0], sizes = [1, 384], strides = [1, 1]} : vector<4x384xf32> to vector<1x384xf32>
    %324 = vector.broadcast %322 : vector<8x1xf32> to vector<8x384xf32>
    %325 = vector.broadcast %323 : vector<1x384xf32> to vector<8x384xf32>
    %326 = arith.mulf %324, %325 : vector<8x384xf32>
    %327 = arith.addf %321, %326 : vector<8x384xf32>
    %328 = vector.extract_strided_slice %206 {offsets = [0, 19], sizes = [8, 1], strides = [1, 1]} : vector<8x36xf32> to vector<8x1xf32>
    %329 = vector.extract_strided_slice %309 {offsets = [3, 0], sizes = [1, 384], strides = [1, 1]} : vector<4x384xf32> to vector<1x384xf32>
    %330 = vector.broadcast %328 : vector<8x1xf32> to vector<8x384xf32>
    %331 = vector.broadcast %329 : vector<1x384xf32> to vector<8x384xf32>
    %332 = arith.mulf %330, %331 : vector<8x384xf32>
    %333 = arith.addf %327, %332 : vector<8x384xf32>
    %334 = vector.extract_strided_slice %205 {offsets = [0, 20], sizes = [4, 384], strides = [1, 1]} : vector<4x512xf32> to vector<4x384xf32>
    %335 = vector.extract_strided_slice %206 {offsets = [0, 20], sizes = [8, 1], strides = [1, 1]} : vector<8x36xf32> to vector<8x1xf32>
    %336 = vector.extract_strided_slice %334 {offsets = [0, 0], sizes = [1, 384], strides = [1, 1]} : vector<4x384xf32> to vector<1x384xf32>
    %337 = vector.broadcast %335 : vector<8x1xf32> to vector<8x384xf32>
    %338 = vector.broadcast %336 : vector<1x384xf32> to vector<8x384xf32>
    %339 = arith.mulf %337, %338 : vector<8x384xf32>
    %340 = arith.addf %333, %339 : vector<8x384xf32>
    %341 = vector.extract_strided_slice %206 {offsets = [0, 21], sizes = [8, 1], strides = [1, 1]} : vector<8x36xf32> to vector<8x1xf32>
    %342 = vector.extract_strided_slice %334 {offsets = [1, 0], sizes = [1, 384], strides = [1, 1]} : vector<4x384xf32> to vector<1x384xf32>
    %343 = vector.broadcast %341 : vector<8x1xf32> to vector<8x384xf32>
    %344 = vector.broadcast %342 : vector<1x384xf32> to vector<8x384xf32>
    %345 = arith.mulf %343, %344 : vector<8x384xf32>
    %346 = arith.addf %340, %345 : vector<8x384xf32>
    %347 = vector.extract_strided_slice %206 {offsets = [0, 22], sizes = [8, 1], strides = [1, 1]} : vector<8x36xf32> to vector<8x1xf32>
    %348 = vector.extract_strided_slice %334 {offsets = [2, 0], sizes = [1, 384], strides = [1, 1]} : vector<4x384xf32> to vector<1x384xf32>
    %349 = vector.broadcast %347 : vector<8x1xf32> to vector<8x384xf32>
    %350 = vector.broadcast %348 : vector<1x384xf32> to vector<8x384xf32>
    %351 = arith.mulf %349, %350 : vector<8x384xf32>
    %352 = arith.addf %346, %351 : vector<8x384xf32>
    %353 = vector.extract_strided_slice %206 {offsets = [0, 23], sizes = [8, 1], strides = [1, 1]} : vector<8x36xf32> to vector<8x1xf32>
    %354 = vector.extract_strided_slice %334 {offsets = [3, 0], sizes = [1, 384], strides = [1, 1]} : vector<4x384xf32> to vector<1x384xf32>
    %355 = vector.broadcast %353 : vector<8x1xf32> to vector<8x384xf32>
    %356 = vector.broadcast %354 : vector<1x384xf32> to vector<8x384xf32>
    %357 = arith.mulf %355, %356 : vector<8x384xf32>
    %358 = arith.addf %352, %357 : vector<8x384xf32>
    %359 = vector.extract_strided_slice %205 {offsets = [0, 36], sizes = [4, 384], strides = [1, 1]} : vector<4x512xf32> to vector<4x384xf32>
    %360 = vector.extract_strided_slice %206 {offsets = [0, 24], sizes = [8, 1], strides = [1, 1]} : vector<8x36xf32> to vector<8x1xf32>
    %361 = vector.extract_strided_slice %359 {offsets = [0, 0], sizes = [1, 384], strides = [1, 1]} : vector<4x384xf32> to vector<1x384xf32>
    %362 = vector.broadcast %360 : vector<8x1xf32> to vector<8x384xf32>
    %363 = vector.broadcast %361 : vector<1x384xf32> to vector<8x384xf32>
    %364 = arith.mulf %362, %363 : vector<8x384xf32>
    %365 = arith.addf %358, %364 : vector<8x384xf32>
    %366 = vector.extract_strided_slice %206 {offsets = [0, 25], sizes = [8, 1], strides = [1, 1]} : vector<8x36xf32> to vector<8x1xf32>
    %367 = vector.extract_strided_slice %359 {offsets = [1, 0], sizes = [1, 384], strides = [1, 1]} : vector<4x384xf32> to vector<1x384xf32>
    %368 = vector.broadcast %366 : vector<8x1xf32> to vector<8x384xf32>
    %369 = vector.broadcast %367 : vector<1x384xf32> to vector<8x384xf32>
    %370 = arith.mulf %368, %369 : vector<8x384xf32>
    %371 = arith.addf %365, %370 : vector<8x384xf32>
    %372 = vector.extract_strided_slice %206 {offsets = [0, 26], sizes = [8, 1], strides = [1, 1]} : vector<8x36xf32> to vector<8x1xf32>
    %373 = vector.extract_strided_slice %359 {offsets = [2, 0], sizes = [1, 384], strides = [1, 1]} : vector<4x384xf32> to vector<1x384xf32>
    %374 = vector.broadcast %372 : vector<8x1xf32> to vector<8x384xf32>
    %375 = vector.broadcast %373 : vector<1x384xf32> to vector<8x384xf32>
    %376 = arith.mulf %374, %375 : vector<8x384xf32>
    %377 = arith.addf %371, %376 : vector<8x384xf32>
    %378 = vector.extract_strided_slice %206 {offsets = [0, 27], sizes = [8, 1], strides = [1, 1]} : vector<8x36xf32> to vector<8x1xf32>
    %379 = vector.extract_strided_slice %359 {offsets = [3, 0], sizes = [1, 384], strides = [1, 1]} : vector<4x384xf32> to vector<1x384xf32>
    %380 = vector.broadcast %378 : vector<8x1xf32> to vector<8x384xf32>
    %381 = vector.broadcast %379 : vector<1x384xf32> to vector<8x384xf32>
    %382 = arith.mulf %380, %381 : vector<8x384xf32>
    %383 = arith.addf %377, %382 : vector<8x384xf32>
    %384 = vector.extract_strided_slice %205 {offsets = [0, 37], sizes = [4, 384], strides = [1, 1]} : vector<4x512xf32> to vector<4x384xf32>
    %385 = vector.extract_strided_slice %206 {offsets = [0, 28], sizes = [8, 1], strides = [1, 1]} : vector<8x36xf32> to vector<8x1xf32>
    %386 = vector.extract_strided_slice %384 {offsets = [0, 0], sizes = [1, 384], strides = [1, 1]} : vector<4x384xf32> to vector<1x384xf32>
    %387 = vector.broadcast %385 : vector<8x1xf32> to vector<8x384xf32>
    %388 = vector.broadcast %386 : vector<1x384xf32> to vector<8x384xf32>
    %389 = arith.mulf %387, %388 : vector<8x384xf32>
    %390 = arith.addf %383, %389 : vector<8x384xf32>
    %391 = vector.extract_strided_slice %206 {offsets = [0, 29], sizes = [8, 1], strides = [1, 1]} : vector<8x36xf32> to vector<8x1xf32>
    %392 = vector.extract_strided_slice %384 {offsets = [1, 0], sizes = [1, 384], strides = [1, 1]} : vector<4x384xf32> to vector<1x384xf32>
    %393 = vector.broadcast %391 : vector<8x1xf32> to vector<8x384xf32>
    %394 = vector.broadcast %392 : vector<1x384xf32> to vector<8x384xf32>
    %395 = arith.mulf %393, %394 : vector<8x384xf32>
    %396 = arith.addf %390, %395 : vector<8x384xf32>
    %397 = vector.extract_strided_slice %206 {offsets = [0, 30], sizes = [8, 1], strides = [1, 1]} : vector<8x36xf32> to vector<8x1xf32>
    %398 = vector.extract_strided_slice %384 {offsets = [2, 0], sizes = [1, 384], strides = [1, 1]} : vector<4x384xf32> to vector<1x384xf32>
    %399 = vector.broadcast %397 : vector<8x1xf32> to vector<8x384xf32>
    %400 = vector.broadcast %398 : vector<1x384xf32> to vector<8x384xf32>
    %401 = arith.mulf %399, %400 : vector<8x384xf32>
    %402 = arith.addf %396, %401 : vector<8x384xf32>
    %403 = vector.extract_strided_slice %206 {offsets = [0, 31], sizes = [8, 1], strides = [1, 1]} : vector<8x36xf32> to vector<8x1xf32>
    %404 = vector.extract_strided_slice %384 {offsets = [3, 0], sizes = [1, 384], strides = [1, 1]} : vector<4x384xf32> to vector<1x384xf32>
    %405 = vector.broadcast %403 : vector<8x1xf32> to vector<8x384xf32>
    %406 = vector.broadcast %404 : vector<1x384xf32> to vector<8x384xf32>
    %407 = arith.mulf %405, %406 : vector<8x384xf32>
    %408 = arith.addf %402, %407 : vector<8x384xf32>
    %409 = vector.extract_strided_slice %205 {offsets = [0, 38], sizes = [4, 384], strides = [1, 1]} : vector<4x512xf32> to vector<4x384xf32>
    %410 = vector.extract_strided_slice %206 {offsets = [0, 32], sizes = [8, 1], strides = [1, 1]} : vector<8x36xf32> to vector<8x1xf32>
    %411 = vector.extract_strided_slice %409 {offsets = [0, 0], sizes = [1, 384], strides = [1, 1]} : vector<4x384xf32> to vector<1x384xf32>
    %412 = vector.broadcast %410 : vector<8x1xf32> to vector<8x384xf32>
    %413 = vector.broadcast %411 : vector<1x384xf32> to vector<8x384xf32>
    %414 = arith.mulf %412, %413 : vector<8x384xf32>
    %415 = arith.addf %408, %414 : vector<8x384xf32>
    %416 = vector.extract_strided_slice %206 {offsets = [0, 33], sizes = [8, 1], strides = [1, 1]} : vector<8x36xf32> to vector<8x1xf32>
    %417 = vector.extract_strided_slice %409 {offsets = [1, 0], sizes = [1, 384], strides = [1, 1]} : vector<4x384xf32> to vector<1x384xf32>
    %418 = vector.broadcast %416 : vector<8x1xf32> to vector<8x384xf32>
    %419 = vector.broadcast %417 : vector<1x384xf32> to vector<8x384xf32>
    %420 = arith.mulf %418, %419 : vector<8x384xf32>
    %421 = arith.addf %415, %420 : vector<8x384xf32>
    %422 = vector.extract_strided_slice %206 {offsets = [0, 34], sizes = [8, 1], strides = [1, 1]} : vector<8x36xf32> to vector<8x1xf32>
    %423 = vector.extract_strided_slice %409 {offsets = [2, 0], sizes = [1, 384], strides = [1, 1]} : vector<4x384xf32> to vector<1x384xf32>
    %424 = vector.broadcast %422 : vector<8x1xf32> to vector<8x384xf32>
    %425 = vector.broadcast %423 : vector<1x384xf32> to vector<8x384xf32>
    %426 = arith.mulf %424, %425 : vector<8x384xf32>
    %427 = arith.addf %421, %426 : vector<8x384xf32>
    %428 = vector.extract_strided_slice %206 {offsets = [0, 35], sizes = [8, 1], strides = [1, 1]} : vector<8x36xf32> to vector<8x1xf32>
    %429 = vector.extract_strided_slice %409 {offsets = [3, 0], sizes = [1, 384], strides = [1, 1]} : vector<4x384xf32> to vector<1x384xf32>
    %430 = vector.broadcast %428 : vector<8x1xf32> to vector<8x384xf32>
    %431 = vector.broadcast %429 : vector<1x384xf32> to vector<8x384xf32>
    %432 = arith.mulf %430, %431 : vector<8x384xf32>
    %433 = arith.addf %427, %432 : vector<8x384xf32>
    %434 = vector.broadcast %207 : vector<8x1xf32> to vector<8x384xf32>
    %435 = arith.addf %433, %434 : vector<8x384xf32>
    %436 = vector.extract_strided_slice %435 {offsets = [0, 0], sizes = [4, 384], strides = [1, 1]} : vector<8x384xf32> to vector<4x384xf32>
    %437 = vector.extract_strided_slice %435 {offsets = [4, 0], sizes = [4, 384], strides = [1, 1]} : vector<8x384xf32> to vector<4x384xf32>
    %cst_23 = arith.constant 1.000000e+00 : f32
    %438 = vector.broadcast %cst_23 : f32 to vector<4x384xf32>
    %439 = arith.addf %438, %436 : vector<4x384xf32>
    %440 = arith.mulf %19, %439 : vector<4x384xf32>
    %441 = arith.addf %440, %437 : vector<4x384xf32>
    %c0_24 = arith.constant 0 : index
    %c0_25 = arith.constant 0 : index
    %c0_26 = arith.constant 0 : index
    %442 = vector.load %arg8[%c0_24, %c0_25, %c0_26] : memref<1x4x384xf32, #tpu.memory_space<vmem>>, vector<1x4x384xf32>
    %443 = vector.shape_cast %442 : vector<1x4x384xf32> to vector<4x384xf32>
    %444 = vector.shape_cast %441 : vector<4x384xf32> to vector<1x4x384xf32>
    tpu.vector_store %arg8[%c0_24, %c0_25, %c0_26], %444 {strides = array<i32>} : memref<1x4x384xf32, #tpu.memory_space<vmem>>, vector<1x4x384xf32>,
    return
  }
  func.func @transform_0(%arg0: i32) -> (i32, i32, i32) {
    %c0_i32 = arith.constant 0 : i32
    %c0_i32_0 = arith.constant 0 : i32
    %c0_i32_1 = arith.constant 0 : i32
    return %arg0, %c0_i32, %c0_i32_0 : i32, i32, i32
  }
  func.func @transform_1(%arg0: i32) -> (i32, i32, i32) {
    %c0_i32 = arith.constant 0 : i32
    %c0_i32_0 = arith.constant 0 : i32
    %c0_i32_1 = arith.constant 0 : i32
    return %arg0, %c0_i32, %c0_i32_0 : i32, i32, i32
  }
  func.func @transform_2(%arg0: i32) -> (i32, i32) {
    %c0_i32 = arith.constant 0 : i32
    %c0_i32_0 = arith.constant 0 : i32
    %c0_i32_1 = arith.constant 0 : i32
    return %c0_i32, %c0_i32_0 : i32, i32
  }
  func.func @transform_3(%arg0: i32) -> (i32, i32) {
    %c0_i32 = arith.constant 0 : i32
    %c0_i32_0 = arith.constant 0 : i32
    %c0_i32_1 = arith.constant 0 : i32
    return %c0_i32, %c0_i32_0 : i32, i32
  }
  func.func @transform_4(%arg0: i32) -> (i32, i32) {
    %c0_i32 = arith.constant 0 : i32
    %c0_i32_0 = arith.constant 0 : i32
    %c0_i32_1 = arith.constant 0 : i32
    return %c0_i32, %c0_i32_0 : i32, i32
  }
  func.func @transform_5(%arg0: i32) -> (i32, i32) {
    %c0_i32 = arith.constant 0 : i32
    %c0_i32_0 = arith.constant 0 : i32
    %c0_i32_1 = arith.constant 0 : i32
    return %c0_i32, %c0_i32_0 : i32, i32
  }
  func.func @transform_6(%arg0: i32) -> (i32, i32) {
    %c0_i32 = arith.constant 0 : i32
    %c0_i32_0 = arith.constant 0 : i32
    %c0_i32_1 = arith.constant 0 : i32
    return %c0_i32, %c0_i32_0 : i32, i32
  }
  func.func @transform_7(%arg0: i32) -> (i32, i32, i32) {
    %c0_i32 = arith.constant 0 : i32
    %c0_i32_0 = arith.constant 0 : i32
    %c0_i32_1 = arith.constant 0 : i32
    return %arg0, %c0_i32, %c0_i32_0 : i32, i32, i32
  }
}

</mosaic_0001>

<bundles_post_ra>
// kernel: tpu_custom_call.1
= control target key start
LH: loop header
LB: loop body
LE: loop exit
PB: predicated region body
PF: predicated region fallthrough
CT: control target
= control target key end

     0   :  { %12 = vsyncpa [#allocation3], 0  ;;  %s4426_s0 = inlined_call_operand.vmem [shape: f32[2,4,384], index: 0, kind: input, shape index: {}]   ;;  %s4427_s1 = inlined_call_operand.vmem [shape: f32[2,3,640], index: 1, kind: input, shape index: {}]   ;;  %s4428_s2 = inlined_call_operand.vmem [shape: f32[1,512], index: 2, kind: input, shape index: {}]   ;;  %s4429_s3 = inlined_call_operand.vmem [shape: f32[4,27], index: 3, kind: input, shape index: {}]   ;;  %s4430_s4 = inlined_call_operand.vmem [shape: f32[4,1], index: 4, kind: input, shape index: {}]   ;;  %s4431_s5 = inlined_call_operand.vmem [shape: f32[8,36], index: 5, kind: input, shape index: {}]   ;;  %s4432_s6 = inlined_call_operand.vmem [shape: f32[8,1], index: 6, kind: input, shape index: {}]   ;;  %s4433_s7 = inlined_call_operand.hbm [shape: f32[2,4,384], index: 7, kind: output, shape index: {}]  }
   0x1   :  { %14 = vsyncpa [#allocation3 + $0x1], 0  ;;  %s2790_s24 = smov 0   ;;  %s2792_s25 = smov 0  }
   0x2   :  { %s2794_s26 = smov 0   ;;  %s2796_s27 = smov 0  }
   0x3 LB: > { %s2811_s28 = sadd.s32 4294967295, %s2703_s27   ;;  %s2475_s29 = sadd.s32 4294967294, %s2703_s27   ;;  %s2703_s27 = sphi %s2796_s27, %s4680_s27   ;;  %s2699_s26 = sphi %s2794_s26, %s4679_s26   ;;  %s2695_s25 = sphi %s2792_s25, %s4678_s25   ;;  %s2691_s24 = sphi %s2790_s24, %s4677_s24  }
   0x4   : > { %s2815_s30 = sadd.s32 1, %s2703_s27   ;;  %s184_s8 = sadd.s32 1, %s2699_s26 }
   0x5   : > { %s181_s9 = ssub.s32 %s2703_s27, %s2815_s30  ;;  %p194_p0 = scmp.ne.s32.totalorder %s2699_s26, %s2695_s25 }
   0x6   : > { %p182_p1 = scmp.eq.s32.totalorder %s181_s9, 0  ;;  %p195_p2 = scmp.eq.s32.totalorder %s2811_s28, 1 }
   0x7   : > { %p200_p3 = scmp.ne.s32.totalorder %s2695_s25, %s2691_s24  ;;  %p201_p4 = scmp.eq.s32.totalorder %s2475_s29, 1 }
   0x8   : > { %s2826_s10 = scalar_select %p182_p1, %s2699_s26, %s184_s8  }
   0x9   : > { %p2828_p5 = por %p195_p2, %p194_p0  ;;  %p2832_p6 = por %p201_p4, %p200_p3 }
   0xa   : > { %p2478_p7 = scmp.ge.s32.totalorder %s2703_s27, 1  ;;  %p250_p8 = scmp.lt.s32.totalorder %s2703_s27, 3 }
   0xc   : > { %p251_p9 = pnand %p2478_p7, %p250_p8 }
   0xe   : > { %254 = sbr.rel (%p251_p9) target bundleno = 3303 (0xce7), region = 48 }
  0x13   : > { %v2841_v0 = vld [vmem:[%s4429_s3] sm:$0xf]  ;;  %v4457_v1 = vmov 2   ;;  %v4458_v2 = vmov 0   ;;  %v2707_v3 = vmov 1   ;;  %v4455_v4 = vmov 3  }
  0x14   : > { %2574 = vset.pattern.permute.xlu2 %v4457_v1  ;;  %2572 = vset.pattern.permute.xlu1 %v4458_v2  ;;  %p287_p10 = scmp.lt.s32.totalorder %s2811_s28, 1  ;;  %v4454_v5 = vmov 4   ;;  %v4453_v6 = vmov 5   ;;  %vm310_vm0 = vcmask 1043456   ;;  %v4452_v10 = vmov 6   ;;  %s2715_s29 = smov 127  }
  0x15   : > { %426 = vperm.xlu2 %2574, %v2841_v0   ;;  %376 = vperm.xlu1 %2572, %v2841_v0   ;;  %v4451_v20 = vmov 7   ;;  %v4450_v29 = vmov 8   ;;  %v4449_v30 = vmov 9   ;;  %s2716_s8 = smov 126   ;;  %s2718_s9 = smov 110   ;;  %vm477_vm1 = vcmask 1039360  }
  0x16   : > { %2601 = vset.pattern.permute.xlu0 %v2707_v3  ;;  %s2853_s15 = scalar_select %p287_p10, %s2811_s28, 1  ;;  %vm592_vm2 = vcmask 1031168   ;;  %vm701_vm3 = vcmask 900096   ;;  %vm810_vm4 = vcmask 891904   ;;  %vm919_vm5 = vcmask 883712  }
  0x17   : > { %s2722_s13 = smov 109   ;;  %s2726_s14 = smov 108   ;;  %vm1028_vm6 = vcmask 752640   ;;  %vm1137_vm7 = vcmask 744448   ;;  %vm1246_vm8 = vcmask 736256  }
  0x18   : > { %s2485_s16 = smul.u32 12, %s2853_s15  ;;  %s2738_s17 = smov 90  }
  0x19   : > { %s2486_s20 = smul.u32 20, %s2853_s15  ;;  %s2730_s15 = smov 92  }
  0x1a   : > { %s291_s19 = scalar_lea.vmem %s4426_s0, %s2485_s16  ;;  %s2734_s16 = smov 91  }
  0x1b   : > { %v2863_v7 = vld [vmem:[%s291_s19] sm:$0xff]  ;;  %v2866_v8 = vld [vmem:[%s291_s19 + $0x8] sm:$0xf]  ;;  %s296_s23 = scalar_lea.vmem %s4427_s1, %s2486_s20 }
  0x1c   : > { %4506 = vst [vmem:[#allocation5_spill] sm:$0xff] %v2863_v7  ;;  %v318_v9 = vmul.f32 %v2863_v7, %v2863_v7  ;;  %v319_v11 = vmul.f32 %v2866_v8, %v2866_v8  ;;  %v369_v31 = vld [vmem:[%s296_s23] sm:$0x77]  ;;  %v2893_v33 = vld [vmem:[%s296_s23 + $0x8] sm:$0x77] }
  0x1d   : > { %2575 = vset.pattern.permute.xlu2 %v4455_v4  ;;  %2573 = vset.pattern.permute.xlu1 %v2707_v3  ;;  %301 = vst [vmem:[#allocation1] ss:$2 sm:$0xff] %v2863_v7  ;;  %v381_v34 = vperm.slane %v369_v31, 0  ;;  %v382_v35 = vperm.slane %v369_v31, 4  ;;  %v383_v36 = vperm.slane %v2893_v33, 0  ;;  %v384_v41 = vperm.slane %v2893_v33, 4 }
  0x1e   : > { %450 = vperm.xlu2 %2575, %v2841_v0   ;;  %402 = vperm.xlu1 %2573, %v2841_v0   ;;  %4507 = vst [vmem:[#allocation6_spill] sm:$0xff] %v2866_v8  ;;  %v371_v37 = vld [vmem:[%s296_s23 + $0x10] sm:$0x7]  ;;  %v405_v53 = vperm.slane %v369_v31, 1  ;;  %v406_v54 = vperm.slane %v369_v31, 5  ;;  %v407_v55 = vperm.slane %v2893_v33, 1 }
  0x1f   : > { %303 = vst [vmem:[#allocation1 + $0x10] ss:$2 sm:$0xff] %v2866_v8  ;;  %v2896_v38 = vperm.slane %v381_v34, 0  ;;  %v2898_v39 = vperm.slane %v382_v35, 0  ;;  %v2900_v40 = vperm.slane %v383_v36, 0  ;;  %v454_v42 = vperm.slane %v371_v37, 0 }
  0x20   : > { %v2906_v47 = vperm.slane %v384_v41, 0  ;;  %v2922_v56 = vperm.slane %v405_v53, 1  ;;  %v2924_v57 = vperm.slane %v406_v54, 1  ;;  %v2926_v58 = vperm.slane %v407_v55, 1 }
  0x21   : > { %v2910_v48 = vperm.slane %v454_v42, 0  ;;  %v494_v63 = vperm.slane %v371_v37, 1  ;;  %v408_v3 = vperm.slane %v2893_v33, 5  ;;  %v4448_v34 = vmov 10  }
  0x24   : > { %v304_v12 = vld.sshfl [vmem:[#allocation1] sm:$0xff pattern:$0x75316420]  ;;  %v305_v13 = vld.sshfl [vmem:[#allocation1 + $0x8] sm:$0xff pattern:$0x75316420] }
  0x25   : > { %v311_v14 = vsel %vm310_vm0, %v304_v12, 0.0  ;;  %v312_v15 = vsel %vm310_vm0, %v305_v13, 0.0  ;;  %322 = vst [vmem:[#allocation1] ss:$2 sm:$0xff] %v318_v9  ;;  %v431_v9 = vperm.slane %v2893_v33, 2  ;;  %v2938_v12 = vperm.slane %v408_v3, 1 }
  0x26   : > { %2576 = vset.pattern.permute.xlu1 %v4454_v5  ;;  %2600 = vset.pattern.permute.xlu2 %v4458_v2  ;;  %v306_v16 = vld.sshfl [vmem:[#allocation1 + $0x10] sm:$0xff pattern:$0x75316420]  ;;  %v313_v17 = vadd.f32 %v312_v15, %v311_v14 }
  0x27   : > { %491 = vperm.xlu1 %2576, %v2841_v0   ;;  %v314_v18 = vsel %vm310_vm0, %v306_v16, 0.0  ;;  %324 = vst [vmem:[#allocation1 + $0x10] ss:$2 sm:$0xff] %v319_v11  ;;  %v2936_v11 = vperm.slane %v494_v63, 1  ;;  %v2940_v13 = vperm.slane %v431_v9, 2 }
  0x28   : > { %v315_v19 = vadd.f32 %v314_v18, %v313_v17  ;;  %v429_v18 = vperm.slane %v369_v31, 2 }
  0x2a   : > { %316 = vadd.xlane.f32.xlu0 %v315_v19  ;;  %v430_v19 = vperm.slane %v369_v31, 6 }
  0x2c   : > { %v325_v21 = vld.sshfl [vmem:[#allocation1] sm:$0xff pattern:$0x75316420]  ;;  %v326_v22 = vld.sshfl [vmem:[#allocation1 + $0x8] sm:$0xff pattern:$0x75316420] }
  0x2d   : > { %v331_v23 = vsel %vm310_vm0, %v325_v21, 0.0  ;;  %v332_v24 = vsel %vm310_vm0, %v326_v22, 0.0  ;;  %v2948_v21 = vperm.slane %v429_v18, 2  ;;  %v2950_v22 = vperm.slane %v430_v19, 2 }
  0x2e   : > { %v327_v25 = vld.sshfl [vmem:[#allocation1 + $0x10] sm:$0xff pattern:$0x75316420]  ;;  %v333_v26 = vadd.f32 %v332_v24, %v331_v23  ;;  %v533_v24 = vperm.slane %v371_v37, 2 }
  0x2f   : > { %2577 = vset.pattern.permute.xlu1 %v4453_v6  ;;  %v334_v27 = vsel %vm310_vm0, %v327_v25, 0.0 }
  0x30   : > { %530 = vperm.xlu1 %2577, %v2841_v0   ;;  %v335_v28 = vadd.f32 %v334_v27, %v333_v26  ;;  %v432_v27 = vperm.slane %v2893_v33, 6  ;;  %v2959_v31 = vperm.slane %v533_v24, 2 }
  0x32   : > { %336 = vadd.xlane.f32.xlu0 %v335_v28  ;;  %v2962_v35 = vperm.slane %v432_v27, 2 }
  0x38   : > { %2578 = vset.pattern.permute.xlu1 %v4452_v10 }
  0x39   : > { %569 = vperm.xlu1 %2578, %v2841_v0  }
  0x41   : > { %2579 = vset.pattern.permute.xlu1 %v4451_v20 }
  0x42   : > { %606 = vperm.xlu1 %2579, %v2841_v0  }
  0x4a   : > { %2580 = vset.pattern.permute.xlu1 %v4450_v29 }
  0x4b   : > { %642 = vperm.xlu1 %2580, %v2841_v0  }
  0x53   : > { %2581 = vset.pattern.permute.xlu1 %v4449_v30 }
  0x54   : > { %678 = vperm.xlu1 %2581, %v2841_v0  }
  0x5c   : > { %2582 = vset.pattern.permute.xlu1 %v4448_v34 }
  0x6f   : > { %v2891_v32 = vpop.permute.xlu2 %426 }
  0x78   : > { %v451_v43 = vpop.permute.xlu2 %450 }
  0x79   : > { %v458_v44 = vmul.f32 %v451_v43, %v2898_v39  ;;  %v457_v45 = vmul.f32 %v451_v43, %v2896_v38  ;;  %v459_v46 = vmul.f32 %v451_v43, %v2900_v40  ;;  %v460_v49 = vmul.f32 %v451_v43, %v2906_v47 }
  0x7a   : > { %v461_v50 = vmul.f32 %v2910_v48, %v451_v43 }
  0x7b   : > { %469 = vrot.lane.b32.xlu1 %v458_v44, %s2715_s29  ;;  %467 = vrot.lane.b32.xlu0 %v457_v45, %s2715_s29 }
  0x7c   : > { %471 = vrot.lane.b32.xlu2 %v459_v46, %s2715_s29 }
  0x83   : > { %473 = vrot.lane.b32.xlu1 %v460_v49, %s2715_s29 }
  0x84   : > { %475 = vrot.lane.b32.xlu2 %v461_v50, %s2715_s29 }
  0x87   : > { %v2917_v51 = vpop.permute.xlu1 %376 }
  0x90   : > { %v2919_v52 = vpop.permute.xlu1 %402 }
  0x99   : > { %v492_v59 = vpop.permute.xlu1 %491 }
  0x9a   : > { %v497_v60 = vmul.f32 %v492_v59, %v2922_v56  ;;  %v499_v61 = vmul.f32 %v492_v59, %v2926_v58  ;;  %v498_v62 = vmul.f32 %v492_v59, %v2924_v57  ;;  %v500_v15 = vmul.f32 %v492_v59, %v2938_v12 }
  0x9b   : > { %v501_v16 = vmul.f32 %v2936_v11, %v492_v59 }
  0x9c   : > { %507 = vrot.lane.b32.xlu2 %v497_v60, %s2715_s29  ;;  %511 = vrot.lane.b32.xlu1 %v499_v61, %s2715_s29 }
  0x9d   : > { %509 = vrot.lane.b32.xlu0 %v498_v62, %s2715_s29 }
  0xa2   : > { %v531_v14 = vpop.permute.xlu1 %530 }
  0xa3   : > { %v538_v17 = vmul.f32 %v531_v14, %v2940_v13  ;;  %v536_v23 = vmul.f32 %v531_v14, %v2948_v21  ;;  %v537_v26 = vmul.f32 %v531_v14, %v2950_v22  ;;  %v539_v36 = vmul.f32 %v531_v14, %v2962_v35 }
  0xa4   : > { %513 = vrot.lane.b32.xlu2 %v500_v15, %s2715_s29  ;;  %v540_v33 = vmul.f32 %v2959_v31, %v531_v14 }
  0xa5   : > { %515 = vrot.lane.b32.xlu0 %v501_v16, %s2715_s29  ;;  %550 = vrot.lane.b32.xlu1 %v538_v17, %s2715_s29 }
  0xab   : > { %v570_v25 = vpop.permute.xlu1 %569 }
  0xac   : > { %546 = vrot.lane.b32.xlu2 %v536_v23, %s2715_s29  ;;  %v574_v28 = vmul.f32 %v570_v25, %v2900_v40  ;;  %v572_v42 = vmul.f32 %v570_v25, %v2896_v38  ;;  %v573_v43 = vmul.f32 %v570_v25, %v2898_v39  ;;  %v575_v46 = vmul.f32 %v570_v25, %v2906_v47 }
  0xad   : > { %548 = vrot.lane.b32.xlu0 %v537_v26, %s2715_s29  ;;  %v576_v49 = vmul.f32 %v570_v25, %v2910_v48  ;;  %v4447_v26 = vmov 11  }
  0xae   : > { %586 = vrot.lane.b32.xlu1 %v574_v28, %s2716_s8 }
  0xb4   : > { %v607_v37 = vpop.permute.xlu1 %606  ;;  %552 = vrot.lane.b32.xlu2 %v539_v36, %s2715_s29 }
  0xb5   : > { %554 = vrot.lane.b32.xlu0 %v540_v33, %s2715_s29  ;;  %v611_v41 = vmul.f32 %v607_v37, %v2926_v58  ;;  %v609_v54 = vmul.f32 %v607_v37, %v2922_v56  ;;  %v610_v55 = vmul.f32 %v607_v37, %v2924_v57  ;;  %v612_v59 = vmul.f32 %v607_v37, %v2938_v12 }
  0xb6   : > { %v613_v60 = vmul.f32 %v607_v37, %v2936_v11 }
  0xb7   : > { %623 = vrot.lane.b32.xlu1 %v611_v41, %s2716_s8 }
  0xbc   : > { %582 = vrot.lane.b32.xlu2 %v572_v42, %s2716_s8 }
  0xbd   : > { %584 = vrot.lane.b32.xlu0 %v573_v43, %s2716_s8  ;;  %v643_v44 = vpop.permute.xlu1 %642 }
  0xbe   : > { %v647_v45 = vmul.f32 %v643_v44, %v2940_v13  ;;  %v645_v61 = vmul.f32 %v643_v44, %v2948_v21  ;;  %v646_v62 = vmul.f32 %v643_v44, %v2950_v22  ;;  %v648_v63 = vmul.f32 %v643_v44, %v2962_v35 }
  0xbf   : > { %v649_v3 = vmul.f32 %v643_v44, %v2959_v31  ;;  %v4446_v44 = vmov 12  }
  0xc0   : > { %659 = vrot.lane.b32.xlu1 %v647_v45, %s2716_s8 }
  0xc4   : > { %588 = vrot.lane.b32.xlu2 %v575_v46, %s2716_s8 }
  0xc5   : > { %590 = vrot.lane.b32.xlu0 %v576_v49, %s2716_s8 }
  0xc6   : > { %v679_v50 = vpop.permute.xlu1 %678 }
  0xc7   : > { %v683_v53 = vmul.f32 %v679_v50, %v2900_v40  ;;  %v681_v9 = vmul.f32 %v679_v50, %v2896_v38  ;;  %v682_v14 = vmul.f32 %v679_v50, %v2898_v39  ;;  %v684_v15 = vmul.f32 %v679_v50, %v2906_v47 }
  0xc8   : > { %v685_v16 = vmul.f32 %v679_v50, %v2910_v48 }
  0xc9   : > { %695 = vrot.lane.b32.xlu1 %v683_v53, %s2718_s9 }
  0xcc   : > { %619 = vrot.lane.b32.xlu2 %v609_v54, %s2716_s8 }
  0xcd   : > { %621 = vrot.lane.b32.xlu0 %v610_v55, %s2716_s8 }
  0xd1   : > { %715 = vperm.xlu1 %2582, %v2841_v0  }
  0xd4   : > { %625 = vrot.lane.b32.xlu2 %v612_v59, %s2716_s8  ;;  %v4445_v59 = vmov 13  }
  0xd5   : > { %627 = vrot.lane.b32.xlu0 %v613_v60, %s2716_s8 }
  0xd9   : > { %2583 = vset.pattern.permute.xlu1 %v4447_v26 }
  0xdc   : > { %655 = vrot.lane.b32.xlu2 %v645_v61, %s2716_s8 }
  0xdd   : > { %657 = vrot.lane.b32.xlu0 %v646_v62, %s2716_s8 }
  0xe4   : > { %661 = vrot.lane.b32.xlu2 %v648_v63, %s2716_s8 }
  0xe5   : > { %663 = vrot.lane.b32.xlu0 %v649_v3, %s2716_s8 }
  0xec   : > { %691 = vrot.lane.b32.xlu2 %v681_v9, %s2718_s9 }
  0xed   : > { %693 = vrot.lane.b32.xlu0 %v682_v14, %s2718_s9  ;;  %v3007_v17 = vpop.permute.xlu1 %469 }
  0xf4   : > { %697 = vrot.lane.b32.xlu2 %v684_v15, %s2718_s9  ;;  %v4444_v15 = vmov 14  }
  0xf5   : > { %699 = vrot.lane.b32.xlu0 %v685_v16, %s2718_s9  ;;  %v3009_v18 = vpop.permute.xlu1 %473 }
 0x10e   : > { %v3011_v19 = vpop.permute.xlu1 %511 }
 0x117   : > { %v3013_v23 = vpop.permute.xlu1 %550 }
 0x120   : > { %v3015_v24 = vpop.permute.xlu1 %586 }
 0x129   : > { %v3017_v25 = vpop.permute.xlu1 %623 }
 0x132   : > { %v3020_v27 = vpop.permute.xlu1 %659 }
 0x13b   : > { %v3022_v28 = vpop.permute.xlu1 %695 }
 0x143   : > { %v716_v36 = vpop.permute.xlu1 %715 }
 0x144   : > { %v720_v33 = vmul.f32 %v716_v36, %v2926_v58  ;;  %v718_v37 = vmul.f32 %v716_v36, %v2922_v56  ;;  %v719_v41 = vmul.f32 %v716_v36, %v2924_v57  ;;  %v721_v42 = vmul.f32 %v716_v36, %v2938_v12 }
 0x145   : > { %v722_v43 = vmul.f32 %v716_v36, %v2936_v11 }
 0x146   : > { %732 = vrot.lane.b32.xlu1 %v720_v33, %s2718_s9  ;;  %728 = vrot.lane.b32.xlu2 %v718_v37, %s2718_s9 }
 0x147   : > { %730 = vrot.lane.b32.xlu0 %v719_v41, %s2718_s9 }
 0x14e   : > { %751 = vperm.xlu1 %2583, %v2841_v0   ;;  %734 = vrot.lane.b32.xlu2 %v721_v42, %s2718_s9 }
 0x14f   : > { %736 = vrot.lane.b32.xlu0 %v722_v43, %s2718_s9 }
 0x156   : > { %2584 = vset.pattern.permute.xlu1 %v4446_v44 }
 0x1b8   : > { %v3036_v45 = vpop.permute.xlu1 %732 }
 0x1b9   : > { %4508 = vst [vmem:[#allocation7_spill] sm:$0xff] %v3036_v45 }
 0x1c0   : > { %v752_v46 = vpop.permute.xlu1 %751 }
 0x1c1   : > { %v756_v49 = vmul.f32 %v752_v46, %v2940_v13  ;;  %v754_v50 = vmul.f32 %v752_v46, %v2948_v21  ;;  %v755_v53 = vmul.f32 %v752_v46, %v2950_v22  ;;  %v757_v54 = vmul.f32 %v752_v46, %v2962_v35 }
 0x1c2   : > { %v758_v55 = vmul.f32 %v752_v46, %v2959_v31  ;;  %v4442_v46 = vmov 15  }
 0x1c3   : > { %768 = vrot.lane.b32.xlu1 %v756_v49, %s2718_s9  ;;  %764 = vrot.lane.b32.xlu2 %v754_v50, %s2718_s9 }
 0x1c4   : > { %766 = vrot.lane.b32.xlu0 %v755_v53, %s2718_s9 }
 0x1cb   : > { %787 = vperm.xlu1 %2584, %v2841_v0   ;;  %770 = vrot.lane.b32.xlu2 %v757_v54, %s2718_s9 }
 0x1cc   : > { %772 = vrot.lane.b32.xlu0 %v758_v55, %s2718_s9 }
 0x1d3   : > { %2585 = vset.pattern.permute.xlu1 %v4445_v59 }
 0x235   : > { %v3050_v60 = vpop.permute.xlu1 %768 }
 0x236   : > { %4509 = vst [vmem:[#allocation8_spill] sm:$0xff] %v3050_v60 }
 0x23d   : > { %v788_v61 = vpop.permute.xlu1 %787 }
 0x23e   : > { %v792_v62 = vmul.f32 %v788_v61, %v2900_v40  ;;  %v790_v63 = vmul.f32 %v788_v61, %v2896_v38  ;;  %v791_v3 = vmul.f32 %v788_v61, %v2898_v39  ;;  %v793_v9 = vmul.f32 %v788_v61, %v2906_v47 }
 0x23f   : > { %v794_v14 = vmul.f32 %v788_v61, %v2910_v48 }
 0x240   : > { %804 = vrot.lane.b32.xlu1 %v792_v62, %s2722_s13  ;;  %800 = vrot.lane.b32.xlu2 %v790_v63, %s2722_s13  ;;  %v4440_v63 = vmov 16  }
 0x241   : > { %802 = vrot.lane.b32.xlu0 %v791_v3, %s2722_s13 }
 0x248   : > { %824 = vperm.xlu1 %2585, %v2841_v0   ;;  %806 = vrot.lane.b32.xlu2 %v793_v9, %s2722_s13 }
 0x249   : > { %808 = vrot.lane.b32.xlu0 %v794_v14, %s2722_s13 }
 0x250   : > { %2586 = vset.pattern.permute.xlu1 %v4444_v15 }
 0x2b2   : > { %v3064_v16 = vpop.permute.xlu1 %804 }
 0x2b3   : > { %4510 = vst [vmem:[#allocation9_spill] sm:$0xff] %v3064_v16 }
 0x2ba   : > { %v825_v36 = vpop.permute.xlu1 %824 }
 0x2bb   : > { %v829_v33 = vmul.f32 %v825_v36, %v2926_v58  ;;  %v827_v37 = vmul.f32 %v825_v36, %v2922_v56  ;;  %v828_v41 = vmul.f32 %v825_v36, %v2924_v57  ;;  %v830_v42 = vmul.f32 %v825_v36, %v2938_v12 }
 0x2bc   : > { %v831_v43 = vmul.f32 %v825_v36, %v2936_v11 }
 0x2bd   : > { %841 = vrot.lane.b32.xlu1 %v829_v33, %s2722_s13  ;;  %837 = vrot.lane.b32.xlu2 %v827_v37, %s2722_s13 }
 0x2be   : > { %839 = vrot.lane.b32.xlu0 %v828_v41, %s2722_s13 }
 0x2c5   : > { %860 = vperm.xlu1 %2586, %v2841_v0   ;;  %843 = vrot.lane.b32.xlu2 %v830_v42, %s2722_s13  ;;  %v4438_v42 = vmov 17  }
 0x2c6   : > { %845 = vrot.lane.b32.xlu0 %v831_v43, %s2722_s13 }
 0x2cd   : > { %2587 = vset.pattern.permute.xlu1 %v4442_v46 }
 0x32f   : > { %v3078_v49 = vpop.permute.xlu1 %841 }
 0x330   : > { %4511 = vst [vmem:[#allocation10_spill] sm:$0xff] %v3078_v49 }
 0x337   : > { %v861_v50 = vpop.permute.xlu1 %860 }
 0x338   : > { %v865_v53 = vmul.f32 %v861_v50, %v2940_v13  ;;  %v863_v54 = vmul.f32 %v861_v50, %v2948_v21  ;;  %v864_v55 = vmul.f32 %v861_v50, %v2950_v22  ;;  %v866_v61 = vmul.f32 %v861_v50, %v2962_v35 }
 0x339   : > { %v867_v62 = vmul.f32 %v861_v50, %v2959_v31 }
 0x33a   : > { %877 = vrot.lane.b32.xlu1 %v865_v53, %s2722_s13  ;;  %873 = vrot.lane.b32.xlu2 %v863_v54, %s2722_s13 }
 0x33b   : > { %875 = vrot.lane.b32.xlu0 %v864_v55, %s2722_s13 }
 0x342   : > { %896 = vperm.xlu1 %2587, %v2841_v0   ;;  %879 = vrot.lane.b32.xlu2 %v866_v61, %s2722_s13 }
 0x343   : > { %881 = vrot.lane.b32.xlu0 %v867_v62, %s2722_s13 }
 0x34a   : > { %2588 = vset.pattern.permute.xlu1 %v4440_v63 }
 0x3ac   : > { %v3092_v3 = vpop.permute.xlu1 %877 }
 0x3ad   : > { %4512 = vst [vmem:[#allocation11_spill] sm:$0xff] %v3092_v3  ;;  %v4479_v3 = vmov 26  }
 0x3b4   : > { %v897_v9 = vpop.permute.xlu1 %896 }
 0x3b5   : > { %v901_v14 = vmul.f32 %v897_v9, %v2900_v40  ;;  %v899_v36 = vmul.f32 %v897_v9, %v2896_v38  ;;  %v900_v33 = vmul.f32 %v897_v9, %v2898_v39  ;;  %v902_v37 = vmul.f32 %v897_v9, %v2906_v47 }
 0x3b6   : > { %v903_v41 = vmul.f32 %v897_v9, %v2910_v48  ;;  %v4436_v9 = vmov 18  }
 0x3b7   : > { %913 = vrot.lane.b32.xlu1 %v901_v14, %s2726_s14  ;;  %909 = vrot.lane.b32.xlu2 %v899_v36, %s2726_s14 }
 0x3b8   : > { %911 = vrot.lane.b32.xlu0 %v900_v33, %s2726_s14 }
 0x3bf   : > { %933 = vperm.xlu1 %2588, %v2841_v0   ;;  %915 = vrot.lane.b32.xlu2 %v902_v37, %s2726_s14 }
 0x3c0   : > { %917 = vrot.lane.b32.xlu0 %v903_v41, %s2726_s14 }
 0x3c7   : > { %2589 = vset.pattern.permute.xlu1 %v4438_v42 }
 0x429   : > { %v3106_v43 = vpop.permute.xlu1 %913 }
 0x42a   : > { %4513 = vst [vmem:[#allocation12_spill] sm:$0xff] %v3106_v43 }
 0x431   : > { %v934_v50 = vpop.permute.xlu1 %933 }
 0x432   : > { %v938_v53 = vmul.f32 %v934_v50, %v2926_v58  ;;  %v936_v54 = vmul.f32 %v934_v50, %v2922_v56  ;;  %v937_v55 = vmul.f32 %v934_v50, %v2924_v57  ;;  %v939_v61 = vmul.f32 %v934_v50, %v2938_v12 }
 0x433   : > { %v940_v62 = vmul.f32 %v934_v50, %v2936_v11 }
 0x434   : > { %950 = vrot.lane.b32.xlu1 %v938_v53, %s2726_s14  ;;  %946 = vrot.lane.b32.xlu2 %v936_v54, %s2726_s14  ;;  %v4434_v54 = vmov 19  }
 0x435   : > { %948 = vrot.lane.b32.xlu0 %v937_v55, %s2726_s14 }
 0x43c   : > { %969 = vperm.xlu1 %2589, %v2841_v0   ;;  %952 = vrot.lane.b32.xlu2 %v939_v61, %s2726_s14 }
 0x43d   : > { %954 = vrot.lane.b32.xlu0 %v940_v62, %s2726_s14 }
 0x444   : > { %2590 = vset.pattern.permute.xlu1 %v4436_v9 }
 0x4a6   : > { %v3120_v14 = vpop.permute.xlu1 %950 }
 0x4a7   : > { %4514 = vst [vmem:[#allocation13_spill] sm:$0xff] %v3120_v14 }
 0x4ae   : > { %v970_v36 = vpop.permute.xlu1 %969 }
 0x4af   : > { %v974_v33 = vmul.f32 %v970_v36, %v2940_v13  ;;  %v972_v37 = vmul.f32 %v970_v36, %v2948_v21  ;;  %v973_v41 = vmul.f32 %v970_v36, %v2950_v22  ;;  %v975_v50 = vmul.f32 %v970_v36, %v2962_v35 }
 0x4b0   : > { %v976_v53 = vmul.f32 %v970_v36, %v2959_v31 }
 0x4b1   : > { %986 = vrot.lane.b32.xlu1 %v974_v33, %s2726_s14  ;;  %982 = vrot.lane.b32.xlu2 %v972_v37, %s2726_s14 }
 0x4b2   : > { %984 = vrot.lane.b32.xlu0 %v973_v41, %s2726_s14 }
 0x4b9   : > { %1005 = vperm.xlu1 %2590, %v2841_v0   ;;  %988 = vrot.lane.b32.xlu2 %v975_v50, %s2726_s14  ;;  %v4435_v50 = vmov 20  }
 0x4ba   : > { %990 = vrot.lane.b32.xlu0 %v976_v53, %s2726_s14 }
 0x4c1   : > { %2591 = vset.pattern.permute.xlu1 %v4434_v54 }
 0x523   : > { %v3134_v55 = vpop.permute.xlu1 %986 }
 0x524   : > { %4515 = vst [vmem:[#allocation14_spill] sm:$0xff] %v3134_v55 }
 0x52b   : > { %v1006_v61 = vpop.permute.xlu1 %1005 }
 0x52c   : > { %v1010_v62 = vmul.f32 %v1006_v61, %v2900_v40  ;;  %v1008_v33 = vmul.f32 %v1006_v61, %v2896_v38  ;;  %v1009_v37 = vmul.f32 %v1006_v61, %v2898_v39  ;;  %v1011_v36 = vmul.f32 %v1006_v61, %v2906_v47 }
 0x52d   : > { %v1012_v41 = vmul.f32 %v1006_v61, %v2910_v48 }
 0x52e   : > { %1022 = vrot.lane.b32.xlu1 %v1010_v62, %s2730_s15  ;;  %1018 = vrot.lane.b32.xlu2 %v1008_v33, %s2730_s15 }
 0x52f   : > { %1020 = vrot.lane.b32.xlu0 %v1009_v37, %s2730_s15 }
 0x536   : > { %1042 = vperm.xlu1 %2591, %v2841_v0   ;;  %1024 = vrot.lane.b32.xlu2 %v1011_v36, %s2730_s15 }
 0x537   : > { %1026 = vrot.lane.b32.xlu0 %v1012_v41, %s2730_s15  ;;  %v4437_v41 = vmov 21  }
 0x53e   : > { %2592 = vset.pattern.permute.xlu1 %v4435_v50 }
 0x5a0   : > { %v3148_v53 = vpop.permute.xlu1 %1022 }
 0x5a1   : > { %4516 = vst [vmem:[#allocation15_spill] sm:$0xff] %v3148_v53 }
 0x5a8   : > { %v1043_v62 = vpop.permute.xlu1 %1042 }
 0x5a9   : > { %v1047_v33 = vmul.f32 %v1043_v62, %v2926_v58  ;;  %v1045_v37 = vmul.f32 %v1043_v62, %v2922_v56  ;;  %v1046_v54 = vmul.f32 %v1043_v62, %v2924_v57  ;;  %v1048_v61 = vmul.f32 %v1043_v62, %v2938_v12 }
 0x5aa   : > { %v1049_v36 = vmul.f32 %v1043_v62, %v2936_v11 }
 0x5ab   : > { %1059 = vrot.lane.b32.xlu1 %v1047_v33, %s2730_s15  ;;  %1055 = vrot.lane.b32.xlu2 %v1045_v37, %s2730_s15 }
 0x5ac   : > { %1057 = vrot.lane.b32.xlu0 %v1046_v54, %s2730_s15 }
 0x5b3   : > { %1078 = vperm.xlu1 %2592, %v2841_v0   ;;  %1061 = vrot.lane.b32.xlu2 %v1048_v61, %s2730_s15 }
 0x5b4   : > { %1063 = vrot.lane.b32.xlu0 %v1049_v36, %s2730_s15  ;;  %v4439_v36 = vmov 22  }
 0x5bb   : > { %2593 = vset.pattern.permute.xlu1 %v4437_v41 }
 0x61d   : > { %v3162_v50 = vpop.permute.xlu1 %1059 }
 0x61e   : > { %4517 = vst [vmem:[#allocation16_spill] sm:$0xff] %v3162_v50 }
 0x625   : > { %v1079_v33 = vpop.permute.xlu1 %1078 }
 0x626   : > { %v1083_v37 = vmul.f32 %v1079_v33, %v2940_v13  ;;  %v1081_v54 = vmul.f32 %v1079_v33, %v2948_v21  ;;  %v1082_v9 = vmul.f32 %v1079_v33, %v2950_v22  ;;  %v1084_v62 = vmul.f32 %v1079_v33, %v2962_v35 }
 0x627   : > { %v1085_v61 = vmul.f32 %v1079_v33, %v2959_v31 }
 0x628   : > { %1095 = vrot.lane.b32.xlu1 %v1083_v37, %s2730_s15  ;;  %1091 = vrot.lane.b32.xlu2 %v1081_v54, %s2730_s15 }
 0x629   : > { %1093 = vrot.lane.b32.xlu0 %v1082_v9, %s2730_s15 }
 0x630   : > { %1114 = vperm.xlu1 %2593, %v2841_v0   ;;  %1097 = vrot.lane.b32.xlu2 %v1084_v62, %s2730_s15 }
 0x631   : > { %1099 = vrot.lane.b32.xlu0 %v1085_v61, %s2730_s15  ;;  %v4441_v61 = vmov 23  }
 0x638   : > { %2594 = vset.pattern.permute.xlu1 %v4439_v36 }
 0x69a   : > { %v3176_v41 = vpop.permute.xlu1 %1095 }
 0x69b   : > { %4518 = vst [vmem:[#allocation17_spill] sm:$0xff] %v3176_v41 }
 0x6a2   : > { %v1115_v37 = vpop.permute.xlu1 %1114 }
 0x6a3   : > { %v1119_v54 = vmul.f32 %v1115_v37, %v2900_v40  ;;  %v1117_v9 = vmul.f32 %v1115_v37, %v2896_v38  ;;  %v1118_v42 = vmul.f32 %v1115_v37, %v2898_v39  ;;  %v1120_v33 = vmul.f32 %v1115_v37, %v2906_v47 }
 0x6a4   : > { %v1121_v62 = vmul.f32 %v1115_v37, %v2910_v48 }
 0x6a5   : > { %1131 = vrot.lane.b32.xlu1 %v1119_v54, %s2734_s16  ;;  %1127 = vrot.lane.b32.xlu2 %v1117_v9, %s2734_s16 }
 0x6a6   : > { %1129 = vrot.lane.b32.xlu0 %v1118_v42, %s2734_s16 }
 0x6ad   : > { %1151 = vperm.xlu1 %2594, %v2841_v0   ;;  %1133 = vrot.lane.b32.xlu2 %v1120_v33, %s2734_s16 }
 0x6ae   : > { %1135 = vrot.lane.b32.xlu0 %v1121_v62, %s2734_s16  ;;  %v4443_v62 = vmov 24  }
 0x6b5   : > { %2595 = vset.pattern.permute.xlu1 %v4441_v61 }
 0x717   : > { %v3190_v36 = vpop.permute.xlu1 %1131 }
 0x718   : > { %4519 = vst [vmem:[#allocation18_spill] sm:$0xff] %v3190_v36 }
 0x71f   : > { %v1152_v54 = vpop.permute.xlu1 %1151 }
 0x720   : > { %v1156_v9 = vmul.f32 %v1152_v54, %v2926_v58  ;;  %v1154_v42 = vmul.f32 %v1152_v54, %v2922_v56  ;;  %v1155_v63 = vmul.f32 %v1152_v54, %v2924_v57  ;;  %v1157_v37 = vmul.f32 %v1152_v54, %v2938_v12 }
 0x721   : > { %v1158_v33 = vmul.f32 %v1152_v54, %v2936_v11 }
 0x722   : > { %1168 = vrot.lane.b32.xlu1 %v1156_v9, %s2734_s16  ;;  %1164 = vrot.lane.b32.xlu2 %v1154_v42, %s2734_s16 }
 0x723   : > { %1166 = vrot.lane.b32.xlu0 %v1155_v63, %s2734_s16 }
 0x72a   : > { %1187 = vperm.xlu1 %2595, %v2841_v0   ;;  %1170 = vrot.lane.b32.xlu2 %v1157_v37, %s2734_s16 }
 0x72b   : > { %1172 = vrot.lane.b32.xlu0 %v1158_v33, %s2734_s16  ;;  %v3217_v33 = vpop.xlane.xlu0 %316 }
 0x72c   : > { %4521 = vst [vmem:[#allocation20_spill] sm:$0xff] %v3217_v33 }
 0x732   : > { %2596 = vset.pattern.permute.xlu1 %v4443_v62  ;;  %v3219_v62 = vpop.permute.xlu2 %471 }
 0x733   : > { %v3221_v15 = vpop.xlane.xlu0 %336 }
 0x734   : > { %4522 = vst [vmem:[#allocation21_spill] sm:$0xff] %v3221_v15 }
 0x794   : > { %v3204_v61 = vpop.permute.xlu1 %1168 }
 0x795   : > { %4520 = vst [vmem:[#allocation19_spill] sm:$0xff] %v3204_v61 }
 0x79c   : > { %v1188_v9 = vpop.permute.xlu1 %1187 }
 0x79d   : > { %v1192_v42 = vmul.f32 %v1188_v9, %v2940_v13  ;;  %v1190_v63 = vmul.f32 %v1188_v9, %v2948_v21  ;;  %v1191_v46 = vmul.f32 %v1188_v9, %v2950_v22  ;;  %v1193_v54 = vmul.f32 %v1188_v9, %v2962_v35 }
 0x79e   : > { %v1194_v37 = vmul.f32 %v1188_v9, %v2959_v31 }
 0x79f   : > { %1204 = vrot.lane.b32.xlu1 %v1192_v42, %s2734_s16  ;;  %1200 = vrot.lane.b32.xlu2 %v1190_v63, %s2734_s16  ;;  %v3223_v42 = vpop.permute.xlu2 %475  ;;  %v3225_v63 = vpop.permute.xlu0 %467 }
 0x7a0   : > { %1202 = vrot.lane.b32.xlu0 %v1191_v46, %s2734_s16 }
 0x7a7   : > { %1223 = vperm.xlu1 %2596, %v2841_v0   ;;  %1206 = vrot.lane.b32.xlu2 %v1193_v54, %s2734_s16  ;;  %v3227_v46 = vpop.permute.xlu2 %507  ;;  %v3229_v59 = vpop.permute.xlu0 %509  ;;  %v4456_v54 = vmov 25  }
 0x7a8   : > { %1208 = vrot.lane.b32.xlu0 %v1194_v37, %s2734_s16 }
 0x7af   : > { %v3231_v9 = vpop.permute.xlu2 %513  ;;  %v3233_v44 = vpop.permute.xlu0 %515  ;;  %2597 = vset.pattern.permute.xlu1 %v4456_v54 }
 0x7b7   : > { %v3236_v37 = vpop.permute.xlu2 %546  ;;  %v3238_v26 = vpop.permute.xlu0 %548 }
 0x7bf   : > { %v3240_v34 = vpop.permute.xlu2 %552  ;;  %v3242_v30 = vpop.permute.xlu0 %554 }
 0x7c7   : > { %v3246_v20 = vpop.permute.xlu2 %582  ;;  %v3251_v54 = vpop.permute.xlu0 %584 }
 0x7cf   : > { %v3256_v1 = vpop.permute.xlu2 %588  ;;  %v3262_v7 = vpop.permute.xlu0 %590 }
 0x7d7   : > { %v3265_v15 = vpop.permute.xlu2 %619 }
 0x811   : > { %v3244_v29 = vpop.permute.xlu1 %1204 }
 0x812   : > { %4523 = vst [vmem:[#allocation22_spill] sm:$0xff] %v3244_v29 }
 0x819   : > { %v1224_v10 = vpop.permute.xlu1 %1223 }
 0x81a   : > { %v1228_v6 = vmul.f32 %v1224_v10, %v2900_v40  ;;  %v1226_v5 = vmul.f32 %v1224_v10, %v2896_v38  ;;  %v1227_v4 = vmul.f32 %v1224_v10, %v2898_v39  ;;  %v1229_v2 = vmul.f32 %v1224_v10, %v2906_v47 }
 0x81b   : > { %v1230_v8 = vmul.f32 %v1224_v10, %v2910_v48 }
 0x81c   : > { %1240 = vrot.lane.b32.xlu1 %v1228_v6, %s2738_s17  ;;  %1236 = vrot.lane.b32.xlu2 %v1226_v5, %s2738_s17  ;;  %v3267_v6 = vpop.permute.xlu0 %621  ;;  %v3269_v5 = vpop.permute.xlu2 %625 }
 0x81d   : > { %1238 = vrot.lane.b32.xlu0 %v1227_v4, %s2738_s17 }
 0x824   : > { %1260 = vperm.xlu1 %2597, %v2841_v0   ;;  %1242 = vrot.lane.b32.xlu2 %v1229_v2, %s2738_s17  ;;  %v3271_v4 = vpop.permute.xlu0 %627  ;;  %v3273_v33 = vpop.permute.xlu2 %655 }
 0x825   : > { %1244 = vrot.lane.b32.xlu0 %v1230_v8, %s2738_s17 }
 0x82c   : > { %v3275_v29 = vpop.permute.xlu0 %657  ;;  %v3277_v10 = vpop.permute.xlu2 %661  ;;  %2598 = vset.pattern.permute.xlu1 %v4479_v3 }
 0x834   : > { %v3279_v48 = vpop.permute.xlu0 %663  ;;  %v3281_v2 = vpop.permute.xlu2 %691 }
 0x83c   : > { %v3283_v61 = vpop.permute.xlu0 %693  ;;  %v3285_v8 = vpop.permute.xlu2 %697 }
 0x844   : > { %v3287_v36 = vpop.permute.xlu0 %699  ;;  %v3289_v41 = vpop.permute.xlu2 %728 }
 0x845   : > { %4524 = vst [vmem:[#allocation23_spill] sm:$0xff] %v3289_v41 }
 0x84c   : > { %v3291_v50 = vpop.permute.xlu0 %730  ;;  %v3293_v53 = vpop.permute.xlu2 %734 }
 0x84d   : > { %4525 = vst [vmem:[#allocation24_spill] sm:$0xff] %v3291_v50 }
 0x84e   : > { %4526 = vst [vmem:[#allocation25_spill] sm:$0xff] %v3293_v53 }
 0x854   : > { %v3295_v55 = vpop.permute.xlu0 %736  ;;  %v3297_v14 = vpop.permute.xlu2 %764 }
 0x855   : > { %4527 = vst [vmem:[#allocation26_spill] sm:$0xff] %v3295_v55 }
 0x856   : > { %4528 = vst [vmem:[#allocation27_spill] sm:$0xff] %v3297_v14 }
 0x85c   : > { %v3299_v43 = vpop.permute.xlu0 %766  ;;  %v3302_v49 = vpop.permute.xlu2 %770 }
 0x85d   : > { %4529 = vst [vmem:[#allocation28_spill] sm:$0xff] %v3299_v43 }
 0x85e   : > { %4530 = vst [vmem:[#allocation29_spill] sm:$0xff] %v3302_v49 }
 0x864   : > { %v3304_v16 = vpop.permute.xlu0 %772  ;;  %v3306_v60 = vpop.permute.xlu2 %800 }
 0x865   : > { %4531 = vst [vmem:[#allocation30_spill] sm:$0xff] %v3304_v16 }
 0x866   : > { %4532 = vst [vmem:[#allocation31_spill] sm:$0xff] %v3306_v60 }
 0x86c   : > { %v3308_v41 = vpop.permute.xlu0 %802  ;;  %v3312_v45 = vpop.permute.xlu2 %806 }
 0x86d   : > { %4533 = vst [vmem:[#allocation32_spill] sm:$0xff] %v3308_v41 }
 0x874   : > { %v3314_v53 = vpop.permute.xlu0 %808  ;;  %v3319_v49 = vpop.permute.xlu2 %837 }
 0x875   : > { %4535 = vst [vmem:[#allocation34_spill] sm:$0xff] %v3314_v53 }
 0x876   : > { %4536 = vst [vmem:[#allocation35_spill] sm:$0xff] %v3319_v49 }
 0x87c   : > { %v3330_v41 = vpop.permute.xlu2 %843 }
 0x88e   : > { %v3310_v50 = vpop.permute.xlu1 %1240 }
 0x88f   : > { %4534 = vst [vmem:[#allocation33_spill] sm:$0xff] %v3310_v50  ;;  %v3324_v50 = vpop.permute.xlu0 %839 }
 0x890   : > { %4537 = vst [vmem:[#allocation36_spill] sm:$0xff] %v3324_v50 }
 0x896   : > { %v1261_v55 = vpop.permute.xlu1 %1260 }
 0x897   : > { %v1265_v14 = vmul.f32 %v1261_v55, %v2926_v58  ;;  %v1263_v43 = vmul.f32 %v1261_v55, %v2922_v56  ;;  %v1264_v3 = vmul.f32 %v1261_v55, %v2924_v57  ;;  %v1266_v60 = vmul.f32 %v1261_v55, %v2938_v12  ;;  %v3333_v49 = vpop.permute.xlu0 %845 }
 0x898   : > { %v1267_v53 = vmul.f32 %v1261_v55, %v2936_v11  ;;  %4538 = vst [vmem:[#allocation37_spill] sm:$0xff] %v3333_v49 }
 0x899   : > { %1277 = vrot.lane.b32.xlu1 %v1265_v14, %s2738_s17  ;;  %1273 = vrot.lane.b32.xlu2 %v1263_v43, %s2738_s17  ;;  %v4539_v14 = vmov 0   ;;  %v3336_v43 = vpop.permute.xlu2 %873 }
 0x89a   : > { %1275 = vrot.lane.b32.xlu0 %v1264_v3, %s2738_s17  ;;  %4540 = vst [vmem:[#allocation38_spill] sm:$0xff] %v3336_v43 }
 0x89f   : > { %v3338_v3 = vpop.permute.xlu0 %875 }
 0x8a0   : > { %4541 = vst [vmem:[#allocation39_spill] sm:$0xff] %v3338_v3 }
 0x8a1   : > { %1296 = vperm.xlu1 %2598, %v2841_v0   ;;  %1279 = vrot.lane.b32.xlu2 %v1266_v60, %s2738_s17  ;;  %v3340_v50 = vpop.permute.xlu2 %879 }
 0x8a2   : > { %1281 = vrot.lane.b32.xlu0 %v1267_v53, %s2738_s17  ;;  %4542 = vst [vmem:[#allocation40_spill] sm:$0xff] %v3340_v50 }
 0x8a7   : > { %v3342_v16 = vpop.permute.xlu0 %881 }
 0x8a8   : > { %4543 = vst [vmem:[#allocation41_spill] sm:$0xff] %v3342_v16 }
 0x8a9   : > { %2599 = vset.pattern.permute.xlu1 %v4539_v14  ;;  %v3344_v11 = vpop.permute.xlu2 %909 }
 0x8aa   : > { %4544 = vst [vmem:[#allocation42_spill] sm:$0xff] %v3344_v11 }
 0x8af   : > { %v3346_v0 = vpop.permute.xlu0 %911 }
 0x8b0   : > { %4545 = vst [vmem:[#allocation43_spill] sm:$0xff] %v3346_v0 }
 0x8b1   : > { %v3348_v60 = vpop.permute.xlu2 %915 }
 0x8b2   : > { %4546 = vst [vmem:[#allocation44_spill] sm:$0xff] %v3348_v60 }
 0x8b7   : > { %v3350_v55 = vpop.permute.xlu0 %917 }
 0x8b8   : > { %4547 = vst [vmem:[#allocation45_spill] sm:$0xff] %v3350_v55 }
 0x8b9   : > { %v3352_v53 = vpop.permute.xlu2 %946 }
 0x8ba   : > { %4548 = vst [vmem:[#allocation46_spill] sm:$0xff] %v3352_v53 }
 0x8bf   : > { %v3354_v49 = vpop.permute.xlu0 %948 }
 0x8c0   : > { %4549 = vst [vmem:[#allocation47_spill] sm:$0xff] %v3354_v49 }
 0x8c1   : > { %v3356_v14 = vpop.permute.xlu2 %952 }
 0x8c2   : > { %4550 = vst [vmem:[#allocation48_spill] sm:$0xff] %v3356_v14 }
 0x8c7   : > { %v3358_v43 = vpop.permute.xlu0 %954 }
 0x8c8   : > { %4551 = vst [vmem:[#allocation49_spill] sm:$0xff] %v3358_v43 }
 0x8c9   : > { %v3360_v3 = vpop.permute.xlu2 %982 }
 0x8ca   : > { %4552 = vst [vmem:[#allocation50_spill] sm:$0xff] %v3360_v3 }
 0x8cf   : > { %v3362_v50 = vpop.permute.xlu0 %984 }
 0x8d0   : > { %4553 = vst [vmem:[#allocation51_spill] sm:$0xff] %v3362_v50 }
 0x8d1   : > { %v3364_v16 = vpop.permute.xlu2 %988 }
 0x8d2   : > { %4554 = vst [vmem:[#allocation52_spill] sm:$0xff] %v3364_v16 }
 0x8d7   : > { %v3366_v11 = vpop.permute.xlu0 %990 }
 0x8d8   : > { %4555 = vst [vmem:[#allocation53_spill] sm:$0xff] %v3366_v11 }
 0x8d9   : > { %v3368_v0 = vpop.permute.xlu2 %1018 }
 0x8da   : > { %4556 = vst [vmem:[#allocation54_spill] sm:$0xff] %v3368_v0 }
 0x8df   : > { %v3370_v60 = vpop.permute.xlu0 %1020 }
 0x8e0   : > { %4557 = vst [vmem:[#allocation55_spill] sm:$0xff] %v3370_v60 }
 0x8e1   : > { %v3372_v55 = vpop.permute.xlu2 %1024 }
 0x8e2   : > { %4558 = vst [vmem:[#allocation56_spill] sm:$0xff] %v3372_v55 }
 0x8e7   : > { %v3374_v53 = vpop.permute.xlu0 %1026 }
 0x8e8   : > { %4559 = vst [vmem:[#allocation57_spill] sm:$0xff] %v3374_v53 }
 0x8e9   : > { %v3376_v49 = vpop.permute.xlu2 %1055 }
 0x8ea   : > { %4560 = vst [vmem:[#allocation58_spill] sm:$0xff] %v3376_v49 }
 0x8ef   : > { %v3378_v14 = vpop.permute.xlu0 %1057 }
 0x8f0   : > { %4561 = vst [vmem:[#allocation59_spill] sm:$0xff] %v3378_v14 }
 0x8f1   : > { %v3382_v3 = vpop.permute.xlu2 %1061 }
 0x8f7   : > { %v3387_v60 = vpop.permute.xlu0 %1063 }
 0x8f8   : > { %4563 = vst [vmem:[#allocation61_spill] sm:$0xff] %v3387_v60 }
 0x8f9   : > { %v3389_v55 = vpop.permute.xlu2 %1091 }
 0x8fa   : > { %4564 = vst [vmem:[#allocation62_spill] sm:$0xff] %v3389_v55 }
 0x8ff   : > { %v3398_v49 = vpop.permute.xlu0 %1093 }
 0x900   : > { %4565 = vst [vmem:[#allocation63_spill] sm:$0xff] %v3398_v49 }
 0x907   : > { %v3412_v60 = vpop.permute.xlu0 %1099 }
 0x908   : > { %4568 = vst [vmem:[#allocation65_spill] sm:$0xff] %v3412_v60 }
 0x90b   : > { %v3380_v43 = vpop.permute.xlu1 %1277 }
 0x90c   : > { %4562 = vst [vmem:[#allocation60_spill] sm:$0xff] %v3380_v43  ;;  %v373_v43 = vld [vmem:[%s4430_s4] sm:$0xf] }
 0x913   : > { %v1297_v50 = vpop.permute.xlu1 %1296 }
 0x914   : > { %v1301_v16 = vmul.f32 %v1297_v50, %v2940_v13  ;;  %v1299_v11 = vmul.f32 %v1297_v50, %v2948_v21  ;;  %v1300_v0 = vmul.f32 %v1297_v50, %v2950_v22  ;;  %v1302_v53 = vmul.f32 %v1297_v50, %v2962_v35 }
 0x915   : > { %v1303_v14 = vmul.f32 %v1297_v50, %v2959_v31  ;;  %v4570_v50 = vmov 3  }
 0x916   : > { %1313 = vrot.lane.b32.xlu1 %v1301_v16, %s2738_s17  ;;  %1309 = vrot.lane.b32.xlu2 %v1299_v11, %s2738_s17  ;;  %v3403_v16 = vpop.permute.xlu2 %1097  ;;  %v3408_v11 = vld [vmem:[%s4431_s5] sm:$0xff] }
 0x917   : > { %1311 = vrot.lane.b32.xlu0 %v1300_v0, %s2738_s17  ;;  %4566 = vst [vmem:[#allocation64_spill] sm:$0xff] %v3408_v11  ;;  %v4567_v0 = vmov 2  }
 0x91e   : > { %1333 = vperm.xlu1 %2599, %v373_v43   ;;  %1315 = vrot.lane.b32.xlu2 %v1302_v53, %s2738_s17  ;;  %v3416_v31 = vpop.permute.xlu2 %1127  ;;  %v4572_v43 = vmov 4   ;;  %v4573_v53 = vmov 5  }
 0x91f   : > { %1317 = vrot.lane.b32.xlu0 %v1303_v14, %s2738_s17  ;;  %4569 = vst [vmem:[#allocation66_spill] sm:$0xff] %v3416_v31  ;;  %v3419_v14 = vpop.permute.xlu0 %1129 }
 0x920   : > { %4571 = vst [vmem:[#allocation67_spill] sm:$0xff] %v3419_v14 }
 0x926   : > { %2602 = vset.pattern.permute.xlu1 %v4567_v0  ;;  %1370 = vperm.xlu2 %2600, %v3408_v11   ;;  %v3425_v0 = vpop.permute.xlu2 %1133 }
 0x927   : > { %1396 = vperm.xlu1 %2602, %v3408_v11   ;;  %1383 = vperm.xlu0 %2601, %v3408_v11   ;;  %4574 = vst [vmem:[#allocation68_spill] sm:$0xff] %v3425_v0  ;;  %v3427_v60 = vpop.permute.xlu0 %1135 }
 0x928   : > { %4575 = vst [vmem:[#allocation69_spill] sm:$0xff] %v3427_v60  ;;  %v395_v60 = vmul.f32 %v2900_v40, %v2917_v51  ;;  %v443_v40 = vmul.f32 %v2940_v13, %v2891_v32  ;;  %v444_v13 = vmul.f32 %v2962_v35, %v2891_v32  ;;  %v558_v35 = vsel %vm477_vm1, %v3013_v23, %v3240_v34 }
 0x92e   : > { %2603 = vset.pattern.permute.xlu2 %v4570_v50  ;;  %v3429_v55 = vpop.permute.xlu2 %1164 }
 0x92f   : > { %2604 = vset.pattern.permute.xlu1 %v4572_v43  ;;  %1409 = vperm.xlu2 %2603, %v3408_v11   ;;  %4576 = vst [vmem:[#allocation70_spill] sm:$0xff] %v3429_v55  ;;  %v3431_v49 = vpop.permute.xlu0 %1166  ;;  %v393_v55 = vmul.f32 %v2896_v38, %v2917_v51  ;;  %v441_v38 = vmul.f32 %v2948_v21, %v2891_v32 }
 0x930   : > { %1422 = vperm.xlu1 %2604, %v3408_v11   ;;  %2605 = vset.pattern.permute.xlu0 %v4573_v53  ;;  %4577 = vst [vmem:[#allocation71_spill] sm:$0xff] %v3431_v49  ;;  %v419_v11 = vmul.f32 %v2926_v58, %v2919_v52  ;;  %v417_v53 = vmul.f32 %v2922_v56, %v2919_v52 }
 0x931   : > { %v394_v58 = vmul.f32 %v2898_v39, %v2917_v51  ;;  %v396_v56 = vmul.f32 %v2906_v47, %v2917_v51  ;;  %v442_v39 = vmul.f32 %v2950_v22, %v2891_v32  ;;  %v478_v51 = vsel %vm477_vm1, %v3225_v63, %v3007_v17 }
 0x932   : > { %v519_v21 = vsel %vm477_vm1, %v3011_v19, %v3231_v9  ;;  %v479_v22 = vsel %vm477_vm1, %v3007_v17, %v3219_v62  ;;  %v517_v32 = vsel %vm477_vm1, %v3227_v46, %v3229_v59  ;;  %v518_v17 = vsel %vm477_vm1, %v3229_v59, %v3011_v19 }
 0x933   : > { %v557_v19 = vsel %vm477_vm1, %v3238_v26, %v3013_v23 }
 0x936   : > { %v3433_v31 = vpop.permute.xlu2 %1170 }
 0x937   : > { %v3435_v50 = vpop.permute.xlu0 %1172 }
 0x938   : > { %4578 = vst [vmem:[#allocation72_spill] sm:$0xff] %v3435_v50  ;;  %v418_v50 = vmul.f32 %v2924_v57, %v2919_v52 }
 0x93a   : > { %v422_v49 = vadd.f32 %v418_v50, %v394_v58  ;;  %v556_v58 = vsel %vm477_vm1, %v3236_v37, %v3238_v26  ;;  %v594_v37 = vsel %vm592_vm2, %v3251_v54, %v3015_v24 }
 0x93c   : > { %v446_v63 = vadd.f32 %v442_v39, %v422_v49 }
 0x93e   : > { %v3437_v14 = vpop.permute.xlu2 %1200  ;;  %v487_v49 = vadd.f32 %v479_v22, %v446_v63 }
 0x93f   : > { %4579 = vst [vmem:[#allocation73_spill] sm:$0xff] %v3437_v14  ;;  %v3439_v43 = vpop.permute.xlu0 %1202  ;;  %v420_v14 = vmul.f32 %v2938_v12, %v2919_v52  ;;  %v480_v52 = vsel %vm477_vm1, %v3219_v62, %v3009_v18 }
 0x940   : > { %4580 = vst [vmem:[#allocation74_spill] sm:$0xff] %v3439_v43  ;;  %v423_v43 = vadd.f32 %v419_v11, %v395_v60  ;;  %v481_v11 = vsel %vm477_vm1, %v3009_v18, %v3223_v42  ;;  %v520_v18 = vsel %vm477_vm1, %v3231_v9, %v3233_v44  ;;  %v595_v42 = vsel %vm592_vm2, %v3015_v24, %v3256_v1 }
 0x941   : > { %v424_v57 = vadd.f32 %v420_v14, %v396_v56  ;;  %v526_v59 = vadd.f32 %v518_v17, %v487_v49  ;;  %v559_v44 = vsel %vm477_vm1, %v3240_v34, %v3242_v30  ;;  %v631_v9 = vsel %vm592_vm2, %v3017_v25, %v3269_v5  ;;  %v4588_v17 = vld [vmem:[#allocation8_spill] sm:$0xff] }
 0x942   : > { %v447_v12 = vadd.f32 %v443_v40, %v423_v43  ;;  %v596_v30 = vsel %vm592_vm2, %v3256_v1, %v3262_v7  ;;  %v667_v34 = vsel %vm592_vm2, %v3020_v27, %v3277_v10  ;;  %v630_v24 = vsel %vm592_vm2, %v3267_v6, %v3017_v25 }
 0x943   : > { %v632_v1 = vsel %vm592_vm2, %v3269_v5, %v3271_v4  ;;  %v704_v7 = vsel %vm701_vm3, %v3022_v28, %v3285_v8  ;;  %v666_v25 = vsel %vm592_vm2, %v3275_v29, %v3020_v27  ;;  %v668_v5 = vsel %vm592_vm2, %v3277_v10, %v3279_v48  ;;  %v4582_v27 = vld [vmem:[#allocation25_spill] sm:$0xff] }
 0x944   : > { %v488_v14 = vadd.f32 %v480_v52, %v447_v12 }
 0x946   : > { %v3445_v0 = vpop.permute.xlu2 %1206  ;;  %v527_v43 = vadd.f32 %v519_v21, %v488_v14 }
 0x947   : > { %4581 = vst [vmem:[#allocation75_spill] sm:$0xff] %v3445_v0  ;;  %v421_v0 = vadd.f32 %v417_v53, %v393_v55  ;;  %v3468_v60 = vpop.permute.xlu0 %1208 }
 0x948   : > { %v566_v53 = vadd.f32 %v558_v35, %v527_v43  ;;  %v4585_v35 = vld [vmem:[#allocation23_spill] sm:$0xff]  ;;  %v4586_v43 = vld [vmem:[#allocation26_spill] sm:$0xff] }
 0x949   : > { %v445_v47 = vadd.f32 %v441_v38, %v421_v0  ;;  %v448_v0 = vadd.f32 %v444_v13, %v424_v57  ;;  %v593_v38 = vsel %vm592_vm2, %v3246_v20, %v3251_v54  ;;  %v565_v57 = vadd.f32 %v557_v19, %v526_v59 }
 0x94a   : > { %v603_v40 = vadd.f32 %v595_v42, %v566_v53  ;;  %v629_v20 = vsel %vm592_vm2, %v3265_v15, %v3267_v6  ;;  %v665_v15 = vsel %vm592_vm2, %v3273_v33, %v3275_v29  ;;  %v703_v33 = vsel %vm701_vm3, %v3283_v61, %v3022_v28  ;;  %v4589_v42 = vld [vmem:[#allocation28_spill] sm:$0xff] }
 0x94b   : > { %v486_v50 = vadd.f32 %v478_v51, %v445_v47  ;;  %v489_v62 = vadd.f32 %v481_v11, %v448_v0  ;;  %v602_v12 = vadd.f32 %v594_v37, %v565_v57  ;;  %v702_v11 = vsel %vm701_vm3, %v3281_v2, %v3283_v61  ;;  %v4583_v0 = vld [vmem:[#allocation7_spill] sm:$0xff] }
 0x94c   : > { %v639_v39 = vadd.f32 %v631_v9, %v603_v40  ;;  %v705_v29 = vsel %vm701_vm3, %v3285_v8, %v3287_v36  ;;  %v740_v10 = vsel %vm701_vm3, %v4583_v0, %v4582_v27  ;;  %v741_v36 = vsel %vm701_vm3, %v4582_v27, %v4586_v43  ;;  %v4587_v8 = vld [vmem:[#allocation29_spill] sm:$0xff]  ;;  %v4606_v43 = vld [vmem:[#allocation43_spill] sm:$0xff] }
 0x94d   : > { %v525_v46 = vadd.f32 %v517_v32, %v486_v50  ;;  %v528_v56 = vadd.f32 %v520_v18, %v489_v62  ;;  %v638_v21 = vadd.f32 %v630_v24, %v602_v12  ;;  %v4584_v32 = vld [vmem:[#allocation24_spill] sm:$0xff]  ;;  %v776_v18 = vsel %vm701_vm3, %v4588_v17, %v4587_v8 }
 0x94e   : > { %v3478_v55 = vpop.permute.xlu2 %1236  ;;  %v675_v13 = vadd.f32 %v667_v34, %v639_v39  ;;  %v738_v50 = vsel %vm701_vm3, %v4585_v35, %v4584_v32  ;;  %v739_v2 = vsel %vm701_vm3, %v4584_v32, %v4583_v0  ;;  %v4604_v35 = vld [vmem:[#allocation44_spill] sm:$0xff] }
 0x94f   : > { %v3519_v23 = vpop.permute.xlu0 %1238  ;;  %v564_v26 = vadd.f32 %v556_v58, %v525_v46  ;;  %v567_v52 = vadd.f32 %v559_v44, %v528_v56  ;;  %v674_v63 = vadd.f32 %v666_v25, %v638_v21  ;;  %v4590_v46 = vld [vmem:[#allocation27_spill] sm:$0xff]  ;;  %v775_v58 = vsel %vm701_vm3, %v4589_v42, %v4588_v17  ;;  %v4591_v44 = vld [vmem:[#allocation9_spill] sm:$0xff] }
 0x950   : > { %v712_v22 = vadd.f32 %v704_v7, %v675_v13  ;;  %v774_v53 = vsel %vm701_vm3, %v4590_v46, %v4589_v42  ;;  %v813_v9 = vsel %vm810_vm4, %v4591_v44, %v3312_v45  ;;  %v4596_v7 = vld [vmem:[#allocation34_spill] sm:$0xff]  ;;  %v4597_v13 = vld [vmem:[#allocation36_spill] sm:$0xff]  ;;  %v4598_v21 = vld [vmem:[#allocation35_spill] sm:$0xff] }
 0x951   : > { %v601_v54 = vadd.f32 %v593_v38, %v564_v26  ;;  %v604_v51 = vadd.f32 %v596_v30, %v567_v52  ;;  %v711_v61 = vadd.f32 %v703_v33, %v674_v63  ;;  %v4592_v26 = vld [vmem:[#allocation30_spill] sm:$0xff]  ;;  %v4593_v30 = vld [vmem:[#allocation32_spill] sm:$0xff]  ;;  %v4601_v63 = vld [vmem:[#allocation37_spill] sm:$0xff] }
 0x952   : > { %v748_v62 = vadd.f32 %v740_v10, %v712_v22  ;;  %v777_v57 = vsel %vm701_vm3, %v4587_v8, %v4592_v26  ;;  %v812_v34 = vsel %vm810_vm4, %v4593_v30, %v4591_v44  ;;  %v4600_v22 = vld [vmem:[#allocation11_spill] sm:$0xff] }
 0x953   : > { %v637_v6 = vadd.f32 %v629_v20, %v601_v54  ;;  %v640_v4 = vadd.f32 %v632_v1, %v604_v51  ;;  %v747_v56 = vadd.f32 %v739_v2, %v711_v61  ;;  %v4594_v20 = vld [vmem:[#allocation31_spill] sm:$0xff]  ;;  %v4595_v54 = vld [vmem:[#allocation10_spill] sm:$0xff]  ;;  %v814_v51 = vsel %vm810_vm4, %v3312_v45, %v4596_v7 }
 0x954   : > { %v784_v37 = vadd.f32 %v776_v18, %v748_v62  ;;  %v811_v24 = vsel %vm810_vm4, %v4594_v20, %v4593_v30  ;;  %v849_v12 = vsel %vm810_vm4, %v4595_v54, %v3330_v41  ;;  %v850_v45 = vsel %vm810_vm4, %v3330_v41, %v4601_v63  ;;  %v4607_v18 = vld [vmem:[#allocation41_spill] sm:$0xff]  ;;  %v4608_v62 = vld [vmem:[#allocation42_spill] sm:$0xff]  ;;  %v4611_v44 = vld [vmem:[#allocation47_spill] sm:$0xff] }
 0x955   : > { %v673_v14 = vadd.f32 %v665_v15, %v637_v6  ;;  %v676_v48 = vadd.f32 %v668_v5, %v640_v4  ;;  %v783_v39 = vadd.f32 %v775_v58, %v747_v56  ;;  %v848_v15 = vsel %vm810_vm4, %v4597_v13, %v4595_v54  ;;  %v4599_v4 = vld [vmem:[#allocation40_spill] sm:$0xff] }
 0x956   : > { %v3539_v47 = vpop.permute.xlu2 %1242  ;;  %v821_v1 = vadd.f32 %v813_v9, %v784_v37  ;;  %v847_v5 = vsel %vm810_vm4, %v4598_v21, %v4597_v13  ;;  %v920_v42 = vsel %vm919_vm5, %v4608_v62, %v4606_v43  ;;  %v4609_v58 = vld [vmem:[#allocation48_spill] sm:$0xff]  ;;  %v4612_v37 = vld [vmem:[#allocation45_spill] sm:$0xff]  ;;  %v4617_v13 = vld [vmem:[#allocation50_spill] sm:$0xff] }
 0x957   : > { %v710_v28 = vadd.f32 %v702_v11, %v673_v14  ;;  %v713_v49 = vadd.f32 %v705_v29, %v676_v48  ;;  %v3580_v19 = vpop.permute.xlu0 %1244  ;;  %v820_v6 = vadd.f32 %v812_v34, %v783_v39  ;;  %v885_v11 = vsel %vm810_vm4, %v4600_v22, %v4599_v4  ;;  %v4602_v29 = vld [vmem:[#allocation39_spill] sm:$0xff]  ;;  %v4603_v48 = vld [vmem:[#allocation38_spill] sm:$0xff]  ;;  %v4614_v20 = vld [vmem:[#allocation52_spill] sm:$0xff] }
 0x958   : > { %v857_v14 = vadd.f32 %v849_v12, %v821_v1  ;;  %v884_v27 = vsel %vm810_vm4, %v4602_v29, %v4600_v22  ;;  %v883_v32 = vsel %vm810_vm4, %v4603_v48, %v4602_v29  ;;  %v923_v26 = vsel %vm919_vm5, %v4604_v35, %v4612_v37  ;;  %v4616_v12 = vld [vmem:[#allocation51_spill] sm:$0xff]  ;;  %v4618_v21 = vld [vmem:[#allocation56_spill] sm:$0xff]  ;;  %v4622_v29 = vld [vmem:[#allocation54_spill] sm:$0xff] }
 0x959   : > { %v746_v59 = vadd.f32 %v738_v50, %v710_v28  ;;  %v749_v38 = vadd.f32 %v741_v36, %v713_v49  ;;  %v856_v10 = vadd.f32 %v848_v15, %v820_v6  ;;  %v4605_v50 = vld [vmem:[#allocation12_spill] sm:$0xff]  ;;  %v886_v49 = vsel %vm810_vm4, %v4599_v4, %v4607_v18  ;;  %v4620_v22 = vld [vmem:[#allocation55_spill] sm:$0xff]  ;;  %v4627_v18 = vld [vmem:[#allocation17_spill] sm:$0xff] }
 0x95a   : > { %v922_v2 = vsel %vm919_vm5, %v4605_v50, %v4604_v35  ;;  %v893_v61 = vadd.f32 %v885_v11, %v857_v14  ;;  %v921_v41 = vsel %vm919_vm5, %v4606_v43, %v4605_v50  ;;  %v992_v15 = vsel %vm919_vm5, %v4617_v13, %v4616_v12  ;;  %v4625_v50 = vld [vmem:[#allocation59_spill] sm:$0xff]  ;;  %v4626_v43 = vld [vmem:[#allocation58_spill] sm:$0xff]  ;;  %v4630_v37 = vld [vmem:[#allocation68_spill] sm:$0xff] }
 0x95b   : > { %v782_v52 = vadd.f32 %v774_v53, %v746_v59  ;;  %v785_v25 = vadd.f32 %v777_v57, %v749_v38  ;;  %v892_v17 = vadd.f32 %v884_v27, %v856_v10  ;;  %v4610_v59 = vld [vmem:[#allocation13_spill] sm:$0xff]  ;;  %v4613_v57 = vld [vmem:[#allocation46_spill] sm:$0xff]  ;;  %v1029_v27 = vsel %vm1028_vm6, %v4622_v29, %v4620_v22  ;;  %v4628_v62 = vld [vmem:[#allocation63_spill] sm:$0xff] }
 0x95c   : > { %v930_v53 = vadd.f32 %v922_v2, %v893_v61  ;;  %v958_v56 = vsel %vm919_vm5, %v4610_v59, %v4609_v58  ;;  %v957_v9 = vsel %vm919_vm5, %v4611_v44, %v4610_v59  ;;  %v956_v30 = vsel %vm919_vm5, %v4613_v57, %v4611_v44  ;;  %v4623_v10 = vld [vmem:[#allocation53_spill] sm:$0xff]  ;;  %v4629_v59 = vld [vmem:[#allocation62_spill] sm:$0xff] }
 0x95d   : > { %v819_v33 = vadd.f32 %v811_v24, %v782_v52  ;;  %v822_v0 = vadd.f32 %v814_v51, %v785_v25  ;;  %v929_v38 = vadd.f32 %v921_v41, %v892_v17  ;;  %v4615_v24 = vld [vmem:[#allocation14_spill] sm:$0xff]  ;;  %v995_v48 = vsel %vm919_vm5, %v4614_v20, %v4623_v10 }
 0x95e   : > { %v3585_v40 = vpop.permute.xlu2 %1273  ;;  %v994_v54 = vsel %vm919_vm5, %v4615_v24, %v4614_v20  ;;  %v993_v1 = vsel %vm919_vm5, %v4616_v12, %v4615_v24  ;;  %v966_v7 = vadd.f32 %v958_v56, %v930_v53  ;;  %v1065_v41 = vsel %vm1028_vm6, %v4626_v43, %v4625_v50  ;;  %v4634_v12 = vld [vmem:[#allocation66_spill] sm:$0xff]  ;;  %v4644_v43 = vld [vmem:[#allocation33_spill] sm:$0xff] }
 0x95f   : > { %v855_v28 = vadd.f32 %v847_v5, %v819_v33  ;;  %v3626_v36 = vpop.permute.xlu0 %1275  ;;  %v858_v8 = vadd.f32 %v850_v45, %v822_v0  ;;  %v965_v51 = vadd.f32 %v957_v9, %v929_v38  ;;  %v4619_v5 = vld [vmem:[#allocation15_spill] sm:$0xff]  ;;  %v4621_v33 = vld [vmem:[#allocation49_spill] sm:$0xff]  ;;  %v1101_v56 = vsel %vm1028_vm6, %v4629_v59, %v4628_v62  ;;  %v4641_v29 = vld [vmem:[#allocation74_spill] sm:$0xff] }
 0x960   : > { %v1031_v4 = vsel %vm1028_vm6, %v4619_v5, %v4618_v21  ;;  %v1030_v11 = vsel %vm1028_vm6, %v4620_v22, %v4619_v5  ;;  %v959_v14 = vsel %vm919_vm5, %v4609_v58, %v4621_v33  ;;  %v1002_v63 = vadd.f32 %v994_v54, %v966_v7  ;;  %v4635_v7 = vld [vmem:[#allocation61_spill] sm:$0xff]  ;;  %v4638_v22 = vld [vmem:[#allocation70_spill] sm:$0xff]  ;;  %v4646_v59 = vld [vmem:[#allocation60_spill] sm:$0xff] }
 0x961   : > { %v891_v46 = vadd.f32 %v883_v32, %v855_v28  ;;  %v894_v52 = vadd.f32 %v886_v49, %v858_v8  ;;  %v1001_v45 = vadd.f32 %v993_v1, %v965_v51  ;;  %v4624_v32 = vld [vmem:[#allocation16_spill] sm:$0xff]  ;;  %v1103_v49 = vsel %vm1028_vm6, %v4627_v18, %v3403_v16 }
 0x962   : > { %v1067_v35 = vsel %vm1028_vm6, %v4624_v32, %v3382_v3  ;;  %v1066_v2 = vsel %vm1028_vm6, %v4625_v50, %v4624_v32  ;;  %v1039_v28 = vadd.f32 %v1031_v4, %v1002_v63  ;;  %v1068_v51 = vsel %vm1028_vm6, %v3382_v3, %v4635_v7  ;;  %v4639_v63 = vld [vmem:[#allocation75_spill] sm:$0xff]  ;;  %v4640_v3 = vld [vmem:[#allocation22_spill] sm:$0xff] }
 0x963   : > { %v928_v39 = vadd.f32 %v920_v42, %v891_v46  ;;  %v931_v25 = vadd.f32 %v923_v26, %v894_v52  ;;  %v1038_v61 = vadd.f32 %v1030_v11, %v1001_v45  ;;  %v1102_v42 = vsel %vm1028_vm6, %v4628_v62, %v4627_v18  ;;  %v4631_v26 = vld [vmem:[#allocation18_spill] sm:$0xff]  ;;  %v4645_v18 = vld [vmem:[#allocation69_spill] sm:$0xff] }
 0x964   : > { %v1075_v53 = vadd.f32 %v1067_v35, %v1039_v28  ;;  %v1140_v57 = vsel %vm1137_vm7, %v4631_v26, %v4630_v37  ;;  %v1212_v45 = vsel %vm1137_vm7, %v4640_v3, %v4639_v63  ;;  %v4643_v35 = vld [vmem:[#allocation73_spill] sm:$0xff] }
 0x965   : > { %v964_v6 = vadd.f32 %v956_v30, %v928_v39  ;;  %v967_v8 = vadd.f32 %v959_v14, %v931_v25  ;;  %v1074_v58 = vadd.f32 %v1066_v2, %v1038_v61  ;;  %v4632_v30 = vld [vmem:[#allocation67_spill] sm:$0xff]  ;;  %v4633_v39 = vld [vmem:[#allocation57_spill] sm:$0xff]  ;;  %v1210_v50 = vsel %vm1137_vm7, %v4643_v35, %v4641_v29 }
 0x966   : > { %v3646_v34 = vpop.permute.xlu2 %1279  ;;  %v1139_v52 = vsel %vm1137_vm7, %v4632_v30, %v4631_v26  ;;  %v1032_v20 = vsel %vm1028_vm6, %v4618_v21, %v4633_v39  ;;  %v1111_v24 = vadd.f32 %v1103_v49, %v1075_v53  ;;  %v1138_v1 = vsel %vm1137_vm7, %v4634_v12, %v4632_v30 }
 0x967   : > { %v1000_v0 = vadd.f32 %v992_v15, %v964_v6  ;;  %v3687_v46 = vpop.permute.xlu0 %1281  ;;  %v1003_v9 = vadd.f32 %v995_v48, %v967_v8  ;;  %v1110_v54 = vadd.f32 %v1102_v42, %v1074_v58  ;;  %v4636_v15 = vld [vmem:[#allocation19_spill] sm:$0xff]  ;;  %v1248_v8 = vsel %vm1246_vm8, %v3519_v23, %v4644_v43 }
 0x968   : > { %v1176_v25 = vsel %vm1137_vm7, %v4636_v15, %v3433_v31  ;;  %v4637_v6 = vld [vmem:[#allocation71_spill] sm:$0xff]  ;;  %v1148_v21 = vadd.f32 %v1140_v57, %v1111_v24  ;;  %v1247_v42 = vsel %vm1246_vm8, %v3478_v55, %v3519_v23  ;;  %v1283_v55 = vsel %vm1246_vm8, %v3585_v40, %v3626_v36 }
 0x969   : > { %v1037_v17 = vadd.f32 %v1029_v27, %v1000_v0  ;;  %v1175_v5 = vsel %vm1137_vm7, %v4637_v6, %v4636_v15  ;;  %v1147_v4 = vadd.f32 %v1139_v52, %v1110_v54  ;;  %v1174_v11 = vsel %vm1137_vm7, %v4638_v22, %v4637_v6  ;;  %v4642_v0 = vld [vmem:[#allocation65_spill] sm:$0xff] }
 0x96a   : > { %v1040_v33 = vadd.f32 %v1032_v20, %v1003_v9  ;;  %v1211_v27 = vsel %vm1137_vm7, %v4641_v29, %v4640_v3  ;;  %v1104_v10 = vsel %vm1028_vm6, %v3403_v16, %v4642_v0  ;;  %v1184_v48 = vadd.f32 %v1176_v25, %v1148_v21 }
 0x96b   : > { %v1073_v38 = vadd.f32 %v1065_v41, %v1037_v17  ;;  %v1183_v32 = vadd.f32 %v1175_v5, %v1147_v4  ;;  %v1249_v41 = vsel %vm1246_vm8, %v4644_v43, %v3539_v47  ;;  %v1141_v16 = vsel %vm1137_vm7, %v4630_v37, %v4645_v18 }
 0x96c   : > { %v1076_v28 = vadd.f32 %v1068_v51, %v1040_v33  ;;  %v1220_v49 = vadd.f32 %v1212_v45, %v1184_v48  ;;  %v1284_v9 = vsel %vm1246_vm8, %v3626_v36, %v4646_v59  ;;  %v1213_v24 = vsel %vm1137_vm7, %v4639_v63, %v3468_v60 }
 0x96d   : > { %v1109_v13 = vadd.f32 %v1101_v56, %v1073_v38  ;;  %v1219_v62 = vadd.f32 %v1211_v27, %v1183_v32  ;;  %v1285_v56 = vsel %vm1246_vm8, %v4646_v59, %v3646_v34  ;;  %v4647_v38 = vld [vmem:[#allocation72_spill] sm:$0xff]  ;;  %v1250_v40 = vsel %vm1246_vm8, %v3539_v47, %v3580_v19  ;;  %v1352_v47 = vld [vmem:[%s4428_s2] sm:$0xf] }
 0x96e   : > { %v1112_v53 = vadd.f32 %v1104_v10, %v1076_v28  ;;  %v1177_v37 = vsel %vm1137_vm7, %v3433_v31, %v4647_v38  ;;  %v1257_v26 = vadd.f32 %v1249_v41, %v1220_v49  ;;  %v1286_v60 = vsel %vm1246_vm8, %v3646_v34, %v3687_v46 }
 0x96f   : > { %v1146_v14 = vadd.f32 %v1138_v1, %v1109_v13  ;;  %v1256_v57 = vadd.f32 %v1248_v8, %v1219_v62  ;;  %v1355_v3 = vperm.slane %v1352_v47, 1  ;;  %v1356_v34 = vperm.slane %v1352_v47, 2 }
 0x970   : > { %v1310_v44 = vpop.permute.xlu2 %1309  ;;  %v1149_v30 = vadd.f32 %v1141_v16, %v1112_v53  ;;  %v1293_v54 = vadd.f32 %v1285_v56, %v1257_v26  ;;  %v1354_v45 = vperm.slane %v1352_v47, 0  ;;  %v1357_v43 = vperm.slane %v1352_v47, 3  ;;  %v4648_v53 = vld [vmem:[#allocation64_spill] sm:$0xff] }
 0x971   : > { %v1182_v61 = vadd.f32 %v1174_v11, %v1146_v14  ;;  %v1292_v12 = vadd.f32 %v1284_v9, %v1256_v57  ;;  %v4650_v59 = vmov 7   ;;  %v4651_v56 = vmov 8  }
 0x972   : > { %v1185_v1 = vadd.f32 %v1177_v37, %v1149_v30  ;;  %v4652_v9 = vmov 9   ;;  %v4653_v38 = vmov 10   ;;  %v4654_v37 = vmov 11  }
 0x973   : > { %v1218_v58 = vadd.f32 %v1210_v50, %v1182_v61  ;;  %v4655_v26 = vmov 12   ;;  %v4656_v57 = vmov 13  }
 0x974   : > { %v1221_v15 = vadd.f32 %v1213_v24, %v1185_v1 }
 0x975   : > { %v1255_v52 = vadd.f32 %v1247_v42, %v1218_v58  ;;  %v4649_v58 = vmov 6  }
 0x976   : > { %v1258_v4 = vadd.f32 %v1250_v40, %v1221_v15  ;;  %v4662_v15 = vmov 19  }
 0x977   : > { %v1291_v7 = vadd.f32 %v1283_v55, %v1255_v52  ;;  %v4657_v55 = vmov 14   ;;  %v4659_v52 = vmov 16  }
 0x978   : > { %v1316_v23 = vpop.permute.xlu2 %1315  ;;  %v1294_v11 = vadd.f32 %v1286_v60, %v1258_v4  ;;  %v4663_v4 = vmov 20  }
 0x988   : > { %v1314_v2 = vpop.permute.xlu1 %1313 }
 0x989   : > { %v1312_v17 = vpop.permute.xlu0 %1311  ;;  %v1321_v39 = vsel %vm1246_vm8, %v1314_v2, %v1316_v23 }
 0x98a   : > { %v1320_v20 = vsel %vm1246_vm8, %v1312_v17, %v1314_v2  ;;  %v1319_v31 = vsel %vm1246_vm8, %v1310_v44, %v1312_v17  ;;  %v1329_v36 = vadd.f32 %v1321_v39, %v1293_v54 }
 0x98b   : > { %v1328_v51 = vadd.f32 %v1320_v20, %v1292_v12  ;;  %v1327_v25 = vadd.f32 %v1319_v31, %v1291_v7  ;;  %v4660_v20 = vmov 17   ;;  %v4661_v7 = vmov 18  }
 0x990   : > { %v1334_v13 = vpop.permute.xlu1 %1333 }
 0x991   : > { %v1318_v6 = vpop.permute.xlu0 %1317  ;;  %v1337_v5 = vadd.f32 %v1334_v13, %v1328_v51  ;;  %v1338_v21 = vadd.f32 %v1334_v13, %v1329_v36  ;;  %v1336_v44 = vadd.f32 %v1334_v13, %v1327_v25 }
 0x992   : > { %v1322_v22 = vsel %vm1246_vm8, %v1316_v23, %v1318_v6  ;;  %v4658_v23 = vmov 15  }
 0x993   : > { %v1345_v19 = vmul.f32 0.01, %v1337_v5  ;;  %v1346_v33 = vmul.f32 0.01, %v1338_v21  ;;  %vm1341_vm9 = vcmp.gt.f32.partialorder %v1337_v5, 0.0  ;;  %vm1342_vm10 = vcmp.gt.f32.partialorder %v1338_v21, 0.0 }
 0x994   : > { %v1344_v14 = vmul.f32 0.01, %v1336_v44  ;;  %v1330_v63 = vadd.f32 %v1322_v22, %v1294_v11  ;;  %vm1340_vm11 = vcmp.gt.f32.partialorder %v1336_v44, 0.0 }
 0x995   : > { %v1349_v29 = vsel %vm1341_vm9, %v1337_v5, %v1345_v19  ;;  %v1350_v27 = vsel %vm1342_vm10, %v1338_v21, %v1346_v33  ;;  %v4664_v19 = vmov 21  }
 0x996   : > { %v1348_v0 = vsel %vm1340_vm11, %v1336_v44, %v1344_v14  ;;  %v1339_v10 = vadd.f32 %v1334_v13, %v1330_v63  ;;  %v3770_v48 = vmul.f32 %v1355_v3, %v1349_v29  ;;  %v3772_v32 = vmul.f32 %v1356_v34, %v1350_v27 }
 0x997   : > { %v3774_v35 = vmul.f32 %v1354_v45, %v1348_v0  ;;  %v4665_v45 = vmov 22  }
 0x998   : > { %v1347_v50 = vmul.f32 0.01, %v1339_v10  ;;  %vm1343_vm12 = vcmp.gt.f32.partialorder %v1339_v10, 0.0  ;;  %v3777_v2 = vperm.slane %v3770_v48, 0  ;;  %v3780_v28 = vperm.slane %v3772_v32, 0 }
 0x999   : > { %v3768_v46 = vpop.permute.xlu1 %1396  ;;  %v3783_v61 = vperm.slane %v3774_v35, 0  ;;  %v3819_v30 = vpop.permute.xlu0 %1383  ;;  %v3828_v24 = vperm.slane %v3774_v35, 1  ;;  %v3831_v54 = vperm.slane %v3770_v48, 1  ;;  %v3843_v36 = vperm.slane %v3772_v32, 1 }
 0x99a   : > { %v1351_v8 = vsel %vm1343_vm12, %v1339_v10, %v1347_v50  ;;  %v3852_v6 = vperm.slane %v3770_v48, 2  ;;  %v3855_v60 = vperm.slane %v3774_v35, 2  ;;  %v3867_v22 = vperm.slane %v3772_v32, 2 }
 0x99b   : > { %v3790_v49 = vmul.f32 %v1357_v43, %v1351_v8  ;;  %v3876_v14 = vperm.slane %v3770_v48, 3  ;;  %v3879_v63 = vperm.slane %v3774_v35, 3  ;;  %v3891_v27 = vperm.slane %v3772_v32, 3 }
 0x99c   : > { %v4666_v35 = vmov 23   ;;  %v4667_v32 = vmov 24  }
 0x99d   : > { %v3794_v62 = vperm.slane %v3790_v49, 0  ;;  %v3840_v40 = vperm.slane %v3790_v49, 1  ;;  %v3864_v44 = vperm.slane %v3790_v49, 2  ;;  %v3887_v29 = vperm.slane %v3790_v49, 3 }
 0x99e   : > { %v4668_v49 = vmov 25  }
 0x9a2   : > { %v1423_v41 = vpop.permute.xlu1 %1422 }
 0x9a3   : > { %v1428_v17 = vmul.f32 %v1423_v41, %v3780_v28  ;;  %v1427_v18 = vmul.f32 %v1423_v41, %v3777_v2  ;;  %v1426_v16 = vmul.f32 %v1423_v41, %v3783_v61  ;;  %v1429_v42 = vmul.f32 %v3794_v62, %v1423_v41  ;;  %v3904_v41 = vpop.permute.xlu2 %1370 }
 0x9a5   : > { %1438 = vrot.lane.b32.xlu1 %v1428_v17, %s2715_s29  ;;  %1436 = vrot.lane.b32.xlu0 %v1427_v18, %s2715_s29 }
 0x9a6   : > { %1434 = vrot.lane.b32.xlu2 %v1426_v16, %s2715_s29 }
 0x9ad   : > { %1452 = vperm.xlu0 %2605, %v4648_v53  }
 0x9ae   : > { %1440 = vrot.lane.b32.xlu2 %v1429_v42, %s2715_s29 }
 0x9b5   : > { %2606 = vset.pattern.permute.xlu0 %v4649_v58  ;;  %v3915_v58 = vpop.permute.xlu2 %1409 }
 0x9b6   : > { %1482 = vperm.xlu0 %2606, %v4648_v53  }
 0x9be   : > { %2607 = vset.pattern.permute.xlu0 %v4650_v59 }
 0x9bf   : > { %1512 = vperm.xlu0 %2607, %v4648_v53  }
 0x9c7   : > { %2608 = vset.pattern.permute.xlu0 %v4651_v56 }
 0x9c8   : > { %1542 = vperm.xlu0 %2608, %v4648_v53  }
 0x9d0   : > { %2609 = vset.pattern.permute.xlu0 %v4652_v9  ;;  %v4669_v9 = vmov 26  }
 0x9d1   : > { %1571 = vperm.xlu0 %2609, %v4648_v53  }
 0x9d9   : > { %2610 = vset.pattern.permute.xlu0 %v4653_v38 }
 0x9da   : > { %1600 = vperm.xlu0 %2610, %v4648_v53  }
 0x9e2   : > { %2611 = vset.pattern.permute.xlu0 %v4654_v37 }
 0x9e3   : > { %1629 = vperm.xlu0 %2611, %v4648_v53  }
 0x9eb   : > { %2612 = vset.pattern.permute.xlu0 %v4655_v26 }
 0x9ec   : > { %1658 = vperm.xlu0 %2612, %v4648_v53  }
 0x9f4   : > { %2613 = vset.pattern.permute.xlu0 %v4656_v57 }
 0x9f5   : > { %1687 = vperm.xlu0 %2613, %v4648_v53  }
 0x9fd   : > { %2614 = vset.pattern.permute.xlu0 %v4657_v55  ;;  %v2740_v55 = vmov 27  }
 0x9fe   : > { %1716 = vperm.xlu0 %2614, %v4648_v53  }
 0xa00   : > { %v3922_v38 = vpop.permute.xlu2 %1434 }
 0xa06   : > { %2615 = vset.pattern.permute.xlu0 %v4658_v23 }
 0xa07   : > { %1745 = vperm.xlu0 %2615, %v4648_v53  }
 0xa08   : > { %v3932_v23 = vpop.permute.xlu2 %1440 }
 0xa0f   : > { %2616 = vset.pattern.permute.xlu0 %v4659_v52 }
 0xa10   : > { %1774 = vperm.xlu0 %2616, %v4648_v53  }
 0xa17   : > { %v3823_v39 = vpop.permute.xlu0 %1436 }
 0xa18   : > { %2617 = vset.pattern.permute.xlu0 %v4660_v20 }
 0xa19   : > { %1803 = vperm.xlu0 %2617, %v4648_v53  }
 0xa1f   : > { %v1453_v12 = vpop.permute.xlu0 %1452 }
 0xa20   : > { %v1456_v31 = vmul.f32 %v1453_v12, %v3828_v24  ;;  %v1457_v1 = vmul.f32 %v1453_v12, %v3831_v54  ;;  %v1459_v51 = vmul.f32 %v3840_v40, %v1453_v12  ;;  %v1458_v13 = vmul.f32 %v1453_v12, %v3843_v36 }
 0xa21   : > { %2618 = vset.pattern.permute.xlu0 %v4661_v7  ;;  %v2741_v12 = vmov 28  }
 0xa22   : > { %1832 = vperm.xlu0 %2618, %v4648_v53   ;;  %1466 = vrot.lane.b32.xlu2 %v1457_v1, %s2715_s29 }
 0xa23   : > { %1464 = vrot.lane.b32.xlu1 %v1456_v31, %s2715_s29 }
 0xa28   : > { %v1483_v25 = vpop.permute.xlu0 %1482 }
 0xa29   : > { %v1487_v5 = vmul.f32 %v1483_v25, %v3852_v6  ;;  %v1486_v21 = vmul.f32 %v1483_v25, %v3855_v60  ;;  %v1489_v11 = vmul.f32 %v3864_v44, %v1483_v25  ;;  %v1488_v47 = vmul.f32 %v1483_v25, %v3867_v22 }
 0xa2a   : > { %2619 = vset.pattern.permute.xlu0 %v4662_v15  ;;  %1470 = vrot.lane.b32.xlu2 %v1459_v51, %s2715_s29 }
 0xa2b   : > { %1468 = vrot.lane.b32.xlu1 %v1458_v13, %s2715_s29  ;;  %1861 = vperm.xlu0 %2619, %v4648_v53   ;;  %v2742_v13 = vmov 29  }
 0xa31   : > { %v1513_v33 = vpop.permute.xlu0 %1512 }
 0xa32   : > { %1496 = vrot.lane.b32.xlu2 %v1487_v5, %s2715_s29  ;;  %v1517_v3 = vmul.f32 %v1513_v33, %v3876_v14  ;;  %v1516_v34 = vmul.f32 %v1513_v33, %v3879_v63  ;;  %v1519_v0 = vmul.f32 %v3887_v29, %v1513_v33  ;;  %v1518_v10 = vmul.f32 %v1513_v33, %v3891_v27 }
 0xa33   : > { %1494 = vrot.lane.b32.xlu1 %v1486_v21, %s2715_s29  ;;  %2620 = vset.pattern.permute.xlu0 %v4663_v4  ;;  %v3954_v4 = vpop.permute.xlu1 %1438 }
 0xa34   : > { %1890 = vperm.xlu0 %2620, %v4648_v53  }
 0xa3a   : > { %1500 = vrot.lane.b32.xlu2 %v1489_v11, %s2715_s29  ;;  %v1543_v48 = vpop.permute.xlu0 %1542 }
 0xa3b   : > { %1498 = vrot.lane.b32.xlu1 %v1488_v47, %s2715_s29  ;;  %v1546_v50 = vmul.f32 %v1543_v48, %v3777_v2  ;;  %v1545_v43 = vmul.f32 %v1543_v48, %v3783_v61  ;;  %v1548_v8 = vmul.f32 %v1543_v48, %v3794_v62  ;;  %v1547_v17 = vmul.f32 %v1543_v48, %v3780_v28 }
 0xa3c   : > { %2621 = vset.pattern.permute.xlu0 %v4664_v19  ;;  %v2743_v47 = vmov 30  }
 0xa3d   : > { %1919 = vperm.xlu0 %2621, %v4648_v53  }
 0xa42   : > { %1526 = vrot.lane.b32.xlu2 %v1517_v3, %s2715_s29 }
 0xa43   : > { %1524 = vrot.lane.b32.xlu1 %v1516_v34, %s2715_s29  ;;  %v1572_v18 = vpop.permute.xlu0 %1571 }
 0xa44   : > { %v1575_v16 = vmul.f32 %v1572_v18, %v3831_v54  ;;  %v1574_v42 = vmul.f32 %v1572_v18, %v3828_v24  ;;  %v1577_v59 = vmul.f32 %v1572_v18, %v3840_v40  ;;  %v1576_v56 = vmul.f32 %v1572_v18, %v3843_v36 }
 0xa45   : > { %2622 = vset.pattern.permute.xlu0 %v4665_v45  ;;  %v2744_v45 = vmov 33  }
 0xa46   : > { %1948 = vperm.xlu0 %2622, %v4648_v53  }
 0xa4a   : > { %1530 = vrot.lane.b32.xlu2 %v1519_v0, %s2715_s29 }
 0xa4b   : > { %1528 = vrot.lane.b32.xlu1 %v1518_v10, %s2715_s29 }
 0xa4c   : > { %v1601_v37 = vpop.permute.xlu0 %1600 }
 0xa4d   : > { %v1604_v26 = vmul.f32 %v1601_v37, %v3852_v6  ;;  %v1603_v57 = vmul.f32 %v1601_v37, %v3855_v60  ;;  %v1606_v52 = vmul.f32 %v1601_v37, %v3864_v44  ;;  %v1605_v20 = vmul.f32 %v1601_v37, %v3867_v22 }
 0xa4e   : > { %2623 = vset.pattern.permute.xlu0 %v4666_v35 }
 0xa4f   : > { %1977 = vperm.xlu0 %2623, %v4648_v53  }
 0xa52   : > { %1555 = vrot.lane.b32.xlu2 %v1546_v50, %s2716_s8 }
 0xa53   : > { %1553 = vrot.lane.b32.xlu1 %v1545_v43, %s2716_s8  ;;  %v4670_v43 = vmov 0  }
 0xa55   : > { %v1630_v1 = vpop.permute.xlu0 %1629 }
 0xa56   : > { %v1633_v7 = vmul.f32 %v1630_v1, %v3876_v14  ;;  %v1632_v51 = vmul.f32 %v1630_v1, %v3879_v63  ;;  %v1635_v25 = vmul.f32 %v1630_v1, %v3887_v29  ;;  %v1634_v5 = vmul.f32 %v1630_v1, %v3891_v27 }
 0xa57   : > { %2624 = vset.pattern.permute.xlu0 %v4667_v32 }
 0xa58   : > { %2006 = vperm.xlu0 %2624, %v4648_v53  }
 0xa5a   : > { %1559 = vrot.lane.b32.xlu2 %v1548_v8, %s2716_s8 }
 0xa5b   : > { %1557 = vrot.lane.b32.xlu1 %v1547_v17, %s2716_s8 }
 0xa5e   : > { %v1659_v11 = vpop.permute.xlu0 %1658 }
 0xa5f   : > { %v1662_v19 = vmul.f32 %v1659_v11, %v3777_v2  ;;  %v1661_v33 = vmul.f32 %v1659_v11, %v3783_v61  ;;  %v1664_v0 = vmul.f32 %v1659_v11, %v3794_v62  ;;  %v1663_v10 = vmul.f32 %v1659_v11, %v3780_v28 }
 0xa60   : > { %2625 = vset.pattern.permute.xlu0 %v4668_v49 }
 0xa61   : > { %2035 = vperm.xlu0 %2625, %v4648_v53  }
 0xa62   : > { %1584 = vrot.lane.b32.xlu2 %v1575_v16, %s2716_s8 }
 0xa63   : > { %1582 = vrot.lane.b32.xlu1 %v1574_v42, %s2716_s8 }
 0xa67   : > { %v1688_v35 = vpop.permute.xlu0 %1687 }
 0xa68   : > { %v1691_v32 = vmul.f32 %v1688_v35, %v3831_v54  ;;  %v1690_v8 = vmul.f32 %v1688_v35, %v3828_v24  ;;  %v1693_v18 = vmul.f32 %v1688_v35, %v3840_v40  ;;  %v1692_v16 = vmul.f32 %v1688_v35, %v3843_v36 }
 0xa69   : > { %2626 = vset.pattern.permute.xlu0 %v4669_v9 }
 0xa6a   : > { %2064 = vperm.xlu0 %2626, %v4648_v53   ;;  %1588 = vrot.lane.b32.xlu2 %v1577_v59, %s2716_s8 }
 0xa6b   : > { %1586 = vrot.lane.b32.xlu1 %v1576_v56, %s2716_s8 }
 0xa70   : > { %v1717_v42 = vpop.permute.xlu0 %1716 }
 0xa71   : > { %v1720_v56 = vmul.f32 %v1717_v42, %v3852_v6  ;;  %v1719_v9 = vmul.f32 %v1717_v42, %v3855_v60 }
 0xa72   : > { %2627 = vset.pattern.permute.xlu0 %v2740_v55  ;;  %1613 = vrot.lane.b32.xlu2 %v1604_v26, %s2716_s8  ;;  %v1721_v55 = vmul.f32 %v1717_v42, %v3867_v22 }
 0xa73   : > { %1611 = vrot.lane.b32.xlu1 %v1603_v57, %s2716_s8  ;;  %2093 = vperm.xlu0 %2627, %v4648_v53   ;;  %v1722_v57 = vmul.f32 %v1717_v42, %v3864_v44 }
 0xa7a   : > { %1617 = vrot.lane.b32.xlu2 %v1606_v52, %s2716_s8 }
 0xa7b   : > { %1615 = vrot.lane.b32.xlu1 %v1605_v20, %s2716_s8  ;;  %2628 = vset.pattern.permute.xlu0 %v2741_v12  ;;  %v1746_v20 = vpop.permute.xlu0 %1745 }
 0xa7c   : > { %2122 = vperm.xlu0 %2628, %v4648_v53   ;;  %v3939_v31 = vpop.permute.xlu2 %1466  ;;  %v1749_v1 = vmul.f32 %v1746_v20, %v3876_v14 }
 0xa82   : > { %1642 = vrot.lane.b32.xlu2 %v1633_v7, %s2716_s8  ;;  %v1748_v7 = vmul.f32 %v1746_v20, %v3879_v63 }
 0xa83   : > { %1640 = vrot.lane.b32.xlu1 %v1632_v51, %s2716_s8 }
 0xa84   : > { %2629 = vset.pattern.permute.xlu0 %v2742_v13  ;;  %v3945_v15 = vpop.permute.xlu2 %1470 }
 0xa85   : > { %2151 = vperm.xlu0 %2629, %v4648_v53  }
 0xa8a   : > { %1646 = vrot.lane.b32.xlu2 %v1635_v25, %s2716_s8  ;;  %v1751_v25 = vmul.f32 %v1746_v20, %v3887_v29 }
 0xa8b   : > { %1644 = vrot.lane.b32.xlu1 %v1634_v5, %s2716_s8  ;;  %v1750_v5 = vmul.f32 %v1746_v20, %v3891_v27 }
 0xa8c   : > { %v3952_v21 = vpop.permute.xlu2 %1496 }
 0xa8d   : > { %2630 = vset.pattern.permute.xlu0 %v2743_v47  ;;  %v1775_v47 = vpop.permute.xlu0 %1774 }
 0xa8e   : > { %2180 = vperm.xlu0 %2630, %v4648_v53   ;;  %v1780_v35 = vmul.f32 %v1775_v47, %v3794_v62 }
 0xa92   : > { %1671 = vrot.lane.b32.xlu2 %v1662_v19, %s2718_s9 }
 0xa93   : > { %1669 = vrot.lane.b32.xlu1 %v1661_v33, %s2718_s9  ;;  %v1778_v33 = vmul.f32 %v1775_v47, %v3777_v2 }
 0xa94   : > { %v3961_v3 = vpop.permute.xlu2 %1500 }
 0xa95   : > { %v3963_v34 = vpop.permute.xlu1 %1464  ;;  %v1804_v42 = vpop.permute.xlu0 %1803 }
 0xa96   : > { %2633 = vset.pattern.permute.xlu0 %v2744_v45  ;;  %v1777_v45 = vmul.f32 %v1775_v47, %v3783_v61  ;;  %v1806_v20 = vmul.f32 %v1804_v42, %v3828_v24 }
 0xa97   : > { %2267 = vperm.xlu0 %2633, %v4648_v53  }
 0xa9a   : > { %1675 = vrot.lane.b32.xlu2 %v1664_v0, %s2718_s9 }
 0xa9b   : > { %1673 = vrot.lane.b32.xlu1 %v1663_v10, %s2718_s9 }
 0xa9c   : > { %v3970_v48 = vpop.permute.xlu2 %1526 }
 0xa9d   : > { %v3972_v50 = vpop.permute.xlu1 %1468 }
 0xa9f   : > { %2637 = vset.pattern.permute.xlu0 %v4670_v43 }
 0xaa2   : > { %1700 = vrot.lane.b32.xlu2 %v1691_v32, %s2718_s9  ;;  %v1779_v32 = vmul.f32 %v1775_v47, %v3780_v28  ;;  %v1415_v47 = vmul.f32 %v3879_v63, %v3915_v58 }
 0xaa3   : > { %1698 = vrot.lane.b32.xlu1 %v1690_v8, %s2718_s9  ;;  %v1376_v8 = vmul.f32 %v3783_v61, %v3904_v41 }
 0xaa4   : > { %v3979_v53 = vpop.permute.xlu2 %1530 }
 0xaa5   : > { %v3981_v17 = vpop.permute.xlu1 %1494 }
 0xaaa   : > { %1704 = vrot.lane.b32.xlu2 %v1693_v18, %s2718_s9  ;;  %v1389_v18 = vmul.f32 %v3828_v24, %v3819_v30 }
 0xaab   : > { %1702 = vrot.lane.b32.xlu1 %v1692_v16, %s2718_s9 }
 0xaac   : > { %v3987_v49 = vpop.permute.xlu2 %1555 }
 0xaad   : > { %v3989_v59 = vpop.permute.xlu1 %1498 }
 0xab2   : > { %1729 = vrot.lane.b32.xlu2 %v1720_v56, %s2718_s9 }
 0xab3   : > { %1727 = vrot.lane.b32.xlu1 %v1719_v9, %s2718_s9  ;;  %v1392_v9 = vadd.f32 %v1389_v18, %v1376_v8  ;;  %v1809_v8 = vmul.f32 %v1804_v42, %v3840_v40  ;;  %v1472_v18 = vsel %vm477_vm1, %v3963_v34, %v3939_v31 }
 0xab4   : > { %v3995_v37 = vpop.permute.xlu2 %1559 }
 0xab5   : > { %v1525_v26 = vpop.permute.xlu1 %1524 }
 0xaba   : > { %1733 = vrot.lane.b32.xlu2 %v1722_v57, %s2718_s9  ;;  %v1807_v57 = vmul.f32 %v1804_v42, %v3831_v54 }
 0xabb   : > { %1731 = vrot.lane.b32.xlu1 %v1721_v55, %s2718_s9  ;;  %v1402_v55 = vmul.f32 %v3855_v60, %v3768_v46 }
 0xabc   : > { %v4001_v52 = vpop.permute.xlu2 %1584 }
 0xabd   : > { %v4003_v12 = vpop.permute.xlu1 %1528 }
 0xac2   : > { %1758 = vrot.lane.b32.xlu2 %v1749_v1, %s2718_s9  ;;  %v1377_v1 = vmul.f32 %v3777_v2, %v3904_v41 }
 0xac3   : > { %1756 = vrot.lane.b32.xlu1 %v1748_v7, %s2718_s9  ;;  %v1390_v7 = vmul.f32 %v3831_v54, %v3819_v30 }
 0xac4   : > { %v4009_v51 = vpop.permute.xlu2 %1588 }
 0xac5   : > { %v1554_v13 = vpop.permute.xlu1 %1553 }
 0xaca   : > { %1762 = vrot.lane.b32.xlu2 %v1751_v25, %s2718_s9  ;;  %v1405_v25 = vadd.f32 %v1402_v55, %v1392_v9  ;;  %v1403_v9 = vmul.f32 %v3852_v6, %v3768_v46  ;;  %v1808_v55 = vmul.f32 %v1804_v42, %v3843_v36 }
 0xacb   : > { %1760 = vrot.lane.b32.xlu1 %v1750_v5, %s2718_s9 }
 0xacc   : > { %v4015_v11 = vpop.permute.xlu2 %1613 }
 0xacd   : > { %v4017_v19 = vpop.permute.xlu1 %1557 }
 0xad2   : > { %1787 = vrot.lane.b32.xlu2 %v1778_v33, %s2722_s13 }
 0xad3   : > { %1785 = vrot.lane.b32.xlu1 %v1777_v45, %s2722_s13  ;;  %v1442_v45 = vsel %vm477_vm1, %v3922_v38, %v3823_v39 }
 0xad4   : > { %v4023_v0 = vpop.permute.xlu2 %1617 }
 0xad5   : > { %v1583_v10 = vpop.permute.xlu1 %1582 }
 0xada   : > { %1791 = vrot.lane.b32.xlu2 %v1780_v35, %s2722_s13  ;;  %v1393_v35 = vadd.f32 %v1390_v7, %v1377_v1  ;;  %v1532_v7 = vsel %vm477_vm1, %v1525_v26, %v3970_v48  ;;  %v1378_v26 = vmul.f32 %v3780_v28, %v3904_v41  ;;  %v1503_v41 = vsel %vm477_vm1, %v3952_v21, %v3989_v59 }
 0xadb   : > { %1789 = vrot.lane.b32.xlu1 %v1779_v32, %s2722_s13  ;;  %v1418_v32 = vadd.f32 %v1415_v47, %v1405_v25  ;;  %v1416_v25 = vmul.f32 %v3876_v14, %v3915_v58  ;;  %v1833_v47 = vpop.permute.xlu0 %1832 }
 0xadc   : > { %v4033_v16 = vpop.permute.xlu2 %1642  ;;  %v1406_v38 = vadd.f32 %v1403_v9, %v1393_v35  ;;  %v1561_v35 = vsel %vm592_vm2, %v1554_v13, %v3987_v49  ;;  %v1473_v9 = vsel %vm477_vm1, %v3939_v31, %v3972_v50  ;;  %v1835_v13 = vmul.f32 %v1833_v47, %v3855_v60 }
 0xadd   : > { %v4035_v56 = vpop.permute.xlu1 %1586 }
 0xae2   : > { %1816 = vrot.lane.b32.xlu2 %v1807_v57, %s2722_s13  ;;  %v1448_v57 = vadd.f32 %v1442_v45, %v1418_v32  ;;  %v1419_v32 = vadd.f32 %v1416_v25, %v1406_v38 }
 0xae3   : > { %1814 = vrot.lane.b32.xlu1 %v1806_v20, %s2722_s13  ;;  %v1502_v20 = vsel %vm477_vm1, %v3981_v17, %v3952_v21  ;;  %v1443_v17 = vsel %vm477_vm1, %v3823_v39, %v3954_v4  ;;  %v1391_v39 = vmul.f32 %v3843_v36, %v3819_v30  ;;  %v1533_v30 = vsel %vm477_vm1, %v3970_v48, %v4003_v12 }
 0xae4   : > { %v4047_v5 = vpop.permute.xlu2 %1646  ;;  %v1478_v1 = vadd.f32 %v1472_v18, %v1448_v57  ;;  %v1836_v18 = vmul.f32 %v1833_v47, %v3852_v6  ;;  %v1590_v57 = vsel %vm592_vm2, %v1583_v10, %v4001_v52  ;;  %v1562_v21 = vsel %vm592_vm2, %v3987_v49, %v4017_v19 }
 0xae5   : > { %v1612_v33 = vpop.permute.xlu1 %1611  ;;  %v1591_v48 = vsel %vm592_vm2, %v4001_v52, %v4035_v56  ;;  %v1444_v52 = vsel %vm477_vm1, %v3954_v4, %v3932_v23  ;;  %v1504_v23 = vsel %vm477_vm1, %v3989_v59, %v3961_v3  ;;  %v1592_v3 = vsel %vm592_vm2, %v4035_v56, %v4009_v51 }
 0xae6   : > { %v1508_v42 = vadd.f32 %v1502_v20, %v1478_v1  ;;  %v1619_v38 = vsel %vm592_vm2, %v1612_v33, %v4015_v11 }
 0xaea   : > { %1820 = vrot.lane.b32.xlu2 %v1809_v8, %s2722_s13  ;;  %v1538_v8 = vadd.f32 %v1532_v7, %v1508_v42  ;;  %v1394_v7 = vadd.f32 %v1391_v39, %v1378_v26 }
 0xaeb   : > { %1818 = vrot.lane.b32.xlu1 %v1808_v55, %s2722_s13  ;;  %v1449_v55 = vadd.f32 %v1443_v17, %v1419_v32 }
 0xaec   : > { %v4068_v34 = vpop.permute.xlu2 %1671  ;;  %v1567_v20 = vadd.f32 %v1561_v35, %v1538_v8  ;;  %v1404_v35 = vmul.f32 %v3867_v22, %v3768_v46  ;;  %v1417_v46 = vmul.f32 %v3891_v27, %v3915_v58 }
 0xaed   : > { %v4072_v45 = vpop.permute.xlu1 %1615  ;;  %v1479_v31 = vadd.f32 %v1473_v9, %v1449_v55  ;;  %v1837_v9 = vmul.f32 %v1833_v47, %v3867_v22 }
 0xaee   : > { %v1596_v1 = vadd.f32 %v1590_v57, %v1567_v20  ;;  %v1407_v26 = vadd.f32 %v1404_v35, %v1394_v7  ;;  %v1620_v49 = vsel %vm592_vm2, %v4015_v11, %v4072_v45  ;;  %v1474_v11 = vsel %vm477_vm1, %v3972_v50, %v3945_v15 }
 0xaef   : > { %v1509_v25 = vadd.f32 %v1503_v41, %v1479_v31  ;;  %v1534_v15 = vsel %vm477_vm1, %v4003_v12, %v3979_v53 }
 0xaf0   : > { %v1625_v42 = vadd.f32 %v1619_v38, %v1596_v1 }
 0xaf1   : > { %v1539_v32 = vadd.f32 %v1533_v30, %v1509_v25 }
 0xaf2   : > { %1845 = vrot.lane.b32.xlu2 %v1836_v18, %s2722_s13  ;;  %v1838_v18 = vmul.f32 %v1833_v47, %v3864_v44  ;;  %v1862_v47 = vpop.permute.xlu0 %1861 }
 0xaf3   : > { %1843 = vrot.lane.b32.xlu1 %v1835_v13, %s2722_s13  ;;  %v1568_v57 = vadd.f32 %v1562_v21, %v1539_v32  ;;  %v1420_v13 = vadd.f32 %v1417_v46, %v1407_v26  ;;  %v1865_v30 = vmul.f32 %v1862_v47, %v3876_v14  ;;  %v1864_v7 = vmul.f32 %v1862_v47, %v3879_v63 }
 0xaf4   : > { %v1676_v10 = vpop.permute.xlu2 %1675  ;;  %v1621_v21 = vsel %vm592_vm2, %v4072_v45, %v4023_v0 }
 0xaf5   : > { %v1641_v17 = vpop.permute.xlu1 %1640  ;;  %v1597_v39 = vadd.f32 %v1591_v48, %v1568_v57  ;;  %v1450_v31 = vadd.f32 %v1444_v52, %v1420_v13 }
 0xaf6   : > { %v1648_v33 = vsel %vm592_vm2, %v1641_v17, %v4033_v16  ;;  %v1867_v17 = vmul.f32 %v1862_v47, %v3887_v29 }
 0xaf7   : > { %v1654_v8 = vadd.f32 %v1648_v33, %v1625_v42  ;;  %v1626_v20 = vadd.f32 %v1620_v49, %v1597_v39  ;;  %v1480_v4 = vadd.f32 %v1474_v11, %v1450_v31 }
 0xaf9   : > { %v1510_v50 = vadd.f32 %v1504_v23, %v1480_v4 }
 0xafa   : > { %1849 = vrot.lane.b32.xlu2 %v1838_v18, %s2722_s13  ;;  %v1891_v56 = vpop.permute.xlu0 %1890 }
 0xafb   : > { %1847 = vrot.lane.b32.xlu1 %v1837_v9, %s2722_s13  ;;  %v1540_v25 = vadd.f32 %v1534_v15, %v1510_v50  ;;  %v1894_v0 = vmul.f32 %v1891_v56, %v3777_v2  ;;  %v1893_v45 = vmul.f32 %v1891_v56, %v3783_v61  ;;  %v1896_v39 = vmul.f32 %v1891_v56, %v3794_v62 }
 0xafc   : > { %v1701_v55 = vpop.permute.xlu2 %1700 }
 0xafd   : > { %v1645_v41 = vpop.permute.xlu1 %1644 }
 0xafe   : > { %v1649_v38 = vsel %vm592_vm2, %v4033_v16, %v1645_v41  ;;  %v1650_v58 = vsel %vm592_vm2, %v1645_v41, %v4047_v5  ;;  %v1563_v16 = vsel %vm592_vm2, %v4017_v19, %v3995_v37  ;;  %v1866_v37 = vmul.f32 %v1862_v47, %v3891_v27 }
 0xaff   : > { %v1655_v1 = vadd.f32 %v1649_v38, %v1626_v20  ;;  %v1569_v53 = vadd.f32 %v1563_v16, %v1540_v25 }
 0xb01   : > { %v1598_v19 = vadd.f32 %v1592_v3, %v1569_v53 }
 0xb02   : > { %1874 = vrot.lane.b32.xlu2 %v1865_v30, %s2722_s13  ;;  %v1920_v52 = vpop.permute.xlu0 %1919 }
 0xb03   : > { %1872 = vrot.lane.b32.xlu1 %v1864_v7, %s2722_s13  ;;  %v1627_v33 = vadd.f32 %v1621_v21, %v1598_v19  ;;  %v1923_v38 = vmul.f32 %v1920_v52, %v3831_v54  ;;  %v1925_v4 = vmul.f32 %v1920_v52, %v3840_v40 }
 0xb04   : > { %v1705_v5 = vpop.permute.xlu2 %1704 }
 0xb05   : > { %v1670_v42 = vpop.permute.xlu1 %1669  ;;  %v1656_v35 = vadd.f32 %v1650_v58, %v1627_v33  ;;  %v1922_v58 = vmul.f32 %v1920_v52, %v3828_v24 }
 0xb06   : > { %v1677_v59 = vsel %vm701_vm3, %v1670_v42, %v4068_v34 }
 0xb07   : > { %v1683_v12 = vadd.f32 %v1677_v59, %v1654_v8 }
 0xb0a   : > { %1878 = vrot.lane.b32.xlu2 %v1867_v17, %s2722_s13  ;;  %v1949_v15 = vpop.permute.xlu0 %1948 }
 0xb0b   : > { %1876 = vrot.lane.b32.xlu1 %v1866_v37, %s2722_s13  ;;  %v1952_v3 = vmul.f32 %v1949_v15, %v3852_v6  ;;  %v1951_v59 = vmul.f32 %v1949_v15, %v3855_v60  ;;  %v1954_v37 = vmul.f32 %v1949_v15, %v3864_v44  ;;  %v1953_v19 = vmul.f32 %v1949_v15, %v3867_v22  ;;  %s2661_s13 = scalar_lea.hbm %s4433_s7, 24 }
 0xb0c   : > { %v1730_v51 = vpop.permute.xlu2 %1729 }
 0xb0d   : > { %v1674_v32 = vpop.permute.xlu1 %1673 }
 0xb0e   : > { %v1678_v8 = vsel %vm701_vm3, %v4068_v34, %v1674_v32  ;;  %v1679_v18 = vsel %vm701_vm3, %v1674_v32, %v1676_v10  ;;  %v1895_v34 = vmul.f32 %v1891_v56, %v3780_v28 }
 0xb0f   : > { %v1684_v48 = vadd.f32 %v1678_v8, %v1655_v1  ;;  %v1685_v26 = vadd.f32 %v1679_v18, %v1656_v35 }
 0xb12   : > { %1903 = vrot.lane.b32.xlu2 %v1894_v0, %s2726_s14 }
 0xb13   : > { %1901 = vrot.lane.b32.xlu1 %v1893_v45, %s2726_s14 }
 0xb14   : > { %v1734_v9 = vpop.permute.xlu2 %1733 }
 0xb15   : > { %v1699_v57 = vpop.permute.xlu1 %1698 }
 0xb16   : > { %v1706_v49 = vsel %vm701_vm3, %v1699_v57, %v1701_v55 }
 0xb17   : > { %v1712_v46 = vadd.f32 %v1706_v49, %v1683_v12 }
 0xb1a   : > { %1907 = vrot.lane.b32.xlu2 %v1896_v39, %s2726_s14 }
 0xb1b   : > { %1905 = vrot.lane.b32.xlu1 %v1895_v34, %s2726_s14 }
 0xb1c   : > { %v1759_v10 = vpop.permute.xlu2 %1758 }
 0xb1d   : > { %v1703_v13 = vpop.permute.xlu1 %1702 }
 0xb1e   : > { %v1707_v47 = vsel %vm701_vm3, %v1701_v55, %v1703_v13  ;;  %v1708_v20 = vsel %vm701_vm3, %v1703_v13, %v1705_v5  ;;  %v1924_v55 = vmul.f32 %v1920_v52, %v3843_v36 }
 0xb1f   : > { %v1713_v41 = vadd.f32 %v1707_v47, %v1684_v48  ;;  %v1714_v11 = vadd.f32 %v1708_v20, %v1685_v26 }
 0xb22   : > { %1932 = vrot.lane.b32.xlu2 %v1923_v38, %s2726_s14 }
 0xb23   : > { %1930 = vrot.lane.b32.xlu1 %v1922_v58, %s2726_s14 }
 0xb24   : > { %v1763_v31 = vpop.permute.xlu2 %1762 }
 0xb25   : > { %v1728_v1 = vpop.permute.xlu1 %1727 }
 0xb26   : > { %v1735_v30 = vsel %vm701_vm3, %v1728_v1, %v1730_v51 }
 0xb27   : > { %v1741_v23 = vadd.f32 %v1735_v30, %v1712_v46 }
 0xb2a   : > { %1936 = vrot.lane.b32.xlu2 %v1925_v4, %s2726_s14 }
 0xb2b   : > { %1934 = vrot.lane.b32.xlu1 %v1924_v55, %s2726_s14 }
 0xb2c   : > { %v1788_v7 = vpop.permute.xlu2 %1787 }
 0xb2d   : > { %v1732_v50 = vpop.permute.xlu1 %1731 }
 0xb2e   : > { %v1736_v16 = vsel %vm701_vm3, %v1730_v51, %v1732_v50  ;;  %v1737_v5 = vsel %vm701_vm3, %v1732_v50, %v1734_v9  ;;  %v1978_v51 = vpop.permute.xlu0 %1977 }
 0xb2f   : > { %v1742_v25 = vadd.f32 %v1736_v16, %v1713_v41  ;;  %v1743_v42 = vadd.f32 %v1737_v5, %v1714_v11  ;;  %v1981_v48 = vmul.f32 %v1978_v51, %v3876_v14  ;;  %v1980_v26 = vmul.f32 %v1978_v51, %v3879_v63 }
 0xb30   : > { %v1983_v49 = vmul.f32 %v1978_v51, %v3887_v29  ;;  %v1982_v46 = vmul.f32 %v1978_v51, %v3891_v27 }
 0xb32   : > { %1961 = vrot.lane.b32.xlu2 %v1952_v3, %s2726_s14 }
 0xb33   : > { %1959 = vrot.lane.b32.xlu1 %v1951_v59, %s2726_s14 }
 0xb34   : > { %v1792_v53 = vpop.permute.xlu2 %1791 }
 0xb35   : > { %v1757_v12 = vpop.permute.xlu1 %1756 }
 0xb36   : > { %v1764_v17 = vsel %vm701_vm3, %v1757_v12, %v1759_v10  ;;  %v2007_v34 = vpop.permute.xlu0 %2006 }
 0xb37   : > { %v1770_v21 = vadd.f32 %v1764_v17, %v1741_v23  ;;  %v2010_v41 = vmul.f32 %v2007_v34, %v3777_v2  ;;  %v2009_v11 = vmul.f32 %v2007_v34, %v3783_v61  ;;  %v2012_v30 = vmul.f32 %v2007_v34, %v3794_v62 }
 0xb38   : > { %v2011_v23 = vmul.f32 %v2007_v34, %v3780_v28 }
 0xb3a   : > { %1965 = vrot.lane.b32.xlu2 %v1954_v37, %s2726_s14 }
 0xb3b   : > { %1963 = vrot.lane.b32.xlu1 %v1953_v19, %s2726_s14 }
 0xb3c   : > { %v1817_v33 = vpop.permute.xlu2 %1816 }
 0xb3d   : > { %v1761_v56 = vpop.permute.xlu1 %1760 }
 0xb3e   : > { %v1765_v35 = vsel %vm701_vm3, %v1759_v10, %v1761_v56  ;;  %v1766_v32 = vsel %vm701_vm3, %v1761_v56, %v1763_v31  ;;  %v2036_v55 = vpop.permute.xlu0 %2035 }
 0xb3f   : > { %v1771_v8 = vadd.f32 %v1765_v35, %v1742_v25  ;;  %v1772_v18 = vadd.f32 %v1766_v32, %v1743_v42  ;;  %v2039_v25 = vmul.f32 %v2036_v55, %v3831_v54  ;;  %v2038_v42 = vmul.f32 %v2036_v55, %v3828_v24 }
 0xb40   : > { %v2041_v17 = vmul.f32 %v2036_v55, %v3840_v40 }
 0xb42   : > { %1990 = vrot.lane.b32.xlu2 %v1981_v48, %s2726_s14 }
 0xb43   : > { %1988 = vrot.lane.b32.xlu1 %v1980_v26, %s2726_s14 }
 0xb44   : > { %v1821_v0 = vpop.permute.xlu2 %1820 }
 0xb45   : > { %v1786_v45 = vpop.permute.xlu1 %1785 }
 0xb46   : > { %v1793_v9 = vsel %vm810_vm4, %v1786_v45, %v1788_v7  ;;  %v2065_v19 = vpop.permute.xlu0 %2064 }
 0xb47   : > { %v1799_v57 = vadd.f32 %v1793_v9, %v1770_v21  ;;  %v2040_v21 = vmul.f32 %v2036_v55, %v3843_v36  ;;  %v2070_v9 = vmul.f32 %v2065_v19, %v3864_v44 }
 0xb4a   : > { %1994 = vrot.lane.b32.xlu2 %v1983_v49, %s2726_s14 }
 0xb4b   : > { %1992 = vrot.lane.b32.xlu1 %v1982_v46, %s2726_s14  ;;  %s284_s14 = sand.u32 1, %s2695_s25  }
 0xb4c   : > { %v1846_v39 = vpop.permute.xlu2 %1845  ;;  %s2388_s22 = scalar_lea.sflag [#allocation3], %s284_s14 }
 0xb4d   : > { %v1790_v10 = vpop.permute.xlu1 %1789 }
 0xb4e   : > { %v1794_v52 = vsel %vm810_vm4, %v1788_v7, %v1790_v10  ;;  %v1795_v13 = vsel %vm810_vm4, %v1790_v10, %v1792_v53  ;;  %v2094_v46 = vpop.permute.xlu0 %2093 }
 0xb4f   : > { %v1800_v47 = vadd.f32 %v1794_v52, %v1771_v8  ;;  %v1801_v20 = vadd.f32 %v1795_v13, %v1772_v18  ;;  %v2068_v8 = vmul.f32 %v2065_v19, %v3852_v6  ;;  %v2067_v18 = vmul.f32 %v2065_v19, %v3855_v60 }
 0xb52   : > { %2019 = vrot.lane.b32.xlu2 %v2010_v41, %s2730_s15 }
 0xb53   : > { %2017 = vrot.lane.b32.xlu1 %v2009_v11, %s2730_s15 }
 0xb54   : > { %v1850_v38 = vpop.permute.xlu2 %1849 }
 0xb55   : > { %v1815_v58 = vpop.permute.xlu1 %1814 }
 0xb56   : > { %v1822_v31 = vsel %vm810_vm4, %v1815_v58, %v1817_v33 }
 0xb57   : > { %v1828_v1 = vadd.f32 %v1822_v31, %v1799_v57  ;;  %v2069_v57 = vmul.f32 %v2065_v19, %v3867_v22  ;;  %v2099_v31 = vmul.f32 %v2094_v46, %v3887_v29 }
 0xb5a   : > { %2023 = vrot.lane.b32.xlu2 %v2012_v30, %s2730_s15 }
 0xb5b   : > { %2021 = vrot.lane.b32.xlu1 %v2011_v23, %s2730_s15  ;;  %v2123_v23 = vpop.permute.xlu0 %2122 }
 0xb5c   : > { %v1875_v4 = vpop.permute.xlu2 %1874 }
 0xb5d   : > { %v1819_v7 = vpop.permute.xlu1 %1818 }
 0xb5e   : > { %v1823_v15 = vsel %vm810_vm4, %v1817_v33, %v1819_v7  ;;  %v1824_v50 = vsel %vm810_vm4, %v1819_v7, %v1821_v0 }
 0xb5f   : > { %v1829_v16 = vadd.f32 %v1823_v15, %v1800_v47  ;;  %v1830_v5 = vadd.f32 %v1824_v50, %v1801_v20  ;;  %v2097_v47 = vmul.f32 %v2094_v46, %v3876_v14  ;;  %v2096_v20 = vmul.f32 %v2094_v46, %v3879_v63 }
 0xb62   : > { %2048 = vrot.lane.b32.xlu2 %v2039_v25, %s2730_s15 }
 0xb63   : > { %2046 = vrot.lane.b32.xlu1 %v2038_v42, %s2730_s15  ;;  %v2152_v19 = vpop.permute.xlu0 %2151 }
 0xb64   : > { %v1879_v3 = vpop.permute.xlu2 %1878 }
 0xb65   : > { %v1844_v59 = vpop.permute.xlu1 %1843 }
 0xb66   : > { %v1851_v53 = vsel %vm810_vm4, %v1844_v59, %v1846_v39 }
 0xb67   : > { %v1857_v12 = vadd.f32 %v1851_v53, %v1828_v1  ;;  %v2098_v1 = vmul.f32 %v2094_v46, %v3891_v27  ;;  %v2128_v53 = vmul.f32 %v2123_v23, %v3794_v62 }
 0xb6a   : > { %2052 = vrot.lane.b32.xlu2 %v2041_v17, %s2730_s15  ;;  %v2746_v17 = vmov 32  }
 0xb6b   : > { %2050 = vrot.lane.b32.xlu1 %v2040_v21, %s2730_s15  ;;  %2632 = vset.pattern.permute.xlu2 %v2746_v17  ;;  %v2127_v21 = vmul.f32 %v2123_v23, %v3780_v28 }
 0xb6c   : > { %v1904_v37 = vpop.permute.xlu2 %1903 }
 0xb6d   : > { %v1848_v33 = vpop.permute.xlu1 %1847 }
 0xb6e   : > { %v1852_v51 = vsel %vm810_vm4, %v1846_v39, %v1848_v33  ;;  %v1853_v56 = vsel %vm810_vm4, %v1848_v33, %v1850_v38 }
 0xb6f   : > { %v1858_v35 = vadd.f32 %v1852_v51, %v1829_v16  ;;  %v1859_v32 = vadd.f32 %v1853_v56, %v1830_v5  ;;  %v2126_v16 = vmul.f32 %v2123_v23, %v3777_v2  ;;  %v2125_v5 = vmul.f32 %v2123_v23, %v3783_v61 }
 0xb72   : > { %2077 = vrot.lane.b32.xlu2 %v2068_v8, %s2730_s15  ;;  %v2155_v8 = vmul.f32 %v2152_v19, %v3831_v54 }
 0xb73   : > { %2075 = vrot.lane.b32.xlu1 %v2067_v18, %s2730_s15  ;;  %v2154_v18 = vmul.f32 %v2152_v19, %v3828_v24 }
 0xb74   : > { %v1908_v48 = vpop.permute.xlu2 %1907 }
 0xb75   : > { %v1873_v26 = vpop.permute.xlu1 %1872 }
 0xb76   : > { %v1880_v0 = vsel %vm810_vm4, %v1873_v26, %v1875_v4 }
 0xb77   : > { %v1886_v45 = vadd.f32 %v1880_v0, %v1857_v12  ;;  %v2745_v12 = vmov 31  }
 0xb78   : > { %2631 = vset.pattern.permute.xlu1 %v2745_v12 }
 0xb7a   : > { %2081 = vrot.lane.b32.xlu2 %v2070_v9, %s2730_s15  ;;  %v2157_v9 = vmul.f32 %v2152_v19, %v3840_v40 }
 0xb7b   : > { %2079 = vrot.lane.b32.xlu1 %v2069_v57, %s2730_s15  ;;  %v2156_v57 = vmul.f32 %v2152_v19, %v3843_v36 }
 0xb7c   : > { %v1933_v49 = vpop.permute.xlu2 %1932 }
 0xb7d   : > { %v1877_v39 = vpop.permute.xlu1 %1876 }
 0xb7e   : > { %v1881_v34 = vsel %vm810_vm4, %v1875_v4, %v1877_v39  ;;  %v1882_v10 = vsel %vm810_vm4, %v1877_v39, %v1879_v3 }
 0xb7f   : > { %v1887_v52 = vadd.f32 %v1881_v34, %v1858_v35  ;;  %v1888_v13 = vadd.f32 %v1882_v10, %v1859_v32 }
 0xb82   : > { %2106 = vrot.lane.b32.xlu2 %v2097_v47, %s2730_s15 }
 0xb83   : > { %2104 = vrot.lane.b32.xlu1 %v2096_v20, %s2730_s15 }
 0xb84   : > { %v1937_v41 = vpop.permute.xlu2 %1936 }
 0xb85   : > { %v1902_v11 = vpop.permute.xlu1 %1901 }
 0xb86   : > { %v1909_v38 = vsel %vm919_vm5, %v1902_v11, %v1904_v37 }
 0xb87   : > { %v1915_v58 = vadd.f32 %v1909_v38, %v1886_v45 }
 0xb8a   : > { %2110 = vrot.lane.b32.xlu2 %v2099_v31, %s2730_s15  ;;  %v2640_v31 = vld [vmem:[%s4431_s5] sm:$0xff] }
 0xb8b   : > { %2108 = vrot.lane.b32.xlu1 %v2098_v1, %s2730_s15  ;;  %s2484_s15 = smul.u32 12, %s284_s14 }
 0xb8c   : > { %v1962_v30 = vpop.permute.xlu2 %1961 }
 0xb8d   : > { %v1906_v4 = vpop.permute.xlu1 %1905  ;;  %s286_s20 = scalar_lea.vmem [#allocation2], %s2484_s15 }
 0xb8e   : > { %v1910_v55 = vsel %vm919_vm5, %v1904_v37, %v1906_v4  ;;  %v1911_v7 = vsel %vm919_vm5, %v1906_v4, %v1908_v48 }
 0xb8f   : > { %v1916_v15 = vadd.f32 %v1910_v55, %v1887_v52  ;;  %v1917_v50 = vadd.f32 %v1911_v7, %v1888_v13 }
 0xb92   : > { %2135 = vrot.lane.b32.xlu2 %v2126_v16, %s2734_s16 }
 0xb93   : > { %2133 = vrot.lane.b32.xlu1 %v2125_v5, %s2734_s16 }
 0xb94   : > { %v1966_v25 = vpop.permute.xlu2 %1965 }
 0xb95   : > { %v1931_v42 = vpop.permute.xlu1 %1930 }
 0xb96   : > { %v1938_v3 = vsel %vm919_vm5, %v1931_v42, %v1933_v49 }
 0xb97   : > { %v1944_v59 = vadd.f32 %v1938_v3, %v1915_v58 }
 0xb9a   : > { %2139 = vrot.lane.b32.xlu2 %v2128_v53, %s2734_s16 }
 0xb9b   : > { %2137 = vrot.lane.b32.xlu1 %v2127_v21, %s2734_s16 }
 0xb9c   : > { %v1991_v37 = vpop.permute.xlu2 %1990 }
 0xb9d   : > { %v1935_v33 = vpop.permute.xlu1 %1934 }
 0xb9e   : > { %v1939_v51 = vsel %vm919_vm5, %v1933_v49, %v1935_v33  ;;  %v1940_v56 = vsel %vm919_vm5, %v1935_v33, %v1937_v41  ;;  %v2181_v49 = vpop.permute.xlu0 %2180 }
 0xb9f   : > { %v1945_v35 = vadd.f32 %v1939_v51, %v1916_v15  ;;  %v1946_v32 = vadd.f32 %v1940_v56, %v1917_v50  ;;  %v2184_v47 = vmul.f32 %v2181_v49, %v3852_v6  ;;  %v2183_v20 = vmul.f32 %v2181_v49, %v3855_v60 }
 0xba0   : > { %v2747_v15 = vmov 35   ;;  %v2748_v50 = vmov 34   ;;  %v2186_v42 = vmul.f32 %v2181_v49, %v3864_v44  ;;  %v2185_v3 = vmul.f32 %v2181_v49, %v3867_v22 }
 0xba2   : > { %2164 = vrot.lane.b32.xlu2 %v2155_v8, %s2734_s16 }
 0xba3   : > { %2162 = vrot.lane.b32.xlu1 %v2154_v18, %s2734_s16 }
 0xba4   : > { %v1995_v48 = vpop.permute.xlu2 %1994 }
 0xba5   : > { %v1960_v26 = vpop.permute.xlu1 %1959 }
 0xba6   : > { %v1967_v0 = vsel %vm919_vm5, %v1960_v26, %v1962_v30 }
 0xba7   : > { %v1973_v45 = vadd.f32 %v1967_v0, %v1944_v59 }
 0xbaa   : > { %2168 = vrot.lane.b32.xlu2 %v2157_v9, %s2734_s16 }
 0xbab   : > { %2166 = vrot.lane.b32.xlu1 %v2156_v57, %s2734_s16 }
 0xbac   : > { %v2020_v39 = vpop.permute.xlu2 %2019 }
 0xbad   : > { %v1964_v46 = vpop.permute.xlu1 %1963 }
 0xbae   : > { %v1968_v34 = vsel %vm919_vm5, %v1962_v30, %v1964_v46  ;;  %v1969_v10 = vsel %vm919_vm5, %v1964_v46, %v1966_v25 }
 0xbaf   : > { %v1974_v52 = vadd.f32 %v1968_v34, %v1945_v35  ;;  %v1975_v13 = vadd.f32 %v1969_v10, %v1946_v32 }
 0xbb2   : > { %2193 = vrot.lane.b32.xlu2 %v2184_v47, %s2734_s16 }
 0xbb3   : > { %2191 = vrot.lane.b32.xlu1 %v2183_v20, %s2734_s16 }
 0xbb4   : > { %v2024_v58 = vpop.permute.xlu2 %2023 }
 0xbb5   : > { %v1989_v41 = vpop.permute.xlu1 %1988 }
 0xbb6   : > { %v1996_v11 = vsel %vm919_vm5, %v1989_v41, %v1991_v37 }
 0xbb7   : > { %v2002_v38 = vadd.f32 %v1996_v11, %v1973_v45 }
 0xbba   : > { %2238 = vperm.xlu2 %2632, %v2640_v31  }
 0xbbb   : > { %2209 = vperm.xlu1 %2631, %v2640_v31  }
 0xbbc   : > { %v2049_v7 = vpop.permute.xlu2 %2048 }
 0xbbd   : > { %v1993_v1 = vpop.permute.xlu1 %1992 }
 0xbbe   : > { %v1997_v30 = vsel %vm919_vm5, %v1991_v37, %v1993_v1  ;;  %v1998_v23 = vsel %vm919_vm5, %v1993_v1, %v1995_v48 }
 0xbbf   : > { %v2003_v4 = vadd.f32 %v1997_v30, %v1974_v52  ;;  %v2004_v55 = vadd.f32 %v1998_v23, %v1975_v13 }
 0xbc2   : > { %2635 = vset.pattern.permute.xlu2 %v2747_v15 }
 0xbc3   : > { %2634 = vset.pattern.permute.xlu1 %v2748_v50  ;;  %2325 = vperm.xlu2 %2635, %v2640_v31  }
 0xbc4   : > { %2296 = vperm.xlu1 %2634, %v2640_v31   ;;  %v2053_v59 = vpop.permute.xlu2 %2052 }
 0xbc5   : > { %v2018_v16 = vpop.permute.xlu1 %2017 }
 0xbc6   : > { %v2025_v5 = vsel %vm1028_vm6, %v2018_v16, %v2020_v39 }
 0xbc7   : > { %v2031_v25 = vadd.f32 %v2025_v5, %v2002_v38 }
 0xbcb   : > { %2197 = vrot.lane.b32.xlu2 %v2186_v42, %s2734_s16 }
 0xbcc   : > { %2195 = vrot.lane.b32.xlu1 %v2185_v3, %s2734_s16  ;;  %2636 = vset.pattern.permute.xlu2 %v4670_v43  ;;  %v2078_v19 = vpop.permute.xlu2 %2077 }
 0xbcd   : > { %v2022_v53 = vpop.permute.xlu1 %2021 }
 0xbce   : > { %v2026_v12 = vsel %vm1028_vm6, %v2020_v39, %v2022_v53  ;;  %v2027_v17 = vsel %vm1028_vm6, %v2022_v53, %v2024_v58 }
 0xbcf   : > { %v2032_v21 = vadd.f32 %v2026_v12, %v2003_v4  ;;  %v2033_v37 = vadd.f32 %v2027_v17, %v2004_v55 }
 0xbd4   : > { %v2082_v18 = vpop.permute.xlu2 %2081 }
 0xbd5   : > { %v2047_v33 = vpop.permute.xlu1 %2046 }
 0xbd6   : > { %v2054_v51 = vsel %vm1028_vm6, %v2047_v33, %v2049_v7 }
 0xbd7   : > { %v2060_v56 = vadd.f32 %v2054_v51, %v2031_v25 }
 0xbdc   : > { %v2107_v9 = vpop.permute.xlu2 %2106 }
 0xbdd   : > { %v2051_v35 = vpop.permute.xlu1 %2050 }
 0xbde   : > { %v2055_v32 = vsel %vm1028_vm6, %v2049_v7, %v2051_v35  ;;  %v2056_v8 = vsel %vm1028_vm6, %v2051_v35, %v2053_v59 }
 0xbdf   : > { %v2061_v48 = vadd.f32 %v2055_v32, %v2032_v21  ;;  %v2062_v43 = vadd.f32 %v2056_v8, %v2033_v37 }
 0xbe4   : > { %v2111_v10 = vpop.permute.xlu2 %2110 }
 0xbe5   : > { %v2076_v26 = vpop.permute.xlu1 %2075 }
 0xbe6   : > { %v2083_v0 = vsel %vm1028_vm6, %v2076_v26, %v2078_v19 }
 0xbe7   : > { %v2089_v45 = vadd.f32 %v2083_v0, %v2060_v56 }
 0xbec   : > { %v2136_v20 = vpop.permute.xlu2 %2135 }
 0xbed   : > { %v2080_v57 = vpop.permute.xlu1 %2079 }
 0xbee   : > { %v2084_v49 = vsel %vm1028_vm6, %v2078_v19, %v2080_v57  ;;  %v2085_v46 = vsel %vm1028_vm6, %v2080_v57, %v2082_v18 }
 0xbef   : > { %v2090_v39 = vadd.f32 %v2084_v49, %v2061_v48  ;;  %v2091_v34 = vadd.f32 %v2085_v46, %v2062_v43 }
 0xbf4   : > { %v2140_v23 = vpop.permute.xlu2 %2139 }
 0xbf5   : > { %v2105_v52 = vpop.permute.xlu1 %2104 }
 0xbf6   : > { %v2112_v13 = vsel %vm1028_vm6, %v2105_v52, %v2107_v9 }
 0xbf7   : > { %v2118_v47 = vadd.f32 %v2112_v13, %v2089_v45 }
 0xbfc   : > { %v2165_v5 = vpop.permute.xlu2 %2164 }
 0xbfd   : > { %v2109_v41 = vpop.permute.xlu1 %2108 }
 0xbfe   : > { %v2113_v11 = vsel %vm1028_vm6, %v2107_v9, %v2109_v41  ;;  %v2114_v38 = vsel %vm1028_vm6, %v2109_v41, %v2111_v10  ;;  %v2268_v9 = vpop.permute.xlu0 %2267 }
 0xbff   : > { %v2119_v58 = vadd.f32 %v2113_v11, %v2090_v39  ;;  %v2120_v31 = vadd.f32 %v2114_v38, %v2091_v34  ;;  %v2270_v57 = vmul.f32 %v2268_v9, %v3828_v24  ;;  %v2272_v34 = vmul.f32 %v2268_v9, %v3843_v36  ;;  %v4671_v11 = vld [vmem:[#allocation20_spill] sm:$0xff] }
 0xc00   : > { %v2273_v24 = vmul.f32 %v2268_v9, %v3840_v40  ;;  %v4355_v38 = vmul.f32 0.00390625, %v4671_v11 }
 0xc04   : > { %v2169_v59 = vpop.permute.xlu2 %2168 }
 0xc05   : > { %v2134_v1 = vpop.permute.xlu1 %2133 }
 0xc06   : > { %v2141_v30 = vsel %vm1137_vm7, %v2134_v1, %v2136_v20 }
 0xc07   : > { %v2147_v4 = vadd.f32 %v2141_v30, %v2118_v47 }
 0xc0c   : > { %v2194_v19 = vpop.permute.xlu2 %2193 }
 0xc0d   : > { %v2138_v55 = vpop.permute.xlu1 %2137 }
 0xc0e   : > { %v2142_v7 = vsel %vm1137_vm7, %v2136_v20, %v2138_v55  ;;  %v2143_v15 = vsel %vm1137_vm7, %v2138_v55, %v2140_v23 }
 0xc0f   : > { %v2148_v50 = vadd.f32 %v2142_v7, %v2119_v58  ;;  %v2149_v16 = vadd.f32 %v2143_v15, %v2120_v31 }
 0xc14   : > { %v2239_v48 = vpop.permute.xlu2 %2238 }
 0xc15   : > { %v2163_v25 = vpop.permute.xlu1 %2162  ;;  %v2241_v43 = vmul.f32 %v2239_v48, %v3783_v61  ;;  %v2242_v26 = vmul.f32 %v2239_v48, %v3777_v2  ;;  %v2244_v49 = vmul.f32 %v2239_v48, %v3794_v62  ;;  %v2243_v61 = vmul.f32 %v2239_v48, %v3780_v28 }
 0xc16   : > { %v2170_v42 = vsel %vm1137_vm7, %v2163_v25, %v2165_v5  ;;  %v2271_v62 = vmul.f32 %v2268_v9, %v3831_v54 }
 0xc17   : > { %v2176_v3 = vadd.f32 %v2170_v42, %v2147_v4 }
 0xc1d   : > { %v2167_v53 = vpop.permute.xlu1 %2166  ;;  %v2326_v40 = vpop.permute.xlu2 %2325 }
 0xc1e   : > { %v2171_v12 = vsel %vm1137_vm7, %v2165_v5, %v2167_v53  ;;  %v2172_v17 = vsel %vm1137_vm7, %v2167_v53, %v2169_v59  ;;  %v2328_v54 = vmul.f32 %v2326_v40, %v3879_v63  ;;  %v2329_v36 = vmul.f32 %v2326_v40, %v3876_v14 }
 0xc1f   : > { %v2177_v21 = vadd.f32 %v2171_v12, %v2148_v50  ;;  %v4300_v37 = vadd.f32 %v2172_v17, %v2149_v16 }
 0xc25   : > { %v2192_v33 = vpop.permute.xlu1 %2191 }
 0xc26   : > { %v2199_v51 = vsel %vm1137_vm7, %v2192_v33, %v2194_v19 }
 0xc27   : > { %v4303_v56 = vadd.f32 %v2199_v51, %v2176_v3 }
 0xc2d   : > { %v2210_v35 = vpop.permute.xlu1 %2209 }
 0xc2e   : > { %v2212_v32 = vmul.f32 %v2210_v35, %v3879_v63  ;;  %v2213_v8 = vmul.f32 %v2210_v35, %v3876_v14  ;;  %v2214_v18 = vmul.f32 %v2210_v35, %v3891_v27  ;;  %v2215_v45 = vmul.f32 %v2210_v35, %v3887_v29 }
 0xc30   : > { %2224 = vrot.lane.b32.xlu2 %v2214_v18, %s2734_s16  ;;  %2222 = vrot.lane.b32.xlu1 %v2213_v8, %s2734_s16 }
 0xc31   : > { %2220 = vrot.lane.b32.xlu0 %v2212_v32, %s2734_s16 }
 0xc36   : > { %v2297_v0 = vpop.permute.xlu1 %2296 }
 0xc37   : > { %v2300_v28 = vmul.f32 %v2297_v0, %v3852_v6  ;;  %v2301_v10 = vmul.f32 %v2297_v0, %v3867_v22  ;;  %v2299_v52 = vmul.f32 %v2297_v0, %v3855_v60  ;;  %v2302_v13 = vmul.f32 %v2297_v0, %v3864_v44  ;;  %v1367_v6 = vld [vmem:[%s4432_s6] sm:$0xff]  ;;  %v2198_v44 = vpop.permute.xlu2 %2197 }
 0xc38   : > { %2251 = vrot.lane.b32.xlu2 %v2242_v26, %s2738_s17  ;;  %2249 = vrot.lane.b32.xlu1 %v2241_v43, %s2738_s17  ;;  %v2331_v60 = vmul.f32 %v2326_v40, %v3887_v29  ;;  %v2330_v22 = vmul.f32 %v2326_v40, %v3891_v27  ;;  %v340_v29 = vmul.f32 %v4355_v38, %v4355_v38  ;;  %v4672_v27 = vld [vmem:[#allocation21_spill] sm:$0xff] }
 0xc39   : > { %2226 = vrot.lane.b32.xlu0 %v2215_v45, %s2734_s16  ;;  %v339_v1 = vmul.f32 0.00390625, %v4672_v27  ;;  %s2487_s16 = smul.u32 12, %s2811_s28  ;;  %s2401_s28 = sshll.u32 %s286_s20, 4  ;;  %s2402_s28 = int_to_ptr.vmem [resolvable:$true] %s2401_s28 }
 0xc3b   : > { %v341_v23 = vsub.f32 %v339_v1, %v340_v29  ;;  %s2399_s19 = scalar_lea.hbm %s4433_s7, %s2487_s16 }
 0xc3c   : > { %s2403_s21 = sshll.u32 %s2399_s19, 4  ;;  %s2404_s21 = int_to_ptr.hbm [resolvable:$true] %s2403_s21 }
 0xc3d   : > { %v350_v7 = vadd.f32 1e-05, %v341_v23  ;;  %s2655_s23 = sshra.s32 %s2404_s21, 4  ;;  %s2656_s23 = int_to_ptr.hbm [resolvable:$true] %s2655_s23 }
 0xc3e   : > { %v4319_v46 = vpop.permute.xlu1 %2195  ;;  %s2657_s29 = scalar_lea.hbm %s2656_s23, 12  ;;  %p2662_p0 = scmp.lt.s32.totalorder %s2656_s23, %s4433_s7 }
 0xc3f   : > { %v2200_v2 = vsel %vm1137_vm7, %v2194_v19, %v4319_v46  ;;  %2638 = vrsqrt.f32 %v350_v7  ;;  %v2201_v35 = vsel %vm1137_vm7, %v4319_v46, %v2198_v44  ;;  %vm357_vm13 = vweird.f32 %v350_v7  ;;  %p2658_p11 = scmp.ne.s32.totalorder %s2656_s23, %s2657_s29  ;;  %p2663_p1 = scmp.lt.s32.totalorder %s2661_s13, %s2657_s29 }
 0xc40   : > { %v4324_v39 = vadd.f32 %v2200_v2, %v2177_v21  ;;  %2255 = vrot.lane.b32.xlu1 %v2244_v49, %s2738_s17  ;;  %2278 = vrot.lane.b32.xlu2 %v2270_v57, %s2738_s17  ;;  %v2207_v0 = vadd.f32 %v2201_v35, %v4300_v37  ;;  %v2749_v57 = vmov 839922192  }
 0xc41   : > { %2253 = vrot.lane.b32.xlu0 %v2243_v61, %s2738_s17  ;;  %v344_v49 = vunpack.c.l.s4 %v2749_v57  ;;  %p2659_p12 = pnand %p2658_p11, %p2828_p5  ;;  %p2664_p2 = por %p2663_p1, %p2662_p0 }
 0xc43   : > { %p2660_p13 = pneg %p2659_p12 }
 0xc45   : > { %v2639_v5 = vpop.eup %2638  ;;  %p2665_p3 = pnand %p2664_p2, %p2660_p13 }
 0xc46   : > { %v352_v25 = vmul.f32 %v2639_v5, %v350_v7  ;;  %vm358_vm14 = vweird.f32 %v2639_v5 }
 0xc47   : > { %vm4378_vm15 = vmor %vm357_vm13, %vm358_vm14 }
 0xc48   : > { %2282 = vrot.lane.b32.xlu1 %v2272_v34, %s2738_s17  ;;  %2284 = vrot.lane.b32.xlu2 %v2273_v24, %s2738_s17  ;;  %v353_v21 = vmul.f32 %v2639_v5, %v352_v25 }
 0xc49   : > { %2280 = vrot.lane.b32.xlu0 %v2271_v62, %s2738_s17 }
 0xc4a   : > { %v354_v8 = vmul.f32 0.5, %v353_v21 }
 0xc4c   : > { %v355_v34 = vsub.f32 1.5, %v354_v8 }
 0xc50   : > { %2309 = vrot.lane.b32.xlu1 %v2300_v28, %s2738_s17  ;;  %2311 = vrot.lane.b32.xlu2 %v2301_v10, %s2738_s17 }
 0xc51   : > { %2307 = vrot.lane.b32.xlu0 %v2299_v52, %s2738_s17 }
 0xc58   : > { %2336 = vrot.lane.b32.xlu1 %v2328_v54, %s2738_s17  ;;  %2338 = vrot.lane.b32.xlu2 %v2329_v36, %s2738_s17  ;;  %v345_v54 = vunpack.c.0.s8 %v344_v49 }
 0xc59   : > { %2313 = vrot.lane.b32.xlu0 %v2302_v13, %s2738_s17 }
 0xc60   : > { %2342 = vrot.lane.b32.xlu1 %v2331_v60, %s2738_s17  ;;  %2355 = vperm.xlu2 %2636, %v1367_v6   ;;  %v356_v6 = vmul.f32 %v2639_v5, %v355_v34 }
 0xc61   : > { %2340 = vrot.lane.b32.xlu0 %v2330_v22, %s2738_s17 }
 0xc8a   : > { %v2225_v14 = vpop.permute.xlu2 %2224 }
 0xc92   : > { %v2252_v63 = vpop.permute.xlu2 %2251 }
 0xc9a   : > { %v2279_v41 = vpop.permute.xlu2 %2278 }
 0xca2   : > { %v2223_v47 = vpop.permute.xlu1 %2222  ;;  %v2285_v30 = vpop.permute.xlu2 %2284 }
 0xca3   : > { %v2221_v20 = vpop.permute.xlu0 %2220  ;;  %v2229_v18 = vsel %vm1137_vm7, %v2223_v47, %v2225_v14 }
 0xca4   : > { %v2228_v42 = vsel %vm1137_vm7, %v2221_v20, %v2223_v47  ;;  %v2235_v24 = vadd.f32 %v2229_v18, %v4324_v39  ;;  %v346_v20 = vperm.slane %v4355_v38, %v345_v54  ;;  %v4676_v38 = vld [vmem:[#allocation6_spill] sm:$0xff] }
 0xca5   : > { %v2234_v17 = vadd.f32 %v2228_v42, %v4303_v56 }
 0xca6   : > { %v349_v7 = vsub.f32 %v4676_v38, %v346_v20 }
 0xcaa   : > { %v2250_v58 = vpop.permute.xlu1 %2249  ;;  %v2312_v15 = vpop.permute.xlu2 %2311 }
 0xcab   : > { %v2227_v31 = vpop.permute.xlu0 %2226  ;;  %v2257_v59 = vsel %vm1246_vm8, %v2250_v58, %v2252_v63  ;;  %v360_v58 = vsel %vm4378_vm15, %v2639_v5, %v356_v6 }
 0xcac   : > { %v2263_v33 = vadd.f32 %v2257_v59, %v2234_v17  ;;  %v2230_v48 = vsel %vm1137_vm7, %v2225_v14, %v2227_v31 }
 0xcad   : > { %v2236_v62 = vadd.f32 %v2230_v48, %v2207_v0 }
 0xcb2   : > { %v2256_v4 = vpop.permute.xlu1 %2255  ;;  %v2339_v53 = vpop.permute.xlu2 %2338 }
 0xcb3   : > { %v2254_v55 = vpop.permute.xlu0 %2253 }
 0xcb4   : > { %v2258_v61 = vsel %vm1246_vm8, %v2252_v63, %v2254_v55  ;;  %v2259_v46 = vsel %vm1246_vm8, %v2254_v55, %v2256_v4  ;;  %v365_v4 = vperm.slane %v360_v58, %v345_v54 }
 0xcb5   : > { %v2264_v52 = vadd.f32 %v2258_v61, %v2235_v24  ;;  %v2265_v40 = vadd.f32 %v2259_v46, %v2236_v62 }
 0xcb6   : > { %v368_v42 = vmul.f32 %v365_v4, %v349_v7 }
 0xcba   : > { %v2283_v50 = vpop.permute.xlu1 %2282  ;;  %v2356_v9 = vpop.permute.xlu2 %2355 }
 0xcbb   : > { %v2281_v16 = vpop.permute.xlu0 %2280  ;;  %v2288_v28 = vsel %vm1246_vm8, %v2283_v50, %v2285_v30  ;;  %v4675_v30 = vld [vmem:[#allocation5_spill] sm:$0xff] }
 0xcbc   : > { %v2286_v19 = vsel %vm1246_vm8, %v2279_v41, %v2281_v16  ;;  %v2287_v10 = vsel %vm1246_vm8, %v2281_v16, %v2283_v50  ;;  %v2294_v60 = vadd.f32 %v2288_v28, %v2265_v40  ;;  %v348_v23 = vsub.f32 %v4675_v30, %v346_v20 }
 0xcbd   : > { %v2292_v32 = vadd.f32 %v2286_v19, %v2263_v33  ;;  %v2293_v39 = vadd.f32 %v2287_v10, %v2264_v52 }
 0xcbe   : > { %v367_v25 = vmul.f32 %v365_v4, %v348_v23 }
 0xcc2   : > { %v2310_v3 = vpop.permute.xlu1 %2309 }
 0xcc3   : > { %v2308_v12 = vpop.permute.xlu0 %2307  ;;  %v2316_v36 = vsel %vm1246_vm8, %v2310_v3, %v2312_v15 }
 0xcc4   : > { %v2315_v51 = vsel %vm1246_vm8, %v2308_v12, %v2310_v3  ;;  %v2322_v14 = vadd.f32 %v2316_v36, %v2293_v39 }
 0xcc5   : > { %v2321_v43 = vadd.f32 %v2315_v51, %v2292_v32 }
 0xcca   : > { %v2337_v26 = vpop.permute.xlu1 %2336 }
 0xccb   : > { %v2344_v56 = vsel %vm1246_vm8, %v2337_v26, %v2339_v53  ;;  %v2314_v45 = vpop.permute.xlu0 %2313 }
 0xccc   : > { %v2350_v2 = vadd.f32 %v2344_v56, %v2321_v43  ;;  %v2317_v13 = vsel %vm1246_vm8, %v2312_v15, %v2314_v45 }
 0xccd   : > { %v2323_v63 = vadd.f32 %v2317_v13, %v2294_v60 }
 0xcce   : > { %v2358_v37 = vadd.f32 %v2356_v9, %v2350_v2 }
 0xcd0   : > { %2374 = vst.sshfl [vmem:[#allocation1] sm:$0xff pattern:$0x75316420] %v2358_v37  ;;  %v2361_v15 = vadd.f32 1.0, %v2358_v37 }
 0xcd2   : > { %v2343_v44 = vpop.permute.xlu1 %2342 }
 0xcd3   : > { %v2341_v47 = vpop.permute.xlu0 %2340 }
 0xcd4   : > { %v2345_v41 = vsel %vm1246_vm8, %v2339_v53, %v2341_v47  ;;  %v2346_v11 = vsel %vm1246_vm8, %v2341_v47, %v2343_v44 }
 0xcd5   : > { %v2351_v31 = vadd.f32 %v2345_v41, %v2322_v14  ;;  %v2352_v29 = vadd.f32 %v2346_v11, %v2323_v63 }
 0xcd7   : > { %v2359_v27 = vadd.f32 %v2356_v9, %v2351_v31  ;;  %v2360_v1 = vadd.f32 %v2356_v9, %v2352_v29 }
 0xcd9   : > { %v2362_v55 = vadd.f32 1.0, %v2359_v27  ;;  %2375 = vst.sshfl [vmem:[#allocation1 + $0x8] sm:$0xff pattern:$0x75316420] %v2359_v27  ;;  %v2363_v16 = vadd.f32 1.0, %v2360_v1 }
 0xcda   : > { %2376 = vst.sshfl [vmem:[#allocation1 + $0x10] sm:$0xff pattern:$0x75316420] %v2360_v1 }
 0xcdb   : > { %v2366_v50 = vrot.slane %v2362_v55, 4  ;;  %v2370_v59 = vmul.f32 %v2363_v16, %v368_v42 }
 0xcdd   : > { %v2367_v5 = vsel %vm310_vm0, %v2361_v15, %v2366_v50 }
 0xcde   : > { %v2369_v3 = vmul.f32 %v2367_v5, %v367_v25 }
 0xce0   : > { %v2378_v53 = vld [vmem:[#allocation1 + $0x1] ss:$2 sm:$0xff] }
 0xce1   : > { %v2380_v12 = vld [vmem:[#allocation1 + $0x11] ss:$2 sm:$0xff]  ;;  %v2383_v17 = vadd.f32 %v2378_v53, %v2369_v3 }
 0xce2   : > { %v2384_v21 = vadd.f32 %v2380_v12, %v2370_v59 }
 0xce3   : > { %2385 = vst [vmem:[%s286_s20] sm:$0xff] %v2383_v17 }
 0xce4   : > { %2386 = vst [vmem:[%s286_s20 + $0x8] sm:$0xf] %v2384_v21 }
 0xce5   : > { %2668 = shalt.err (!%p2665_p3)
}
 0xce6   : > { %2488 = dma.vmem_to_hbm [thread:$0]  (%p2828_p5), %s2402_s28, 192, %s2404_s21, %s2388_s22  }
 0xce7 PF: > { %p2494_p4 = scmp.ge.s32.totalorder %s2703_s27, 2  ;;  %s2415_s14 = sand.u32 1, %s2691_s24  }
 0xce8   : > { %s2416_s17 = scalar_lea.sflag [#allocation3], %s2415_s14 }
 0xce9   : > { %p2491_p7 = pnand %p2494_p4, %p2832_p6 }
 0xceb   : > { %p2492_p8 = pneg %p2491_p7 }
 0xced   : > { %2686 = dma.done.wait (%p2492_p8), %s2416_s17, 192  }
 0xcee   : > { %2688 = vsyncadd (%p2492_p8), %s2416_s17, 4294967104  ;;  %p17_p9 = scmp.ge.s32.totalorder %s2815_s30, 4   ;;  %s4677_s24 = smov %s2695_s25 }
 0xcef   : > { %s4678_s25 = smov %s2699_s26  ;;  %s4679_s26 = smov %s2826_s10 }
 0xcf0   : > { %s4680_s27 = smov %s2815_s30  ;;  %19 = sbr.rel (!%p17_p9) target bundleno = 3 (0x3), region = 90 }
 0xcf5   :  { %2422 = vsyncpa [#allocation3], 1 }
 0xcf6   :  { %2424 = vsyncpa [#allocation3 + $0x1], 1 }

</bundles_post_ra>
